<compile_context>
chip_gen: v6e
topology: v6e:2x2x1
jax: 0.10.0
libtpu: 0.0.40
codegen_flags: <defaults>
</compile_context>

<pallas_src>
from functools import partial

import jax
import jax.numpy as jnp
from jax import lax
from jax.experimental import pallas as pl
from jax.experimental.pallas import tpu as pltpu


# ---------------------------------------------------------------------------
# Fused BasicBlock kernel (one batch block per grid step)
# ---------------------------------------------------------------------------
def _basic_block_kernel(*refs, H, W, Cin, Cout, stride, has_proj, B):
    """Ref order: activations (1 ref stride=1 / 4 phase refs stride=2),
    w1(9*Cin,Cout), b1, w2(9*Cout,Cout), b2, [ws(Cin,Cout), bs,], out,
    scratches: h_pad, patch1_buf, patch2_buf."""
    Ho, Wo = H // stride, W // stride
    M = B * Ho * Wo

    idx = 0
    if stride == 1:
        x_ref = refs[idx]; idx += 1
        phase_refs = None
    else:
        phase_refs = refs[idx:idx + 4]; idx += 4              # p00, p01, p10, p11
    w1_ref, b1_ref, w2_ref, b2_ref = refs[idx:idx + 4]; idx += 4
    if has_proj:
        ws_ref, bs_ref = refs[idx:idx + 2]; idx += 2
    o_ref = refs[idx]; idx += 1
    h_pad, patch1_buf, patch2_buf = refs[idx:idx + 3]

    # ---- im2col for conv1: stage the 9 taps lane-concatenated in VMEM -----
    if stride == 1:
        x_full = x_ref[...]                                    # (B, H+2, W+2, Cin) bf16
        for dy in range(3):
            for dx in range(3):
                t = 3 * dy + dx
                tap = x_full[:, dy:dy + Ho, dx:dx + Wo, :]
                patch1_buf[:, t * Cin:(t + 1) * Cin] = tap.reshape(M, Cin)
        sc_src = x_full[:, 1:1 + H, 1:1 + W, :]                # unpadded x (bf16)
    else:
        phases = [r[...] for r in phase_refs]                  # 4 x (B, Ho+1, Wo+1, Cin)
        for dy in range(3):
            for dx in range(3):
                t = 3 * dy + dx
                ph = phases[2 * (dy % 2) + (dx % 2)]
                tap = ph[:, dy // 2:dy // 2 + Ho, dx // 2:dx // 2 + Wo, :]
                patch1_buf[:, t * Cin:(t + 1) * Cin] = tap.reshape(M, Cin)
        sc_src = phases[3][:, :Ho, :Wo, :]                     # x[:, ::2, ::2, :] (bf16)

    # ---- conv1: one K=9*Cin MXU contraction (BN1 scale folded into w1) ----
    acc1 = jnp.dot(patch1_buf[...], w1_ref[...],
                   preferred_element_type=jnp.float32)          # (M, Cout) f32
    h1 = jnp.maximum(acc1 + b1_ref[...], 0.0)

    # Stash intermediate with a zero halo in VMEM. Only the halo is zeroed
    # (interior fully overwritten every step) -> grid steps stay independent.
    zrow = jnp.zeros((B, 1, Wo + 2, Cout), jnp.float32)
    zcol = jnp.zeros((B, Ho + 2, 1, Cout), jnp.float32)
    h_pad[:, 0:1, :, :] = zrow
    h_pad[:, Ho + 1:Ho + 2, :, :] = zrow
    h_pad[:, :, 0:1, :] = zcol
    h_pad[:, :, Wo + 1:Wo + 2, :] = zcol
    h_pad[:, 1:1 + Ho, 1:1 + Wo, :] = h1.reshape(B, Ho, Wo, Cout)

    # ---- im2col for conv2 (reads the VMEM-resident padded intermediate) ---
    for dy in range(3):
        for dx in range(3):
            t = 3 * dy + dx
            tap = h_pad[:, dy:dy + Ho, dx:dx + Wo, :]
            patch2_buf[:, t * Cout:(t + 1) * Cout] = (
                tap.astype(jnp.bfloat16).reshape(M, Cout))

    # ---- conv2: one K=9*Cout MXU contraction (BN2 scale folded into w2) ---
    acc2 = jnp.dot(patch2_buf[...], w2_ref[...],
                   preferred_element_type=jnp.float32)
    y2 = acc2 + b2_ref[...]

    # ---- shortcut + residual add + ReLU (fused epilogue) ------------------
    if has_proj:
        sc = jnp.dot(sc_src.reshape(M, Cin), ws_ref[...],
                     preferred_element_type=jnp.float32) + bs_ref[...]
    else:
        sc = sc_src.reshape(M, Cout).astype(jnp.float32)       # identity (Cin == Cout)

    out = jnp.maximum(y2 + sc, 0.0)
    o_ref[...] = out.reshape(B, Ho, Wo, Cout).astype(o_ref.dtype)


# ---------------------------------------------------------------------------
# Wrapper: PyTorch NCHW boundary, bf16 cast, space-to-depth for stride 2
# ---------------------------------------------------------------------------
def _nbytes(shape, dtype):
    n = 1
    for d in shape:
        n *= int(d)
    return n * jnp.dtype(dtype).itemsize


def _pick_batch_block(N, cap=8):
    # Keep >= 2 grid steps when possible so v7x's two TensorCores each take
    # half the batch; within that, the largest divisor of N up to `cap`.
    target = min(cap, max(1, N // 2)) if N > 1 else 1
    for d in range(target, 0, -1):
        if N % d == 0:
            return d
    return 1


def basic_block_forward(x_nchw, p, batch_block=None):
    stride = p['stride']
    Cin, Cout = p['in_planes'], p['planes']
    has_proj = p['has_proj']

    x = jnp.transpose(x_nchw, (0, 2, 3, 1)).astype(jnp.bfloat16)   # NHWC bf16
    N, H, W, _ = x.shape
    assert H % stride == 0 and W % stride == 0
    Ho, Wo = H // stride, W // stride
    assert Wo % 8 == 0, "kernel assumes output width multiple of 8 (sublane tiling)"

    B = batch_block if batch_block is not None else _pick_batch_block(N)
    assert N % B == 0

    xp = jnp.pad(x, ((0, 0), (1, 1), (1, 1), (0, 0)))              # pad=1

    if stride == 1:
        act_inputs = [xp]
        act_specs = [pl.BlockSpec((B, H + 2, W + 2, Cin), lambda n: (n, 0, 0, 0))]
    else:
        # 2x2 space-to-depth phases of the padded input: every stride-2 tap
        # becomes a contiguous slice of one phase inside the kernel.
        act_inputs = [xp[:, py::2, px::2, :] for py in (0, 1) for px in (0, 1)]
        act_specs = [pl.BlockSpec((B, Ho + 1, Wo + 1, Cin), lambda n: (n, 0, 0, 0))
                     for _ in range(4)]

    def const_spec(a):
        return pl.BlockSpec(a.shape, lambda n: (0,) * a.ndim)

    weight_inputs = [p['w1'], p['b1'], p['w2'], p['b2']]
    if has_proj:
        weight_inputs += [p['ws'], p['bs']]
    weight_specs = [const_spec(a) for a in weight_inputs]

    kernel = partial(_basic_block_kernel, H=H, W=W, Cin=Cin, Cout=Cout,
                     stride=stride, has_proj=has_proj, B=B)

    # Rough double-buffered VMEM footprint -> vmem_limit (clamped for v7x).
    est = _nbytes((B, Ho + 2, Wo + 2, Cout), jnp.float32)
    est += _nbytes((B * Ho * Wo, 9 * Cin), jnp.bfloat16)
    est += _nbytes((B * Ho * Wo, 9 * Cout), jnp.bfloat16)
    est += 2 * sum(_nbytes((B,) + tuple(a.shape[1:]), a.dtype) for a in act_inputs)
    est += 2 * sum(_nbytes(tuple(a.shape), a.dtype) for a in weight_inputs)
    est += 2 * _nbytes((B, Ho, Wo, Cout), jnp.float32)
    vmem_limit = int(min(64 * 1024 * 1024, max(16 * 1024 * 1024, 4 * est)))

    out = pl.pallas_call(
        kernel,
        out_shape=jax.ShapeDtypeStruct((N, Ho, Wo, Cout), jnp.float32),
        grid=(N // B,),
        in_specs=act_specs + weight_specs,
        out_specs=pl.BlockSpec((B, Ho, Wo, Cout), lambda n: (n, 0, 0, 0)),
        scratch_shapes=[
            pltpu.VMEM((B, Ho + 2, Wo + 2, Cout), jnp.float32),     # padded h1
            pltpu.VMEM((B * Ho * Wo, 9 * Cin), jnp.bfloat16),       # conv1 im2col
            pltpu.VMEM((B * Ho * Wo, 9 * Cout), jnp.bfloat16),      # conv2 im2col
        ],
        compiler_params=pltpu.CompilerParams(
            dimension_semantics=("parallel",),
            vmem_limit_bytes=vmem_limit),
    )(*act_inputs, *weight_inputs)

    return jnp.transpose(out, (0, 3, 1, 2))                         # back to NCHW


# ---------------------------------------------------------------------------
# Deterministic parameter init (PyTorch layouts) + BN-folded kernel operands
# ---------------------------------------------------------------------------
def _fold_bn(key, c):
    k1, k2, k3, k4 = jax.random.split(key, 4)
    gamma = 1.0 + 0.1 * jax.random.normal(k1, (c,), jnp.float32)
    beta = 0.1 * jax.random.normal(k2, (c,), jnp.float32)
    mean = 0.1 * jax.random.normal(k3, (c,), jnp.float32)
    var = 1.0 + 0.1 * jax.random.uniform(k4, (c,), jnp.float32)
    scale = gamma * lax.rsqrt(var + 1e-5)
    bias = beta - mean * scale
    return scale, bias


def _conv_w(key, cout, cin, k):
    w = jax.random.normal(key, (cout, cin, k, k), jnp.float32)      # OIHW (PyTorch)
    return w * (2.0 / (cin * k * k)) ** 0.5


def _fold_conv3x3(w_oihw, scale):
    cout, cin = w_oihw.shape[0], w_oihw.shape[1]
    w = jnp.transpose(w_oihw, (2, 3, 1, 0)).reshape(9 * cin, cout)  # K=(dy,dx,ci)
    return (w * scale[None, :]).astype(jnp.bfloat16)                # fold BN scale (f32)


def _fold_conv1x1(w_oihw, scale):
    cout, cin = w_oihw.shape[0], w_oihw.shape[1]
    w = jnp.transpose(w_oihw, (2, 3, 1, 0)).reshape(cin, cout)
    return (w * scale[None, :]).astype(jnp.bfloat16)


def init_block_params(key, in_planes, planes, stride):
    ks = jax.random.split(key, 6)
    w1 = _conv_w(ks[0], planes, in_planes, 3)
    s1, b1 = _fold_bn(ks[1], planes)
    w2 = _conv_w(ks[2], planes, planes, 3)
    s2, b2 = _fold_bn(ks[3], planes)
    has_proj = (stride != 1) or (in_planes != planes)
    p = {'stride': stride, 'in_planes': in_planes, 'planes': planes,
         'has_proj': has_proj,
         # f32 / PyTorch-layout copies for the pure-JAX reference
         'w1_t': w1, 'w2_t': w2, 's1v': s1, 'b1v': b1, 's2v': s2, 'b2v': b2,
         # kernel operands (BN scale folded into weights, bf16)
         'w1': _fold_conv3x3(w1, s1), 'b1': b1.reshape(1, -1),
         'w2': _fold_conv3x3(w2, s2), 'b2': b2.reshape(1, -1)}
    if has_proj:
        ws = _conv_w(ks[4], planes, in_planes, 1)
        ss, bs = _fold_bn(ks[5], planes)
        p.update({'ws_t': ws, 'ssv': ss, 'bsv': bs,
                  'ws': _fold_conv1x1(ws, ss), 'bs': bs.reshape(1, -1)})
    return p


# ---------------------------------------------------------------------------
# Pure-JAX reference (f32) for validation
# ---------------------------------------------------------------------------
def _conv_ref(x_nhwc, w_oihw, stride, pad):
    w = jnp.transpose(w_oihw, (2, 3, 1, 0))                         # HWIO
    return lax.conv_general_dilated(
        x_nhwc, w, window_strides=(stride, stride),
        padding=((pad, pad), (pad, pad)),
        dimension_numbers=('NHWC', 'HWIO', 'NHWC'))


def basic_block_reference(x_nchw, p):
    x = jnp.transpose(x_nchw, (0, 2, 3, 1)).astype(jnp.float32)
    h = jnp.maximum(_conv_ref(x, p['w1_t'], p['stride'], 1) * p['s1v'] + p['b1v'], 0.0)
    y = _conv_ref(h, p['w2_t'], 1, 1) * p['s2v'] + p['b2v']
    if p['has_proj']:
        sc = _conv_ref(x, p['ws_t'], p['stride'], 0) * p['ssv'] + p['bsv']
    else:
        sc = x
    out = jnp.maximum(y + sc, 0.0)
    return jnp.transpose(out, (0, 3, 1, 2))


# ---------------------------------------------------------------------------
if __name__ == "__main__":
    key = jax.random.PRNGKey(0)
    kx, k1, k2 = jax.random.split(key, 3)
    x = jax.random.normal(kx, (2, 16, 16, 16), jnp.float32)         # NCHW (like PyTorch)

    # stride=1, identity shortcut
    p_id = init_block_params(k1, 16, 16, stride=1)
    # stride=2, projection shortcut (downsampling block)
    p_dn = init_block_params(k2, 16, 32, stride=2)

    y_id = basic_block_forward(x, p_id)
    y_dn = basic_block_forward(x, p_dn)
    jax.block_until_ready((y_id, y_dn))

    assert y_id.shape == (2, 16, 16, 16)
    assert y_dn.shape == (2, 32, 8, 8)

    r_id = basic_block_reference(x, p_id)
    r_dn = basic_block_reference(x, p_dn)
    err = max(float(jnp.max(jnp.abs(y_id - r_id))),
              float(jnp.max(jnp.abs(y_dn - r_dn))))
    assert err < 1e-1, f"mismatch vs reference: max abs err {err}"

    print("KERNEL_OK")
</pallas_src>

<mosaic_0001>
module attributes {stable_mosaic.version = 11 : i64} {
  func.func @_basic_block_kernel(%arg0: i32, %arg1: memref<1x18x18x16xbf16, #tpu.memory_space<vmem>>, %arg2: memref<144x16xbf16, #tpu.memory_space<vmem>>, %arg3: memref<1x16xf32, #tpu.memory_space<vmem>>, %arg4: memref<144x16xbf16, #tpu.memory_space<vmem>>, %arg5: memref<1x16xf32, #tpu.memory_space<vmem>>, %arg6: memref<1x16x16x16xf32, #tpu.memory_space<vmem>>, %arg7: memref<1x18x18x16xf32, #tpu.memory_space<vmem>>, %arg8: memref<256x144xbf16, #tpu.memory_space<vmem>>, %arg9: memref<256x144xbf16, #tpu.memory_space<vmem>>) attributes {dimension_semantics = [#tpu.dimension_semantics<parallel>], iteration_bounds = array<i64: 2>, scalar_prefetch = 0 : i64, scratch_operands = 3 : i64, tpu.core_type = #tpu.core_type<tc>, window_params = [{transform_indices = @transform_0, window_bounds = array<i64: 1, 18, 18, 16>}, {pipeline_mode = #tpu.pipeline_mode<synchronous>, transform_indices = @transform_1, window_bounds = array<i64: 144, 16>}, {pipeline_mode = #tpu.pipeline_mode<synchronous>, transform_indices = @transform_2, window_bounds = array<i64: 1, 16>}, {pipeline_mode = #tpu.pipeline_mode<synchronous>, transform_indices = @transform_3, window_bounds = array<i64: 144, 16>}, {pipeline_mode = #tpu.pipeline_mode<synchronous>, transform_indices = @transform_4, window_bounds = array<i64: 1, 16>}, {transform_indices = @transform_5, window_bounds = array<i64: 1, 16, 16, 16>}]} {
    %c0 = arith.constant 0 : index
    %c0_0 = arith.constant 0 : index
    %c0_1 = arith.constant 0 : index
    %c0_2 = arith.constant 0 : index
    %0 = vector.load %arg1[%c0, %c0_0, %c0_1, %c0_2] : memref<1x18x18x16xbf16, #tpu.memory_space<vmem>>, vector<1x18x18x16xbf16>
    %1 = vector.extract_strided_slice %0 {offsets = [0, 0, 0, 0], sizes = [1, 16, 16, 16], strides = [1, 1, 1, 1]} : vector<1x18x18x16xbf16> to vector<1x16x16x16xbf16>
    %2 = vector.shape_cast %1 : vector<1x16x16x16xbf16> to vector<256x16xbf16>
    %c0_3 = arith.constant 0 : index
    %c0_4 = arith.constant 0 : index
    %3 = vector.load %arg8[%c0_3, %c0_4] : memref<256x144xbf16, #tpu.memory_space<vmem>>, vector<256x16xbf16>
    tpu.vector_store %arg8[%c0_3, %c0_4], %2 {strides = array<i32>} : memref<256x144xbf16, #tpu.memory_space<vmem>>, vector<256x16xbf16>,
    %4 = vector.extract_strided_slice %0 {offsets = [0, 0, 1, 0], sizes = [1, 16, 16, 16], strides = [1, 1, 1, 1]} : vector<1x18x18x16xbf16> to vector<1x16x16x16xbf16>
    %5 = vector.shape_cast %4 : vector<1x16x16x16xbf16> to vector<256x16xbf16>
    %c0_5 = arith.constant 0 : index
    %c16 = arith.constant 16 : index
    %6 = vector.load %arg8[%c0_5, %c16] : memref<256x144xbf16, #tpu.memory_space<vmem>>, vector<256x16xbf16>
    tpu.vector_store %arg8[%c0_5, %c16], %5 {strides = array<i32>} : memref<256x144xbf16, #tpu.memory_space<vmem>>, vector<256x16xbf16>,
    %7 = vector.extract_strided_slice %0 {offsets = [0, 0, 2, 0], sizes = [1, 16, 16, 16], strides = [1, 1, 1, 1]} : vector<1x18x18x16xbf16> to vector<1x16x16x16xbf16>
    %8 = vector.shape_cast %7 : vector<1x16x16x16xbf16> to vector<256x16xbf16>
    %c0_6 = arith.constant 0 : index
    %c32 = arith.constant 32 : index
    %9 = vector.load %arg8[%c0_6, %c32] : memref<256x144xbf16, #tpu.memory_space<vmem>>, vector<256x16xbf16>
    tpu.vector_store %arg8[%c0_6, %c32], %8 {strides = array<i32>} : memref<256x144xbf16, #tpu.memory_space<vmem>>, vector<256x16xbf16>,
    %10 = vector.extract_strided_slice %0 {offsets = [0, 1, 0, 0], sizes = [1, 16, 16, 16], strides = [1, 1, 1, 1]} : vector<1x18x18x16xbf16> to vector<1x16x16x16xbf16>
    %11 = vector.shape_cast %10 : vector<1x16x16x16xbf16> to vector<256x16xbf16>
    %c0_7 = arith.constant 0 : index
    %c48 = arith.constant 48 : index
    %12 = vector.load %arg8[%c0_7, %c48] : memref<256x144xbf16, #tpu.memory_space<vmem>>, vector<256x16xbf16>
    tpu.vector_store %arg8[%c0_7, %c48], %11 {strides = array<i32>} : memref<256x144xbf16, #tpu.memory_space<vmem>>, vector<256x16xbf16>,
    %13 = vector.extract_strided_slice %0 {offsets = [0, 1, 1, 0], sizes = [1, 16, 16, 16], strides = [1, 1, 1, 1]} : vector<1x18x18x16xbf16> to vector<1x16x16x16xbf16>
    %14 = vector.shape_cast %13 : vector<1x16x16x16xbf16> to vector<256x16xbf16>
    %c0_8 = arith.constant 0 : index
    %c64 = arith.constant 64 : index
    %15 = vector.load %arg8[%c0_8, %c64] : memref<256x144xbf16, #tpu.memory_space<vmem>>, vector<256x16xbf16>
    tpu.vector_store %arg8[%c0_8, %c64], %14 {strides = array<i32>} : memref<256x144xbf16, #tpu.memory_space<vmem>>, vector<256x16xbf16>,
    %16 = vector.extract_strided_slice %0 {offsets = [0, 1, 2, 0], sizes = [1, 16, 16, 16], strides = [1, 1, 1, 1]} : vector<1x18x18x16xbf16> to vector<1x16x16x16xbf16>
    %17 = vector.shape_cast %16 : vector<1x16x16x16xbf16> to vector<256x16xbf16>
    %c0_9 = arith.constant 0 : index
    %c80 = arith.constant 80 : index
    %18 = vector.load %arg8[%c0_9, %c80] : memref<256x144xbf16, #tpu.memory_space<vmem>>, vector<256x16xbf16>
    tpu.vector_store %arg8[%c0_9, %c80], %17 {strides = array<i32>} : memref<256x144xbf16, #tpu.memory_space<vmem>>, vector<256x16xbf16>,
    %19 = vector.extract_strided_slice %0 {offsets = [0, 2, 0, 0], sizes = [1, 16, 16, 16], strides = [1, 1, 1, 1]} : vector<1x18x18x16xbf16> to vector<1x16x16x16xbf16>
    %20 = vector.shape_cast %19 : vector<1x16x16x16xbf16> to vector<256x16xbf16>
    %c0_10 = arith.constant 0 : index
    %c96 = arith.constant 96 : index
    %21 = vector.load %arg8[%c0_10, %c96] : memref<256x144xbf16, #tpu.memory_space<vmem>>, vector<256x16xbf16>
    tpu.vector_store %arg8[%c0_10, %c96], %20 {strides = array<i32>} : memref<256x144xbf16, #tpu.memory_space<vmem>>, vector<256x16xbf16>,
    %22 = vector.extract_strided_slice %0 {offsets = [0, 2, 1, 0], sizes = [1, 16, 16, 16], strides = [1, 1, 1, 1]} : vector<1x18x18x16xbf16> to vector<1x16x16x16xbf16>
    %23 = vector.shape_cast %22 : vector<1x16x16x16xbf16> to vector<256x16xbf16>
    %c0_11 = arith.constant 0 : index
    %c112 = arith.constant 112 : index
    %24 = vector.load %arg8[%c0_11, %c112] : memref<256x144xbf16, #tpu.memory_space<vmem>>, vector<256x16xbf16>
    tpu.vector_store %arg8[%c0_11, %c112], %23 {strides = array<i32>} : memref<256x144xbf16, #tpu.memory_space<vmem>>, vector<256x16xbf16>,
    %25 = vector.extract_strided_slice %0 {offsets = [0, 2, 2, 0], sizes = [1, 16, 16, 16], strides = [1, 1, 1, 1]} : vector<1x18x18x16xbf16> to vector<1x16x16x16xbf16>
    %26 = vector.shape_cast %25 : vector<1x16x16x16xbf16> to vector<256x16xbf16>
    %c0_12 = arith.constant 0 : index
    %c128 = arith.constant 128 : index
    %27 = vector.load %arg8[%c0_12, %c128] : memref<256x144xbf16, #tpu.memory_space<vmem>>, vector<256x16xbf16>
    tpu.vector_store %arg8[%c0_12, %c128], %26 {strides = array<i32>} : memref<256x144xbf16, #tpu.memory_space<vmem>>, vector<256x16xbf16>,
    %28 = vector.extract_strided_slice %0 {offsets = [0, 1, 1, 0], sizes = [1, 16, 16, 16], strides = [1, 1, 1, 1]} : vector<1x18x18x16xbf16> to vector<1x16x16x16xbf16>
    %c0_13 = arith.constant 0 : index
    %c0_14 = arith.constant 0 : index
    %29 = vector.load %arg8[%c0_13, %c0_14] : memref<256x144xbf16, #tpu.memory_space<vmem>>, vector<256x144xbf16>
    %c0_15 = arith.constant 0 : index
    %c0_16 = arith.constant 0 : index
    %30 = vector.load %arg2[%c0_15, %c0_16] : memref<144x16xbf16, #tpu.memory_space<vmem>>, vector<144x16xbf16>
    %cst = arith.constant dense<0.000000e+00> : vector<256x16xf32>
    %31 = tpu.matmul %29, %30, %cst {dimension_numbers = #tpu.dot_dimension_numbers<[1], [0], [0], [1], [0, 0, 1, 1], [], []>} : vector<256x144xbf16>, vector<144x16xbf16>, vector<256x16xf32> -> vector<256x16xf32>
    %c0_17 = arith.constant 0 : index
    %c0_18 = arith.constant 0 : index
    %32 = vector.load %arg3[%c0_17, %c0_18] : memref<1x16xf32, #tpu.memory_space<vmem>>, vector<1x16xf32>
    %33 = vector.broadcast %32 : vector<1x16xf32> to vector<256x16xf32>
    %34 = arith.addf %31, %33 : vector<256x16xf32>
    %cst_19 = arith.constant 0.000000e+00 : f32
    %35 = vector.broadcast %cst_19 : f32 to vector<256x16xf32>
    %36 = arith.maximumf %34, %35 : vector<256x16xf32>
    %cst_20 = arith.constant 0.000000e+00 : f32
    %37 = vector.broadcast %cst_20 : f32 to vector<1x1x18x16xf32>
    %cst_21 = arith.constant 0.000000e+00 : f32
    %38 = vector.broadcast %cst_21 : f32 to vector<1x18x1x16xf32>
    %c0_22 = arith.constant 0 : index
    %c0_23 = arith.constant 0 : index
    %c0_24 = arith.constant 0 : index
    %c0_25 = arith.constant 0 : index
    %39 = vector.load %arg7[%c0_22, %c0_23, %c0_24, %c0_25] : memref<1x18x18x16xf32, #tpu.memory_space<vmem>>, vector<1x1x18x16xf32>
    tpu.vector_store %arg7[%c0_22, %c0_23, %c0_24, %c0_25], %37 {strides = array<i32>} : memref<1x18x18x16xf32, #tpu.memory_space<vmem>>, vector<1x1x18x16xf32>,
    %c0_26 = arith.constant 0 : index
    %c17 = arith.constant 17 : index
    %c0_27 = arith.constant 0 : index
    %c0_28 = arith.constant 0 : index
    %40 = vector.load %arg7[%c0_26, %c17, %c0_27, %c0_28] : memref<1x18x18x16xf32, #tpu.memory_space<vmem>>, vector<1x1x18x16xf32>
    tpu.vector_store %arg7[%c0_26, %c17, %c0_27, %c0_28], %37 {strides = array<i32>} : memref<1x18x18x16xf32, #tpu.memory_space<vmem>>, vector<1x1x18x16xf32>,
    %c0_29 = arith.constant 0 : index
    %c0_30 = arith.constant 0 : index
    %c0_31 = arith.constant 0 : index
    %c0_32 = arith.constant 0 : index
    %41 = vector.load %arg7[%c0_29, %c0_30, %c0_31, %c0_32] : memref<1x18x18x16xf32, #tpu.memory_space<vmem>>, vector<1x18x1x16xf32>
    tpu.vector_store %arg7[%c0_29, %c0_30, %c0_31, %c0_32], %38 {strides = array<i32>} : memref<1x18x18x16xf32, #tpu.memory_space<vmem>>, vector<1x18x1x16xf32>,
    %c0_33 = arith.constant 0 : index
    %c0_34 = arith.constant 0 : index
    %c17_35 = arith.constant 17 : index
    %c0_36 = arith.constant 0 : index
    %42 = vector.load %arg7[%c0_33, %c0_34, %c17_35, %c0_36] : memref<1x18x18x16xf32, #tpu.memory_space<vmem>>, vector<1x18x1x16xf32>
    tpu.vector_store %arg7[%c0_33, %c0_34, %c17_35, %c0_36], %38 {strides = array<i32>} : memref<1x18x18x16xf32, #tpu.memory_space<vmem>>, vector<1x18x1x16xf32>,
    %43 = vector.shape_cast %36 : vector<256x16xf32> to vector<1x16x16x16xf32>
    %c0_37 = arith.constant 0 : index
    %c1 = arith.constant 1 : index
    %c1_38 = arith.constant 1 : index
    %c0_39 = arith.constant 0 : index
    %44 = vector.load %arg7[%c0_37, %c1, %c1_38, %c0_39] : memref<1x18x18x16xf32, #tpu.memory_space<vmem>>, vector<1x16x16x16xf32>
    tpu.vector_store %arg7[%c0_37, %c1, %c1_38, %c0_39], %43 {strides = array<i32>} : memref<1x18x18x16xf32, #tpu.memory_space<vmem>>, vector<1x16x16x16xf32>,
    %c0_40 = arith.constant 0 : index
    %c0_41 = arith.constant 0 : index
    %c0_42 = arith.constant 0 : index
    %c0_43 = arith.constant 0 : index
    %45 = vector.load %arg7[%c0_40, %c0_41, %c0_42, %c0_43] : memref<1x18x18x16xf32, #tpu.memory_space<vmem>>, vector<1x16x16x16xf32>
    %46 = arith.truncf %45 : vector<1x16x16x16xf32> to vector<1x16x16x16xbf16>
    %47 = vector.shape_cast %46 : vector<1x16x16x16xbf16> to vector<256x16xbf16>
    %c0_44 = arith.constant 0 : index
    %c0_45 = arith.constant 0 : index
    %48 = vector.load %arg9[%c0_44, %c0_45] : memref<256x144xbf16, #tpu.memory_space<vmem>>, vector<256x16xbf16>
    tpu.vector_store %arg9[%c0_44, %c0_45], %47 {strides = array<i32>} : memref<256x144xbf16, #tpu.memory_space<vmem>>, vector<256x16xbf16>,
    %c0_46 = arith.constant 0 : index
    %c0_47 = arith.constant 0 : index
    %c1_48 = arith.constant 1 : index
    %c0_49 = arith.constant 0 : index
    %49 = vector.load %arg7[%c0_46, %c0_47, %c1_48, %c0_49] : memref<1x18x18x16xf32, #tpu.memory_space<vmem>>, vector<1x16x16x16xf32>
    %50 = arith.truncf %49 : vector<1x16x16x16xf32> to vector<1x16x16x16xbf16>
    %51 = vector.shape_cast %50 : vector<1x16x16x16xbf16> to vector<256x16xbf16>
    %c0_50 = arith.constant 0 : index
    %c16_51 = arith.constant 16 : index
    %52 = vector.load %arg9[%c0_50, %c16_51] : memref<256x144xbf16, #tpu.memory_space<vmem>>, vector<256x16xbf16>
    tpu.vector_store %arg9[%c0_50, %c16_51], %51 {strides = array<i32>} : memref<256x144xbf16, #tpu.memory_space<vmem>>, vector<256x16xbf16>,
    %c0_52 = arith.constant 0 : index
    %c0_53 = arith.constant 0 : index
    %c2 = arith.constant 2 : index
    %c0_54 = arith.constant 0 : index
    %53 = vector.load %arg7[%c0_52, %c0_53, %c2, %c0_54] : memref<1x18x18x16xf32, #tpu.memory_space<vmem>>, vector<1x16x16x16xf32>
    %54 = arith.truncf %53 : vector<1x16x16x16xf32> to vector<1x16x16x16xbf16>
    %55 = vector.shape_cast %54 : vector<1x16x16x16xbf16> to vector<256x16xbf16>
    %c0_55 = arith.constant 0 : index
    %c32_56 = arith.constant 32 : index
    %56 = vector.load %arg9[%c0_55, %c32_56] : memref<256x144xbf16, #tpu.memory_space<vmem>>, vector<256x16xbf16>
    tpu.vector_store %arg9[%c0_55, %c32_56], %55 {strides = array<i32>} : memref<256x144xbf16, #tpu.memory_space<vmem>>, vector<256x16xbf16>,
    %c0_57 = arith.constant 0 : index
    %c1_58 = arith.constant 1 : index
    %c0_59 = arith.constant 0 : index
    %c0_60 = arith.constant 0 : index
    %57 = vector.load %arg7[%c0_57, %c1_58, %c0_59, %c0_60] : memref<1x18x18x16xf32, #tpu.memory_space<vmem>>, vector<1x16x16x16xf32>
    %58 = arith.truncf %57 : vector<1x16x16x16xf32> to vector<1x16x16x16xbf16>
    %59 = vector.shape_cast %58 : vector<1x16x16x16xbf16> to vector<256x16xbf16>
    %c0_61 = arith.constant 0 : index
    %c48_62 = arith.constant 48 : index
    %60 = vector.load %arg9[%c0_61, %c48_62] : memref<256x144xbf16, #tpu.memory_space<vmem>>, vector<256x16xbf16>
    tpu.vector_store %arg9[%c0_61, %c48_62], %59 {strides = array<i32>} : memref<256x144xbf16, #tpu.memory_space<vmem>>, vector<256x16xbf16>,
    %c0_63 = arith.constant 0 : index
    %c1_64 = arith.constant 1 : index
    %c1_65 = arith.constant 1 : index
    %c0_66 = arith.constant 0 : index
    %61 = vector.load %arg7[%c0_63, %c1_64, %c1_65, %c0_66] : memref<1x18x18x16xf32, #tpu.memory_space<vmem>>, vector<1x16x16x16xf32>
    %62 = arith.truncf %61 : vector<1x16x16x16xf32> to vector<1x16x16x16xbf16>
    %63 = vector.shape_cast %62 : vector<1x16x16x16xbf16> to vector<256x16xbf16>
    %c0_67 = arith.constant 0 : index
    %c64_68 = arith.constant 64 : index
    %64 = vector.load %arg9[%c0_67, %c64_68] : memref<256x144xbf16, #tpu.memory_space<vmem>>, vector<256x16xbf16>
    tpu.vector_store %arg9[%c0_67, %c64_68], %63 {strides = array<i32>} : memref<256x144xbf16, #tpu.memory_space<vmem>>, vector<256x16xbf16>,
    %c0_69 = arith.constant 0 : index
    %c1_70 = arith.constant 1 : index
    %c2_71 = arith.constant 2 : index
    %c0_72 = arith.constant 0 : index
    %65 = vector.load %arg7[%c0_69, %c1_70, %c2_71, %c0_72] : memref<1x18x18x16xf32, #tpu.memory_space<vmem>>, vector<1x16x16x16xf32>
    %66 = arith.truncf %65 : vector<1x16x16x16xf32> to vector<1x16x16x16xbf16>
    %67 = vector.shape_cast %66 : vector<1x16x16x16xbf16> to vector<256x16xbf16>
    %c0_73 = arith.constant 0 : index
    %c80_74 = arith.constant 80 : index
    %68 = vector.load %arg9[%c0_73, %c80_74] : memref<256x144xbf16, #tpu.memory_space<vmem>>, vector<256x16xbf16>
    tpu.vector_store %arg9[%c0_73, %c80_74], %67 {strides = array<i32>} : memref<256x144xbf16, #tpu.memory_space<vmem>>, vector<256x16xbf16>,
    %c0_75 = arith.constant 0 : index
    %c2_76 = arith.constant 2 : index
    %c0_77 = arith.constant 0 : index
    %c0_78 = arith.constant 0 : index
    %69 = vector.load %arg7[%c0_75, %c2_76, %c0_77, %c0_78] : memref<1x18x18x16xf32, #tpu.memory_space<vmem>>, vector<1x16x16x16xf32>
    %70 = arith.truncf %69 : vector<1x16x16x16xf32> to vector<1x16x16x16xbf16>
    %71 = vector.shape_cast %70 : vector<1x16x16x16xbf16> to vector<256x16xbf16>
    %c0_79 = arith.constant 0 : index
    %c96_80 = arith.constant 96 : index
    %72 = vector.load %arg9[%c0_79, %c96_80] : memref<256x144xbf16, #tpu.memory_space<vmem>>, vector<256x16xbf16>
    tpu.vector_store %arg9[%c0_79, %c96_80], %71 {strides = array<i32>} : memref<256x144xbf16, #tpu.memory_space<vmem>>, vector<256x16xbf16>,
    %c0_81 = arith.constant 0 : index
    %c2_82 = arith.constant 2 : index
    %c1_83 = arith.constant 1 : index
    %c0_84 = arith.constant 0 : index
    %73 = vector.load %arg7[%c0_81, %c2_82, %c1_83, %c0_84] : memref<1x18x18x16xf32, #tpu.memory_space<vmem>>, vector<1x16x16x16xf32>
    %74 = arith.truncf %73 : vector<1x16x16x16xf32> to vector<1x16x16x16xbf16>
    %75 = vector.shape_cast %74 : vector<1x16x16x16xbf16> to vector<256x16xbf16>
    %c0_85 = arith.constant 0 : index
    %c112_86 = arith.constant 112 : index
    %76 = vector.load %arg9[%c0_85, %c112_86] : memref<256x144xbf16, #tpu.memory_space<vmem>>, vector<256x16xbf16>
    tpu.vector_store %arg9[%c0_85, %c112_86], %75 {strides = array<i32>} : memref<256x144xbf16, #tpu.memory_space<vmem>>, vector<256x16xbf16>,
    %c0_87 = arith.constant 0 : index
    %c2_88 = arith.constant 2 : index
    %c2_89 = arith.constant 2 : index
    %c0_90 = arith.constant 0 : index
    %77 = vector.load %arg7[%c0_87, %c2_88, %c2_89, %c0_90] : memref<1x18x18x16xf32, #tpu.memory_space<vmem>>, vector<1x16x16x16xf32>
    %78 = arith.truncf %77 : vector<1x16x16x16xf32> to vector<1x16x16x16xbf16>
    %79 = vector.shape_cast %78 : vector<1x16x16x16xbf16> to vector<256x16xbf16>
    %c0_91 = arith.constant 0 : index
    %c128_92 = arith.constant 128 : index
    %80 = vector.load %arg9[%c0_91, %c128_92] : memref<256x144xbf16, #tpu.memory_space<vmem>>, vector<256x16xbf16>
    tpu.vector_store %arg9[%c0_91, %c128_92], %79 {strides = array<i32>} : memref<256x144xbf16, #tpu.memory_space<vmem>>, vector<256x16xbf16>,
    %c0_93 = arith.constant 0 : index
    %c0_94 = arith.constant 0 : index
    %81 = vector.load %arg9[%c0_93, %c0_94] : memref<256x144xbf16, #tpu.memory_space<vmem>>, vector<256x144xbf16>
    %c0_95 = arith.constant 0 : index
    %c0_96 = arith.constant 0 : index
    %82 = vector.load %arg4[%c0_95, %c0_96] : memref<144x16xbf16, #tpu.memory_space<vmem>>, vector<144x16xbf16>
    %cst_97 = arith.constant dense<0.000000e+00> : vector<256x16xf32>
    %83 = tpu.matmul %81, %82, %cst_97 {dimension_numbers = #tpu.dot_dimension_numbers<[1], [0], [0], [1], [0, 0, 1, 1], [], []>} : vector<256x144xbf16>, vector<144x16xbf16>, vector<256x16xf32> -> vector<256x16xf32>
    %c0_98 = arith.constant 0 : index
    %c0_99 = arith.constant 0 : index
    %84 = vector.load %arg5[%c0_98, %c0_99] : memref<1x16xf32, #tpu.memory_space<vmem>>, vector<1x16xf32>
    %85 = vector.broadcast %84 : vector<1x16xf32> to vector<256x16xf32>
    %86 = arith.addf %83, %85 : vector<256x16xf32>
    %87 = vector.shape_cast %28 : vector<1x16x16x16xbf16> to vector<256x16xbf16>
    %88 = arith.extf %87 : vector<256x16xbf16> to vector<256x16xf32>
    %89 = arith.addf %86, %88 : vector<256x16xf32>
    %cst_100 = arith.constant 0.000000e+00 : f32
    %90 = vector.broadcast %cst_100 : f32 to vector<256x16xf32>
    %91 = arith.maximumf %89, %90 : vector<256x16xf32>
    %92 = vector.shape_cast %91 : vector<256x16xf32> to vector<1x16x16x16xf32>
    %c0_101 = arith.constant 0 : index
    %c0_102 = arith.constant 0 : index
    %c0_103 = arith.constant 0 : index
    %c0_104 = arith.constant 0 : index
    %93 = vector.load %arg6[%c0_101, %c0_102, %c0_103, %c0_104] : memref<1x16x16x16xf32, #tpu.memory_space<vmem>>, vector<1x16x16x16xf32>
    tpu.vector_store %arg6[%c0_101, %c0_102, %c0_103, %c0_104], %92 {strides = array<i32>} : memref<1x16x16x16xf32, #tpu.memory_space<vmem>>, vector<1x16x16x16xf32>,
    return
  }
  func.func @transform_0(%arg0: i32) -> (i32, i32, i32, i32) {
    %c0_i32 = arith.constant 0 : i32
    %c0_i32_0 = arith.constant 0 : i32
    %c0_i32_1 = arith.constant 0 : i32
    %c0_i32_2 = arith.constant 0 : i32
    return %arg0, %c0_i32, %c0_i32_0, %c0_i32_1 : i32, i32, i32, i32
  }
  func.func @transform_1(%arg0: i32) -> (i32, i32) {
    %c0_i32 = arith.constant 0 : i32
    %c0_i32_0 = arith.constant 0 : i32
    %c0_i32_1 = arith.constant 0 : i32
    return %c0_i32, %c0_i32_0 : i32, i32
  }
  func.func @transform_2(%arg0: i32) -> (i32, i32) {
    %c0_i32 = arith.constant 0 : i32
    %c0_i32_0 = arith.constant 0 : i32
    %c0_i32_1 = arith.constant 0 : i32
    return %c0_i32, %c0_i32_0 : i32, i32
  }
  func.func @transform_3(%arg0: i32) -> (i32, i32) {
    %c0_i32 = arith.constant 0 : i32
    %c0_i32_0 = arith.constant 0 : i32
    %c0_i32_1 = arith.constant 0 : i32
    return %c0_i32, %c0_i32_0 : i32, i32
  }
  func.func @transform_4(%arg0: i32) -> (i32, i32) {
    %c0_i32 = arith.constant 0 : i32
    %c0_i32_0 = arith.constant 0 : i32
    %c0_i32_1 = arith.constant 0 : i32
    return %c0_i32, %c0_i32_0 : i32, i32
  }
  func.func @transform_5(%arg0: i32) -> (i32, i32, i32, i32) {
    %c0_i32 = arith.constant 0 : i32
    %c0_i32_0 = arith.constant 0 : i32
    %c0_i32_1 = arith.constant 0 : i32
    %c0_i32_2 = arith.constant 0 : i32
    return %arg0, %c0_i32, %c0_i32_0, %c0_i32_1 : i32, i32, i32, i32
  }
}

</mosaic_0001>

<bundles_post_ra>
// kernel: tpu_custom_call.1
= control target key start
LH: loop header
LB: loop body
LE: loop exit
PB: predicated region body
PF: predicated region fallthrough
CT: control target
= control target key end

     0   :  { %10 = vsyncpa [#allocation6], 0  ;;  %s8972_s0 = inlined_call_operand.vmem [shape: bf16[2,18,18,16], index: 0, kind: input, shape index: {}]   ;;  %s8973_s1 = inlined_call_operand.vmem [shape: bf16[144,16], index: 1, kind: input, shape index: {}]   ;;  %s8974_s2 = inlined_call_operand.vmem [shape: f32[1,16], index: 2, kind: input, shape index: {}]   ;;  %s8975_s3 = inlined_call_operand.vmem [shape: bf16[144,16], index: 3, kind: input, shape index: {}]   ;;  %s8976_s4 = inlined_call_operand.vmem [shape: f32[1,16], index: 4, kind: input, shape index: {}]   ;;  %s8977_s5 = inlined_call_operand.hbm [shape: f32[2,16,16,16], index: 5, kind: output, shape index: {}]  }
   0x1   :  { %12 = vsyncpa [#allocation6 + $0x1], 0  ;;  %s6312_s18 = smov 0   ;;  %s6314_s19 = smov 0  }
   0x2   :  { %s6316_s20 = smov 0   ;;  %s6318_s21 = smov 0  }
   0x3 LB: > { %s6333_s22 = sadd.s32 4294967295, %s6268_s21   ;;  %s5348_s23 = sadd.s32 4294967294, %s6268_s21   ;;  %s6268_s21 = sphi %s6318_s21, %s9219_s21   ;;  %s6264_s20 = sphi %s6316_s20, %s9218_s20   ;;  %s6260_s19 = sphi %s6314_s19, %s9217_s19   ;;  %s6256_s18 = sphi %s6312_s18, %s9216_s18  }
   0x4   : > { %s6337_s24 = sadd.s32 1, %s6268_s21   ;;  %s135_s25 = sadd.s32 1, %s6264_s20 }
   0x5   : > { %s132_s26 = ssub.s32 %s6268_s21, %s6337_s24  ;;  %p145_p0 = scmp.ne.s32.totalorder %s6264_s20, %s6260_s19 }
   0x6   : > { %p133_p1 = scmp.eq.s32.totalorder %s132_s26, 0  ;;  %p146_p2 = scmp.eq.s32.totalorder %s6333_s22, 1 }
   0x7   : > { %p151_p3 = scmp.ne.s32.totalorder %s6260_s19, %s6256_s18  ;;  %p152_p4 = scmp.eq.s32.totalorder %s5348_s23, 1 }
   0x8   : > { %s6348_s27 = scalar_select %p133_p1, %s6264_s20, %s135_s25  }
   0x9   : > { %p6350_p5 = por %p146_p2, %p145_p0  ;;  %p6354_p6 = por %p152_p4, %p151_p3 }
   0xa   : > { %p5351_p7 = scmp.ge.s32.totalorder %s6268_s21, 1  ;;  %p190_p8 = scmp.lt.s32.totalorder %s6268_s21, 3 }
   0xc   : > { %p191_p9 = pnand %p5351_p7, %p190_p8 }
   0xe   : > { %194 = sbr.rel (%p191_p9) target bundleno = 1495 (0x5d7), region = 40 }
  0x13   : > { %p218_p10 = scmp.lt.s32.totalorder %s6333_s22, 1  ;;  %vm311_vm0 = vsmask.f32 3328  ;;  %vm312_vm1 = vsmask.f32 7440  ;;  %vm278_vm2 = vcmask 125952  }
  0x14   : > { %vm6414_vm3 = vmor %vm311_vm0, %vm312_vm1  ;;  %v9087_v28 = vmov 0  ;;  %s6270_s10 = smov 16   ;;  %vm875_vm4 = vcmask 1042432   ;;  %vm876_vm5 = vcmask 1046532   ;;  %s6271_s11 = smov 32   ;;  %vm794_vm7 = vcmask 257152  }
  0x15   : > { %s219_s30 = scalar_select %p218_p10, %s6333_s22, 1  ;;  %v9088_v28 = vsel %vm6414_vm3, 4294967295, %v9087_v28  ;;  %vm6838_vm6 = vmor %vm875_vm4, %vm876_vm5  ;;  %vm1086_vm8 = vcmask 388352   ;;  %vm1217_vm9 = vcmask 519552   ;;  %vm1402_vm10 = vcmask 650752  }
  0x16   : > { %9089 = vst [vmem:[#allocation8_spill] sm:$0xff] %v9088_v28  ;;  %s6272_s12 = smov 48   ;;  %s6274_s25 = smov 64   ;;  %vm1539_vm11 = vcmask 781952   ;;  %vm1670_vm12 = vcmask 913152   ;;  %vm1823_vm13 = vcmask 1044352  }
  0x17   : > { %s6070_s6 = smul.u32 216, %s219_s30  ;;  %s6275_s23 = smov 80   ;;  %vm2183_vm14 = vcmask 130048   ;;  %vm2427_vm15 = vcmask 123904   ;;  %vm2433_vm0 = vcmask 122880  }
  0x18   : > { %s6277_s7 = smov 112   ;;  %s215_s15 = sand.u32 1, %s6260_s19  }
  0x19   : > { %s6365_s9 = scalar_lea.vmem %s8972_s0, %s6070_s6  ;;  %s6276_s6 = smov 96  }
  0x1a   : > { %v6368_v0 = vld [vmem:[%s6365_s9 + $0xc] sm:$0xf]  ;;  %v6371_v1 = vld [vmem:[%s6365_s9 + $0x10] sm:$0xf]  ;;  %v6374_v2 = vld [vmem:[%s6365_s9] sm:$0xf] }
  0x1b   : > { %v339_v3 = vshrl.u32 %v6368_v0, 16  ;;  %v342_v4 = vshll.u32 %v6368_v0, 16  ;;  %v348_v5 = vshll.u32 %v6371_v1, 16  ;;  %v6380_v6 = vld [vmem:[%s6365_s9 + $0x4] sm:$0xf]  ;;  %v315_v7 = vshrl.u32 %v6374_v2, 16 }
  0x1c   : > { %279 = vst.msk [vmem:[#allocation3] sm:$0xf] %vm278_vm2, %v6374_v2  ;;  %281 = vst.msk [vmem:[#allocation3 + $0x10] sm:$0xf] %vm278_vm2, %v6368_v0  ;;  %v318_v8 = vshll.u32 %v6374_v2, 16  ;;  %v324_v9 = vshll.u32 %v6380_v6, 16 }
  0x1d   : > { %282 = vst.msk [vmem:[#allocation3 + $0x18] sm:$0xf] %vm278_vm2, %v6371_v1  ;;  %v6392_v10 = vld [vmem:[%s6365_s9 + $0x14] sm:$0x1]  ;;  %v352_v11 = vshrl.u32 %v6371_v1, 16  ;;  %v328_v12 = vshrl.u32 %v6380_v6, 16 }
  0x1e   : > { %280 = vst.msk [vmem:[#allocation3 + $0x8] sm:$0xf] %vm278_vm2, %v6380_v6  ;;  %v341_v13 = vrot.slane %v339_v3, 4  ;;  %v344_v14 = vrot.slane %v342_v4, 5  ;;  %v350_v15 = vrot.slane %v348_v5, 5  ;;  %v317_v16 = vrot.slane %v315_v7, 4 }
  0x1f   : > { %v6399_v17 = vld [vmem:[%s6365_s9 + $0x8] sm:$0x1]  ;;  %v320_v18 = vrot.slane %v318_v8, 5  ;;  %v326_v19 = vrot.slane %v324_v9, 5  ;;  %v354_v20 = vrot.slane %v352_v11, 4  ;;  %v358_v21 = vshll.u32 %v6392_v10, 16 }
  0x20   : > { %v6403_v22 = vld [vmem:[%s6365_s9 + $0x1c] sm:$0xf]  ;;  %v345_v23 = vor.u32 %v344_v14, %v341_v13  ;;  %v330_v24 = vrot.slane %v328_v12, 4  ;;  %v334_v25 = vshll.u32 %v6399_v17, 16  ;;  %v6407_v26 = vld [vmem:[%s6365_s9 + $0x20] sm:$0x1] }
  0x21   : > { %v372_v27 = vshll.u32 %v6403_v22, 16  ;;  %284 = vst.msk [vmem:[#allocation3 + $0x28] sm:$0xf] %vm278_vm2, %v6403_v22  ;;  %v321_v29 = vor.u32 %v320_v18, %v317_v16  ;;  %v355_v30 = vor.u32 %v354_v20, %v350_v15  ;;  %v360_v31 = vrot.slane %v358_v21, 5  ;;  %v6420_v33 = vld [vmem:[%s6365_s9 + $0x18] sm:$0xf] }
  0x22   : > { %v376_v32 = vshrl.u32 %v6403_v22, 16  ;;  %v6423_v34 = vld [vmem:[%s6365_s9 + $0x28] sm:$0xf]  ;;  %v346_v35 = vrot.slane %v345_v23, 4  ;;  %v331_v36 = vor.u32 %v330_v24, %v326_v19  ;;  %v336_v37 = vrot.slane %v334_v25, 5  ;;  %s5352_s26 = sshll.u32 %s215_s15, 8 }
  0x23   : > { %v6425_v38 = vrot.slane %v372_v27, 5  ;;  %283 = vst.msk [vmem:[#allocation3 + $0x20] sm:$0xf] %vm278_vm2, %v6420_v33  ;;  %286 = vst.msk [vmem:[#allocation3 + $0x38] sm:$0xf] %vm278_vm2, %v6423_v34  ;;  %v322_v39 = vrot.slane %v321_v29, 4 }
  0x24   : > { %v356_v40 = vrot.slane %v355_v30, 4  ;;  %v378_v41 = vrot.slane %v376_v32, 4  ;;  %v382_v42 = vshll.u32 %v6407_v26, 16  ;;  %v6433_v43 = vld [vmem:[%s6365_s9 + $0x24] sm:$0xf]  ;;  %v6437_v44 = vsel %vm6414_vm3, %v346_v35, %v350_v15  ;;  %s8674_s30 = scalar_lea.vmem [#allocation5], %s5352_s26 }
  0x25   : > { %9090 = vst [vmem:[#allocation9_spill] sm:$0xff] %v6437_v44  ;;  %v332_v45 = vrot.slane %v331_v36, 4  ;;  %v363_v46 = vshrl.u32 %v6420_v33, 16  ;;  %v366_v47 = vshll.u32 %v6420_v33, 16  ;;  %v6442_v48 = vld [vmem:[%s6365_s9 + $0x34] sm:$0xf]  ;;  %702 = vrot.lane.b32.xlu1 %v6437_v44, %s6270_s10  ;;  %v327_v49 = vsel %vm6414_vm3, %v322_v39, %v326_v19 }
  0x26   : > { %285 = vst.msk [vmem:[#allocation3 + $0x30] sm:$0xf] %vm278_vm2, %v6433_v43  ;;  %v379_v50 = vor.u32 %v378_v41, %v6425_v38  ;;  %v6452_v51 = vld [vmem:[%s6365_s9 + $0x2c] sm:$0x1]  ;;  %v6455_v52 = vld [vmem:[%s6365_s9 + $0x30] sm:$0xf]  ;;  %698 = vrot.lane.b32.xlu0 %v327_v49, %s6270_s10  ;;  %v6465_v54 = vsel %vm6414_vm3, %v356_v40, %v360_v31 }
  0x27   : > { %v6458_v53 = vld [vmem:[%s6365_s9 + $0x40] sm:$0xf]  ;;  %288 = vst.msk [vmem:[#allocation3 + $0x48] sm:$0xf] %vm278_vm2, %v6442_v48  ;;  %9091 = vst [vmem:[#allocation10_spill] sm:$0xff] %v6465_v54  ;;  %v337_v55 = vsel %vm6414_vm3, %v332_v45, %v336_v37  ;;  %v384_v56 = vrot.slane %v382_v42, 5 }
  0x28   : > { %v365_v57 = vrot.slane %v363_v46, 4  ;;  %v6470_v58 = vld [vmem:[%s6365_s9 + $0x3c] sm:$0xf]  ;;  %287 = vst.msk [vmem:[#allocation3 + $0x40] sm:$0xf] %vm278_vm2, %v6455_v52  ;;  %v380_v59 = vrot.slane %v379_v50, 4 }
  0x29   : > { %290 = vst.msk [vmem:[#allocation3 + $0x58] sm:$0xf] %vm278_vm2, %v6458_v53  ;;  %v368_v60 = vrot.slane %v366_v47, 5  ;;  %v396_v61 = vshll.u32 %v6423_v34, 16  ;;  %v400_v62 = vshrl.u32 %v6423_v34, 16  ;;  %v406_v3 = vshll.u32 %v6452_v51, 16  ;;  %704 = vrot.lane.b32.xlu1 %v6465_v54, %s6270_s10 }
  0x2a   : > { %v6479_v63 = vld [vmem:[%s6365_s9 + $0x4c] sm:$0xf]  ;;  %289 = vst.msk [vmem:[#allocation3 + $0x50] sm:$0xf] %vm278_vm2, %v6470_v58  ;;  %v387_v4 = vshrl.u32 %v6433_v43, 16  ;;  %v390_v5 = vshll.u32 %v6433_v43, 16  ;;  %v6496_v9 = vsel %vm6414_vm3, %v380_v59, %v384_v56  ;;  %700 = vrot.lane.b32.xlu0 %v337_v55, %s6270_s10 }
  0x2b   : > { %v6487_v7 = vld [vmem:[%s6365_s9 + $0x38] sm:$0x1]  ;;  %v420_v8 = vshll.u32 %v6442_v48, 16  ;;  %292 = vst.msk [vmem:[#allocation3 + $0x68] sm:$0xf] %vm278_vm2, %v6479_v63  ;;  %9092 = vst [vmem:[#allocation11_spill] sm:$0xff] %v6496_v9  ;;  %v369_v11 = vor.u32 %v368_v60, %v365_v57 }
  0x2c   : > { %v398_v12 = vrot.slane %v396_v61, 5  ;;  %v402_v13 = vrot.slane %v400_v62, 4  ;;  %v6499_v14 = vld [vmem:[%s6365_s9 + $0x48] sm:$0xf]  ;;  %v6502_v15 = vld [vmem:[%s6365_s9 + $0x58] sm:$0xf] }
  0x2d   : > { %v408_v16 = vrot.slane %v406_v3, 5  ;;  %v389_v18 = vrot.slane %v387_v4, 4  ;;  %v392_v19 = vrot.slane %v390_v5, 5  ;;  %v422_v20 = vrot.slane %v420_v8, 5  ;;  %v6506_v21 = vld [vmem:[%s6365_s9 + $0x44] sm:$0x1]  ;;  %708 = vrot.lane.b32.xlu1 %v6496_v9, %s6270_s10 }
  0x2e   : > { %291 = vst.msk [vmem:[#allocation3 + $0x60] sm:$0xf] %vm278_vm2, %v6499_v14  ;;  %294 = vst.msk [vmem:[#allocation3 + $0x78] sm:$0xf] %vm278_vm2, %v6502_v15  ;;  %v370_v23 = vrot.slane %v369_v11, 4  ;;  %v403_v24 = vor.u32 %v402_v13, %v398_v12  ;;  %v424_v25 = vshrl.u32 %v6442_v48, 16 }
  0x2f   : > { %v430_v27 = vshll.u32 %v6487_v7, 16  ;;  %v6515_v29 = vld [vmem:[%s6365_s9 + $0x54] sm:$0xf]  ;;  %v393_v30 = vor.u32 %v392_v19, %v389_v18  ;;  %v411_v31 = vshrl.u32 %v6455_v52, 16  ;;  %v414_v32 = vshll.u32 %v6455_v52, 16 }
  0x30   : > { %v444_v35 = vshll.u32 %v6458_v53, 16  ;;  %v6521_v36 = vld [vmem:[%s6365_s9 + $0x64] sm:$0xf]  ;;  %293 = vst.msk [vmem:[#allocation3 + $0x70] sm:$0xf] %vm278_vm2, %v6515_v29  ;;  %v6530_v37 = vsel %vm6414_vm3, %v370_v23, %v6425_v38  ;;  %v404_v39 = vrot.slane %v403_v24, 4 }
  0x31   : > { %9093 = vst [vmem:[#allocation12_spill] sm:$0xff] %v6530_v37  ;;  %v426_v40 = vrot.slane %v424_v25, 4  ;;  %v432_v41 = vrot.slane %v430_v27, 5  ;;  %296 = vst.msk [vmem:[#allocation3 + $0x88] sm:$0xf] %vm278_vm2, %v6521_v36  ;;  %706 = vrot.lane.b32.xlu0 %v6530_v37, %s6270_s10  ;;  %v394_v42 = vrot.slane %v393_v30, 4 }
  0x32   : > { %v413_v45 = vrot.slane %v411_v31, 4  ;;  %v416_v46 = vrot.slane %v414_v32, 5  ;;  %v6536_v47 = vrot.slane %v444_v35, 5  ;;  %v6539_v49 = vld [vmem:[%s6365_s9 + $0x60] sm:$0xf]  ;;  %v6543_v38 = vsel %vm6414_vm3, %v404_v39, %v408_v16 }
  0x33   : > { %9094 = vst [vmem:[#allocation13_spill] sm:$0xff] %v6543_v38  ;;  %v427_v50 = vor.u32 %v426_v40, %v422_v20  ;;  %v448_v55 = vshrl.u32 %v6458_v53, 16  ;;  %v454_v56 = vshll.u32 %v6506_v21, 16  ;;  %v6548_v57 = vld [vmem:[%s6365_s9 + $0x50] sm:$0x1]  ;;  %v6557_v60 = vsel %vm6414_vm3, %v394_v42, %v398_v12  ;;  %712 = vrot.lane.b32.xlu1 %v6543_v38, %s6270_s10 }
  0x34   : > { %v6551_v59 = vld [vmem:[%s6365_s9 + $0x70] sm:$0xf]  ;;  %295 = vst.msk [vmem:[#allocation3 + $0x80] sm:$0xf] %vm278_vm2, %v6539_v49  ;;  %9095 = vst [vmem:[#allocation14_spill] sm:$0xff] %v6557_v60  ;;  %v417_v61 = vor.u32 %v416_v46, %v413_v45  ;;  %v435_v62 = vshrl.u32 %v6470_v58, 16 }
  0x35   : > { %v438_v3 = vshll.u32 %v6470_v58, 16  ;;  %v6562_v4 = vld [vmem:[%s6365_s9 + $0x6c] sm:$0xf]  ;;  %v6565_v5 = vld [vmem:[%s6365_s9 + $0x7c] sm:$0xf]  ;;  %v428_v8 = vrot.slane %v427_v50, 4  ;;  %710 = vrot.lane.b32.xlu0 %v6557_v60, %s6270_s10 }
  0x36   : > { %9096 = vst [vmem:[#allocation15_spill] sm:$0xff] %v6562_v4  ;;  %298 = vst.msk [vmem:[#allocation3 + $0x98] sm:$0xf] %vm278_vm2, %v6551_v59  ;;  %v450_v11 = vrot.slane %v448_v55, 4  ;;  %v456_v12 = vrot.slane %v454_v56, 5  ;;  %v468_v13 = vshll.u32 %v6479_v63, 16 }
  0x37   : > { %297 = vst.msk [vmem:[#allocation3 + $0x90] sm:$0xf] %vm278_vm2, %v6562_v4  ;;  %300 = vst.msk [vmem:[#allocation3 + $0xa8] sm:$0xf] %vm278_vm2, %v6565_v5  ;;  %v418_v16 = vrot.slane %v417_v61, 4  ;;  %v437_v18 = vrot.slane %v435_v62, 4  ;;  %v6584_v25 = vsel %vm6414_vm3, %v428_v8, %v432_v41 }
  0x38   : > { %v440_v19 = vrot.slane %v438_v3, 5  ;;  %v472_v23 = vshrl.u32 %v6479_v63, 16  ;;  %v6580_v24 = vld [vmem:[%s6365_s9 + $0x78] sm:$0xf]  ;;  %9097 = vst [vmem:[#allocation16_spill] sm:$0xff] %v6584_v25  ;;  %v451_v27 = vor.u32 %v450_v11, %v6536_v47  ;;  %v6587_v30 = vrot.slane %v468_v13, 5  ;;  %716 = vrot.lane.b32.xlu1 %v6584_v25, %s6270_s10 }
  0x39   : > { %v478_v31 = vshll.u32 %v6548_v57, 16  ;;  %v6591_v32 = vld [vmem:[%s6365_s9 + $0x5c] sm:$0x1]  ;;  %v6594_v35 = vld [vmem:[%s6365_s9 + $0x88] sm:$0xf]  ;;  %v6600_v39 = vsel %vm6414_vm3, %v418_v16, %v422_v20  ;;  %v459_v42 = vshrl.u32 %v6499_v14, 16 }
  0x3a   : > { %9098 = vst [vmem:[#allocation17_spill] sm:$0xff] %v6594_v35  ;;  %299 = vst.msk [vmem:[#allocation3 + $0xa0] sm:$0xf] %vm278_vm2, %v6580_v24  ;;  %v441_v40 = vor.u32 %v440_v19, %v437_v18  ;;  %v474_v41 = vrot.slane %v472_v23, 4  ;;  %v6604_v45 = vld [vmem:[%s6365_s9 + $0x84] sm:$0xf]  ;;  %714 = vrot.lane.b32.xlu0 %v6600_v39, %s6270_s10 }
  0x3b   : > { %9099 = vst [vmem:[#allocation18_spill] sm:$0xff] %v6600_v39  ;;  %v6607_v46 = vld [vmem:[%s6365_s9 + $0x94] sm:$0xf]  ;;  %302 = vst.msk [vmem:[#allocation3 + $0xb8] sm:$0xf] %vm278_vm2, %v6594_v35  ;;  %v452_v50 = vrot.slane %v451_v27, 4 }
  0x3c   : > { %9100 = vst [vmem:[#allocation19_spill] sm:$0xff] %v6607_v46  ;;  %v480_v55 = vrot.slane %v478_v31, 5  ;;  %v462_v20 = vshll.u32 %v6499_v14, 16  ;;  %v492_v56 = vshll.u32 %v6502_v15, 16  ;;  %301 = vst.msk [vmem:[#allocation3 + $0xb0] sm:$0xf] %vm278_vm2, %v6604_v45  ;;  %v475_v62 = vor.u32 %v474_v41, %v6587_v30 }
  0x3d   : > { %304 = vst.msk [vmem:[#allocation3 + $0xc8] sm:$0xf] %vm278_vm2, %v6607_v46  ;;  %v442_v61 = vrot.slane %v441_v40, 4  ;;  %v461_v3 = vrot.slane %v459_v42, 4  ;;  %v496_v8 = vshrl.u32 %v6502_v15, 16  ;;  %v6628_v13 = vsel %vm6414_vm3, %v452_v50, %v456_v12 }
  0x3e   : > { %v6624_v11 = vld [vmem:[%s6365_s9 + $0x90] sm:$0xf]  ;;  %9102 = vst [vmem:[#allocation21_spill] sm:$0xff] %v6628_v13  ;;  %v464_v16 = vrot.slane %v462_v20, 5  ;;  %v494_v18 = vrot.slane %v492_v56, 5  ;;  %v502_v19 = vshll.u32 %v6591_v32, 16  ;;  %720 = vrot.lane.b32.xlu1 %v6628_v13, %s6270_s10 }
  0x3f   : > { %9101 = vst [vmem:[#allocation20_spill] sm:$0xff] %v6624_v11  ;;  %v6632_v23 = vld [vmem:[%s6365_s9 + $0xa0] sm:$0xf]  ;;  %303 = vst.msk [vmem:[#allocation3 + $0xc0] sm:$0xf] %vm278_vm2, %v6624_v11  ;;  %v6639_v27 = vsel %vm6414_vm3, %v442_v61, %v6536_v47  ;;  %v476_v31 = vrot.slane %v475_v62, 4 }
  0x40   : > { %9103 = vst [vmem:[#allocation22_spill] sm:$0xff] %v6639_v27  ;;  %v498_v40 = vrot.slane %v496_v8, 4  ;;  %v483_v12 = vshrl.u32 %v6515_v29, 16  ;;  %v6643_v41 = vld [vmem:[%s6365_s9 + $0x68] sm:$0x1]  ;;  %v465_v42 = vor.u32 %v464_v16, %v461_v3  ;;  %v504_v50 = vrot.slane %v502_v19, 5  ;;  %718 = vrot.lane.b32.xlu0 %v6639_v27, %s6270_s10 }
  0x41   : > { %306 = vst.msk [vmem:[#allocation3 + $0xd8] sm:$0xf] %vm278_vm2, %v6632_v23  ;;  %v486_v47 = vshll.u32 %v6515_v29, 16  ;;  %v516_v20 = vshll.u32 %v6521_v36, 16  ;;  %v6652_v56 = vld [vmem:[%s6365_s9 + $0x9c] sm:$0xf]  ;;  %v6658_v61 = vsel %vm6414_vm3, %v476_v31, %v480_v55 }
  0x42   : > { %9104 = vst [vmem:[#allocation23_spill] sm:$0xff] %v6652_v56  ;;  %9105 = vst [vmem:[#allocation24_spill] sm:$0xff] %v6658_v61  ;;  %v499_v62 = vor.u32 %v498_v40, %v494_v18  ;;  %v485_v8 = vrot.slane %v483_v12, 4  ;;  %v520_v3 = vshrl.u32 %v6521_v36, 16  ;;  %v6662_v16 = vld [vmem:[%s6365_s9 + $0x74] sm:$0x1]  ;;  %724 = vrot.lane.b32.xlu1 %v6658_v61, %s6270_s10 }
  0x43   : > { %9106 = vst [vmem:[#allocation25_spill] sm:$0xff] %v6662_v16  ;;  %v6665_v19 = vld [vmem:[%s6365_s9 + $0xac] sm:$0xf]  ;;  %305 = vst.msk [vmem:[#allocation3 + $0xd0] sm:$0xf] %vm278_vm2, %v6652_v56  ;;  %v466_v13 = vrot.slane %v465_v42, 4 }
  0x44   : > { %v488_v39 = vrot.slane %v486_v47, 5  ;;  %v518_v27 = vrot.slane %v516_v20, 5  ;;  %v526_v25 = vshll.u32 %v6643_v41, 16  ;;  %v6671_v55 = vld [vmem:[%s6365_s9 + $0xa8] sm:$0xf]  ;;  %v500_v31 = vrot.slane %v499_v62, 4 }
  0x45   : > { %9107 = vst [vmem:[#allocation26_spill] sm:$0xff] %v6671_v55  ;;  %308 = vst.msk [vmem:[#allocation3 + $0xe8] sm:$0xf] %vm278_vm2, %v6665_v19  ;;  %v522_v40 = vrot.slane %v520_v3, 4  ;;  %v507_v12 = vshrl.u32 %v6539_v49, 16  ;;  %v510_v60 = vshll.u32 %v6539_v49, 16  ;;  %v6687_v42 = vsel %vm6414_vm3, %v466_v13, %v6587_v30 }
  0x46   : > { %v6678_v38 = vld [vmem:[%s6365_s9 + $0xb8] sm:$0xf]  ;;  %307 = vst.msk [vmem:[#allocation3 + $0xe0] sm:$0xf] %vm278_vm2, %v6671_v55  ;;  %9109 = vst [vmem:[#allocation28_spill] sm:$0xff] %v6687_v42  ;;  %v489_v47 = vor.u32 %v488_v39, %v485_v8  ;;  %v528_v20 = vrot.slane %v526_v25, 5  ;;  %722 = vrot.lane.b32.xlu0 %v6687_v42, %s6270_s10  ;;  %v6699_v61 = vsel %vm6414_vm3, %v500_v31, %v504_v50 }
  0x47   : > { %9108 = vst [vmem:[#allocation27_spill] sm:$0xff] %v6678_v38  ;;  %v540_v62 = vshll.u32 %v6551_v59, 16  ;;  %v6691_v3 = vld [vmem:[%s6365_s9 + $0xb4] sm:$0xf]  ;;  %310 = vst.msk [vmem:[#allocation3 + $0xf8] sm:$0xf] %vm278_vm2, %v6678_v38  ;;  %v523_v37 = vor.u32 %v522_v40, %v518_v27  ;;  %728 = vrot.lane.b32.xlu1 %v6699_v61, %s6270_s10 }
  0x48   : > { %9110 = vst [vmem:[#allocation29_spill] sm:$0xff] %v6691_v3  ;;  %9111 = vst [vmem:[#allocation30_spill] sm:$0xff] %v6699_v61  ;;  %v509_v9 = vrot.slane %v507_v12, 4  ;;  %v512_v30 = vrot.slane %v510_v60, 5  ;;  %v6702_v13 = vld [vmem:[%s6365_s9 + $0x80] sm:$0x1] }
  0x49   : > { %309 = vst.msk [vmem:[#allocation3 + $0xf0] sm:$0xf] %vm278_vm2, %v6691_v3  ;;  %v490_v25 = vrot.slane %v489_v47, 4  ;;  %v542_v39 = vrot.slane %v540_v62, 5  ;;  %v544_v8 = vshrl.u32 %v6551_v59, 16  ;;  %v550_v44 = vshll.u32 %v6662_v16, 16 }
  0x4a   : > { %v524_v42 = vrot.slane %v523_v37, 4  ;;  %v513_v54 = vor.u32 %v512_v30, %v509_v9  ;;  %v531_v50 = vshrl.u32 %v6562_v4, 16  ;;  %v534_v31 = vshll.u32 %v6562_v4, 16  ;;  %v6724_v4 = vld [vmem:[%s6365_s9 + $0x8c] sm:$0x1] }
  0x4b   : > { %v6714_v60 = vsel %vm6414_vm3, %v490_v25, %v494_v18  ;;  %v546_v40 = vrot.slane %v544_v8, 4  ;;  %v552_v12 = vrot.slane %v550_v44, 5  ;;  %v564_v47 = vshll.u32 %v6565_v5, 16 }
  0x4c   : > { %9112 = vst [vmem:[#allocation31_spill] sm:$0xff] %v6714_v60  ;;  %726 = vrot.lane.b32.xlu0 %v6714_v60, %s6270_s10  ;;  %v6721_v9 = vsel %vm6414_vm3, %v524_v42, %v528_v20  ;;  %v514_v37 = vrot.slane %v513_v54, 4  ;;  %v533_v62 = vrot.slane %v531_v50, 4  ;;  %v536_v30 = vrot.slane %v534_v31, 5 }
  0x4d   : > { %9113 = vst [vmem:[#allocation32_spill] sm:$0xff] %v6721_v9  ;;  %v547_v61 = vor.u32 %v546_v40, %v542_v39  ;;  %v566_v16 = vrot.slane %v564_v47, 5  ;;  %v568_v18 = vshrl.u32 %v6565_v5, 16  ;;  %v574_v44 = vshll.u32 %v6702_v13, 16  ;;  %732 = vrot.lane.b32.xlu1 %v6721_v9, %s6270_s10 }
  0x4e   : > { %v6730_v25 = vsel %vm6414_vm3, %v514_v37, %v518_v27  ;;  %v537_v8 = vor.u32 %v536_v30, %v533_v62  ;;  %v555_v42 = vshrl.u32 %v6580_v24, 16  ;;  %v558_v54 = vshll.u32 %v6580_v24, 16  ;;  %v6741_v62 = vld [vmem:[%s6365_s9 + $0x98] sm:$0x1] }
  0x4f   : > { %9114 = vst [vmem:[#allocation33_spill] sm:$0xff] %v6730_v25  ;;  %v548_v20 = vrot.slane %v547_v61, 4  ;;  %v570_v50 = vrot.slane %v568_v18, 4  ;;  %v576_v31 = vrot.slane %v574_v44, 5  ;;  %v588_v40 = vshll.u32 %v6594_v35, 16  ;;  %9115 = vst [vmem:[#allocation34_spill] sm:$0xff] %v6741_v62 }
  0x50   : > { %730 = vrot.lane.b32.xlu0 %v6730_v25, %s6270_s10  ;;  %v538_v47 = vrot.slane %v537_v8, 4  ;;  %v557_v60 = vrot.slane %v555_v42, 4  ;;  %v560_v27 = vrot.slane %v558_v54, 5  ;;  %v592_v37 = vshrl.u32 %v6594_v35, 16 }
  0x51   : > { %v6745_v30 = vsel %vm6414_vm3, %v548_v20, %v552_v12  ;;  %v571_v9 = vor.u32 %v570_v50, %v566_v16  ;;  %v590_v61 = vrot.slane %v588_v40, 5  ;;  %v598_v18 = vshll.u32 %v6724_v4, 16 }
  0x52   : > { %9116 = vst [vmem:[#allocation35_spill] sm:$0xff] %v6745_v30  ;;  %v6750_v44 = vsel %vm6414_vm3, %v538_v47, %v542_v39  ;;  %v561_v8 = vor.u32 %v560_v27, %v557_v60  ;;  %v594_v42 = vrot.slane %v592_v37, 4  ;;  %v579_v54 = vshrl.u32 %v6604_v45, 16  ;;  %736 = vrot.lane.b32.xlu1 %v6745_v30, %s6270_s10  ;;  %v6761_v47 = vld [vmem:[%s6365_s9 + $0xa4] sm:$0x1] }
  0x53   : > { %9117 = vst [vmem:[#allocation36_spill] sm:$0xff] %v6750_v44  ;;  %v572_v25 = vrot.slane %v571_v9, 4  ;;  %v600_v35 = vrot.slane %v598_v18, 5  ;;  %v582_v12 = vshll.u32 %v6604_v45, 16  ;;  %v612_v20 = vshll.u32 %v6607_v46, 16 }
  0x54   : > { %734 = vrot.lane.b32.xlu0 %v6750_v44, %s6270_s10  ;;  %v562_v50 = vrot.slane %v561_v8, 4  ;;  %v595_v40 = vor.u32 %v594_v42, %v590_v61  ;;  %v581_v39 = vrot.slane %v579_v54, 4  ;;  %v616_v60 = vshrl.u32 %v6607_v46, 16 }
  0x55   : > { %v6765_v27 = vsel %vm6414_vm3, %v572_v25, %v576_v31  ;;  %v584_v9 = vrot.slane %v582_v12, 5  ;;  %v614_v37 = vrot.slane %v612_v20, 5  ;;  %v622_v18 = vshll.u32 %v6741_v62, 16  ;;  %v6788_v62 = vld [vmem:[%s6365_s9 + $0xb0] sm:$0x1] }
  0x56   : > { %9118 = vst [vmem:[#allocation37_spill] sm:$0xff] %v6765_v27  ;;  %v6770_v30 = vsel %vm6414_vm3, %v562_v50, %v566_v16  ;;  %v596_v44 = vrot.slane %v595_v40, 4  ;;  %v618_v8 = vrot.slane %v616_v60, 4  ;;  %v603_v42 = vshrl.u32 %v6624_v11, 16  ;;  %740 = vrot.lane.b32.xlu1 %v6765_v27, %s6270_s10 }
  0x57   : > { %9119 = vst [vmem:[#allocation38_spill] sm:$0xff] %v6770_v30  ;;  %v585_v54 = vor.u32 %v584_v9, %v581_v39  ;;  %v624_v46 = vrot.slane %v622_v18, 5  ;;  %v606_v25 = vshll.u32 %v6624_v11, 16  ;;  %v636_v31 = vshll.u32 %v6632_v23, 16 }
  0x58   : > { %738 = vrot.lane.b32.xlu0 %v6770_v30, %s6270_s10  ;;  %v6781_v16 = vsel %vm6414_vm3, %v596_v44, %v600_v35  ;;  %v619_v12 = vor.u32 %v618_v8, %v614_v37  ;;  %v605_v20 = vrot.slane %v603_v42, 4  ;;  %v640_v50 = vshrl.u32 %v6632_v23, 16 }
  0x59   : > { %9120 = vst [vmem:[#allocation39_spill] sm:$0xff] %v6781_v16  ;;  %v586_v40 = vrot.slane %v585_v54, 4  ;;  %v608_v60 = vrot.slane %v606_v25, 5  ;;  %v638_v39 = vrot.slane %v636_v31, 5  ;;  %v646_v9 = vshll.u32 %v6761_v47, 16 }
  0x5a   : > { %v620_v18 = vrot.slane %v619_v12, 4  ;;  %v642_v27 = vrot.slane %v640_v50, 4  ;;  %v627_v11 = vshrl.u32 %v6652_v56, 16  ;;  %v630_v30 = vshll.u32 %v6652_v56, 16  ;;  %744 = vrot.lane.b32.xlu1 %v6781_v16, %s6270_s10 }
  0x5b   : > { %v6794_v35 = vsel %vm6414_vm3, %v586_v40, %v590_v61  ;;  %v609_v44 = vor.u32 %v608_v60, %v605_v20  ;;  %v648_v8 = vrot.slane %v646_v9, 5  ;;  %v660_v42 = vshll.u32 %v6665_v19, 16 }
  0x5c   : > { %9121 = vst [vmem:[#allocation40_spill] sm:$0xff] %v6794_v35  ;;  %742 = vrot.lane.b32.xlu0 %v6794_v35, %s6270_s10  ;;  %v6801_v54 = vsel %vm6414_vm3, %v620_v18, %v624_v46  ;;  %v643_v25 = vor.u32 %v642_v27, %v638_v39  ;;  %v629_v31 = vrot.slane %v627_v11, 4  ;;  %v632_v12 = vrot.slane %v630_v30, 5  ;;  %v6808_v35 = vld [vmem:[%s6365_s9 + $0xbc] sm:$0x1] }
  0x5d   : > { %9122 = vst [vmem:[#allocation41_spill] sm:$0xff] %v6801_v54  ;;  %v610_v50 = vrot.slane %v609_v44, 4  ;;  %v662_v16 = vrot.slane %v660_v42, 5  ;;  %v664_v61 = vshrl.u32 %v6665_v19, 16  ;;  %v670_v20 = vshll.u32 %v6788_v62, 16 }
  0x5e   : > { %v644_v40 = vrot.slane %v643_v25, 4  ;;  %v633_v60 = vor.u32 %v632_v12, %v629_v31  ;;  %v651_v9 = vshrl.u32 %v6671_v55, 16  ;;  %v654_v56 = vshll.u32 %v6671_v55, 16  ;;  %748 = vrot.lane.b32.xlu1 %v6801_v54, %s6270_s10 }
  0x5f   : > { %v6814_v46 = vsel %vm6414_vm3, %v610_v50, %v614_v37  ;;  %v666_v11 = vrot.slane %v664_v61, 4  ;;  %v672_v30 = vrot.slane %v670_v20, 5  ;;  %v684_v27 = vshll.u32 %v6678_v38, 16 }
  0x60   : > { %9123 = vst [vmem:[#allocation42_spill] sm:$0xff] %v6814_v46  ;;  %746 = vrot.lane.b32.xlu0 %v6814_v46, %s6270_s10  ;;  %v6821_v18 = vsel %vm6414_vm3, %v644_v40, %v648_v8  ;;  %v634_v44 = vrot.slane %v633_v60, 4  ;;  %v653_v42 = vrot.slane %v651_v9, 4  ;;  %v656_v25 = vrot.slane %v654_v56, 5 }
  0x61   : > { %9124 = vst [vmem:[#allocation43_spill] sm:$0xff] %v6821_v18  ;;  %v667_v31 = vor.u32 %v666_v11, %v662_v16  ;;  %v686_v12 = vrot.slane %v684_v27, 5  ;;  %v688_v54 = vshrl.u32 %v6678_v38, 16  ;;  %v694_v37 = vshll.u32 %v6808_v35, 16 }
  0x62   : > { %v6827_v50 = vsel %vm6414_vm3, %v634_v44, %v638_v39  ;;  %v657_v61 = vor.u32 %v656_v25, %v653_v42  ;;  %v675_v20 = vshrl.u32 %v6691_v3, 16  ;;  %v678_v46 = vshll.u32 %v6691_v3, 16  ;;  %752 = vrot.lane.b32.xlu1 %v6821_v18, %s6270_s10  ;;  %v9143_v18 = vld [vmem:[#allocation20_spill] sm:$0xff] }
  0x63   : > { %9125 = vst [vmem:[#allocation44_spill] sm:$0xff] %v6827_v50  ;;  %v668_v8 = vrot.slane %v667_v31, 4  ;;  %v690_v56 = vrot.slane %v688_v54, 4  ;;  %v696_v40 = vrot.slane %v694_v37, 5  ;;  %v880_v60 = vrot.slane %v6380_v6, 5 }
  0x64   : > { %750 = vrot.lane.b32.xlu0 %v6827_v50, %s6270_s10  ;;  %v658_v9 = vrot.slane %v657_v61, 4  ;;  %v677_v11 = vrot.slane %v675_v20, 4  ;;  %v680_v39 = vrot.slane %v678_v46, 5  ;;  %v883_v44 = vrot.slane %v6399_v17, 5 }
  0x65   : > { %v6845_v54 = vsel %vm6414_vm3, %v668_v8, %v672_v30  ;;  %v691_v42 = vor.u32 %v690_v56, %v686_v12  ;;  %v882_v6 = vrot.slane %v880_v60, 4  ;;  %v5354_v25 = vrot.slane %v6374_v2, 9 }
  0x66   : > { %9128 = vst [vmem:[#allocation45_spill] sm:$0xff] %v6845_v54  ;;  %v6850_v31 = vsel %vm6414_vm3, %v658_v9, %v662_v16  ;;  %v681_v46 = vor.u32 %v680_v39, %v677_v11  ;;  %v887_v37 = vrot.slane %v6371_v1, 5  ;;  %v890_v61 = vrot.slane %v6392_v10, 5  ;;  %756 = vrot.lane.b32.xlu1 %v6845_v54, %s6270_s10  ;;  %v9142_v54 = vld [vmem:[#allocation34_spill] sm:$0xff] }
  0x67   : > { %9129 = vst [vmem:[#allocation46_spill] sm:$0xff] %v6850_v31  ;;  %v692_v17 = vrot.slane %v691_v42, 4  ;;  %v884_v30 = vsel %vm6838_vm6, %v882_v6, %v883_v44  ;;  %v881_v20 = vsel %vm6838_vm6, %v5354_v25, %v880_v60  ;;  %v5355_v2 = vrot.slane %v6368_v0, 9 }
  0x68   : > { %754 = vrot.lane.b32.xlu0 %v6850_v31, %s6270_s10  ;;  %v682_v16 = vrot.slane %v681_v46, 4  ;;  %v889_v8 = vrot.slane %v887_v37, 4  ;;  %v894_v56 = vrot.slane %v6403_v22, 5  ;;  %v897_v10 = vrot.slane %v6407_v26, 5 }
  0x69   : > { %v6867_v9 = vsel %vm6414_vm3, %v692_v17, %v696_v40  ;;  %v6871_v11 = vsel %vm6838_vm6, %v5355_v2, %v887_v37  ;;  %v5356_v60 = vrot.slane %v6420_v33, 9  ;;  %v901_v39 = vrot.slane %v6423_v34, 5 }
  0x6a   : > { %9130 = vst [vmem:[#allocation47_spill] sm:$0xff] %v6867_v9  ;;  %9131 = vst [vmem:[#allocation48_spill] sm:$0xff] %v6871_v11  ;;  %v6877_v44 = vsel %vm6414_vm3, %v682_v16, %v686_v12  ;;  %v6881_v42 = vsel %vm6838_vm6, %v889_v8, %v890_v61  ;;  %v896_v26 = vrot.slane %v894_v56, 4  ;;  %v904_v40 = vrot.slane %v6452_v51, 5  ;;  %760 = vrot.lane.b32.xlu1 %v6867_v9, %s6270_s10  ;;  %v9140_v9 = vld [vmem:[#allocation17_spill] sm:$0xff] }
  0x6b   : > { %9132 = vst [vmem:[#allocation49_spill] sm:$0xff] %v6877_v44  ;;  %9133 = vst [vmem:[#allocation50_spill] sm:$0xff] %v6881_v42  ;;  %v6888_v6 = vsel %vm6838_vm6, %v5356_v60, %v894_v56  ;;  %v903_v25 = vrot.slane %v901_v39, 4  ;;  %v5357_v46 = vrot.slane %v6433_v43, 9  ;;  %v908_v12 = vrot.slane %v6442_v48, 5 }
  0x6c   : > { %9134 = vst [vmem:[#allocation51_spill] sm:$0xff] %v6888_v6  ;;  %758 = vrot.lane.b32.xlu0 %v6877_v44, %s6270_s10  ;;  %v6896_v37 = vsel %vm6838_vm6, %v896_v26, %v897_v10  ;;  %1896 = vst.msk [vmem:[#allocation3 + $0x4] sm:$0xf] %vm278_vm2, %v6888_v6  ;;  %v911_v51 = vrot.slane %v6487_v7, 5  ;;  %v5358_v61 = vrot.slane %v6455_v52, 9  ;;  %v915_v17 = vrot.slane %v6458_v53, 5 }
  0x6d   : > { %9135 = vst [vmem:[#allocation52_spill] sm:$0xff] %v6896_v37  ;;  %1897 = vst.msk [vmem:[#allocation3 + $0xc] sm:$0xf] %vm278_vm2, %v6896_v37  ;;  %v6907_v2 = vsel %vm6838_vm6, %v903_v25, %v904_v40  ;;  %v6911_v16 = vsel %vm6838_vm6, %v5357_v46, %v901_v39  ;;  %v910_v8 = vrot.slane %v908_v12, 4  ;;  %v918_v56 = vrot.slane %v6506_v21, 5 }
  0x6e   : > { %9136 = vst [vmem:[#allocation53_spill] sm:$0xff] %v6907_v2  ;;  %9137 = vst [vmem:[#allocation54_spill] sm:$0xff] %v6911_v16  ;;  %v6920_v7 = vsel %vm6838_vm6, %v5358_v61, %v908_v12  ;;  %v917_v10 = vrot.slane %v915_v17, 4  ;;  %v5359_v60 = vrot.slane %v6470_v58, 9  ;;  %v922_v26 = vrot.slane %v6479_v63, 5  ;;  %992 = vrot.lane.b32.xlu1 %v884_v30, %s6271_s11 }
  0x6f   : > { %1899 = vst.msk [vmem:[#allocation3 + $0x1c] sm:$0xf] %vm278_vm2, %v6907_v2  ;;  %1898 = vst.msk [vmem:[#allocation3 + $0x14] sm:$0xf] %vm278_vm2, %v6911_v16  ;;  %v6927_v21 = vsel %vm6838_vm6, %v910_v8, %v911_v51  ;;  %v925_v39 = vrot.slane %v6548_v57, 5  ;;  %v5360_v40 = vrot.slane %v6499_v14, 9 }
  0x70   : > { %1900 = vst.msk [vmem:[#allocation3 + $0x24] sm:$0xf] %vm278_vm2, %v6920_v7  ;;  %v929_v25 = vrot.slane %v6502_v15, 5  ;;  %990 = vrot.lane.b32.xlu0 %v881_v20, %s6271_s11  ;;  %1901 = vst.msk [vmem:[#allocation3 + $0x2c] sm:$0xf] %vm278_vm2, %v6927_v21  ;;  %v6939_v30 = vsel %vm6838_vm6, %v917_v10, %v918_v56  ;;  %v6943_v46 = vsel %vm6838_vm6, %v5359_v60, %v915_v17  ;;  %v924_v12 = vrot.slane %v922_v26, 4 }
  0x71   : > { %v932_v57 = vrot.slane %v6591_v32, 5  ;;  %1903 = vst.msk [vmem:[#allocation3 + $0x3c] sm:$0xf] %vm278_vm2, %v6939_v30  ;;  %1902 = vst.msk [vmem:[#allocation3 + $0x34] sm:$0xf] %vm278_vm2, %v6943_v46  ;;  %v6952_v20 = vsel %vm6838_vm6, %v5360_v40, %v922_v26  ;;  %v5361_v61 = vrot.slane %v6515_v29, 9 }
  0x72   : > { %v931_v51 = vrot.slane %v929_v25, 4  ;;  %v936_v8 = vrot.slane %v6521_v36, 5  ;;  %v6958_v17 = vsel %vm6838_vm6, %v924_v12, %v925_v39  ;;  %1904 = vst.msk [vmem:[#allocation3 + $0x44] sm:$0xf] %vm278_vm2, %v6952_v20  ;;  %v939_v32 = vrot.slane %v6643_v41, 5  ;;  %996 = vrot.lane.b32.xlu1 %v6881_v42, %s6271_s11  ;;  %v9138_v41 = vld [vmem:[#allocation25_spill] sm:$0xff] }
  0x73   : > { %v5362_v56 = vrot.slane %v6539_v49, 9  ;;  %v943_v10 = vrot.slane %v6551_v59, 5  ;;  %1905 = vst.msk [vmem:[#allocation3 + $0x4c] sm:$0xf] %vm278_vm2, %v6958_v17  ;;  %v6975_v26 = vsel %vm6838_vm6, %v5361_v61, %v929_v25  ;;  %v946_v40 = vrot.slane %v9138_v41, 5 }
  0x74   : > { %v6971_v60 = vsel %vm6838_vm6, %v931_v51, %v932_v57  ;;  %v938_v39 = vrot.slane %v936_v8, 4  ;;  %994 = vrot.lane.b32.xlu0 %v6871_v11, %s6271_s11  ;;  %1906 = vst.msk [vmem:[#allocation3 + $0x54] sm:$0xf] %vm278_vm2, %v6975_v26  ;;  %v9139_v51 = vld [vmem:[#allocation15_spill] sm:$0xff]  ;;  %v950_v61 = vrot.slane %v6565_v5, 5  ;;  %v953_v28 = vrot.slane %v6702_v13, 5 }
  0x75   : > { %1907 = vst.msk [vmem:[#allocation3 + $0x5c] sm:$0xf] %vm278_vm2, %v6971_v60  ;;  %v6986_v12 = vsel %vm6838_vm6, %v5362_v56, %v936_v8  ;;  %v945_v57 = vrot.slane %v943_v10, 4  ;;  %v5363_v25 = vrot.slane %v9139_v51, 9  ;;  %v5364_v44 = vrot.slane %v6580_v24, 9 }
  0x76   : > { %v6992_v41 = vsel %vm6838_vm6, %v938_v39, %v939_v32  ;;  %1908 = vst.msk [vmem:[#allocation3 + $0x64] sm:$0xf] %vm278_vm2, %v6986_v12  ;;  %v957_v31 = vrot.slane %v9140_v9, 5  ;;  %v952_v56 = vrot.slane %v950_v61, 4  ;;  %v960_v39 = vrot.slane %v6724_v4, 5  ;;  %1000 = vrot.lane.b32.xlu1 %v6896_v37, %s6271_s11 }
  0x77   : > { %1909 = vst.msk [vmem:[#allocation3 + $0x6c] sm:$0xf] %vm278_vm2, %v6992_v41  ;;  %v7003_v8 = vsel %vm6838_vm6, %v945_v57, %v946_v40  ;;  %v7007_v32 = vsel %vm6838_vm6, %v5363_v25, %v943_v10  ;;  %v7018_v13 = vsel %vm6838_vm6, %v5364_v44, %v950_v61  ;;  %v5365_v10 = vrot.slane %v6604_v45, 9  ;;  %v9141_v57 = vld [vmem:[#allocation19_spill] sm:$0xff] }
  0x78   : > { %1911 = vst.msk [vmem:[#allocation3 + $0x7c] sm:$0xf] %vm278_vm2, %v7003_v8  ;;  %1910 = vst.msk [vmem:[#allocation3 + $0x74] sm:$0xf] %vm278_vm2, %v7007_v32  ;;  %v959_v40 = vrot.slane %v957_v31, 4  ;;  %v964_v25 = vrot.slane %v9141_v57, 5  ;;  %998 = vrot.lane.b32.xlu0 %v6888_v6, %s6271_s11  ;;  %v7026_v4 = vsel %vm6838_vm6, %v952_v56, %v953_v28 }
  0x79   : > { %1912 = vst.msk [vmem:[#allocation3 + $0x84] sm:$0xf] %vm278_vm2, %v7018_v13  ;;  %v967_v50 = vrot.slane %v9142_v54, 5  ;;  %v5366_v44 = vrot.slane %v9143_v18, 9  ;;  %v971_v61 = vrot.slane %v6632_v23, 5  ;;  %v7041_v28 = vsel %vm6838_vm6, %v5365_v10, %v957_v31 }
  0x7a   : > { %1913 = vst.msk [vmem:[#allocation3 + $0x8c] sm:$0xf] %vm278_vm2, %v7026_v4  ;;  %v7037_v37 = vsel %vm6838_vm6, %v959_v40, %v960_v39  ;;  %v966_v56 = vrot.slane %v964_v25, 4  ;;  %v974_v6 = vrot.slane %v6761_v47, 5  ;;  %1914 = vst.msk [vmem:[#allocation3 + $0x94] sm:$0xf] %vm278_vm2, %v7041_v28  ;;  %1004 = vrot.lane.b32.xlu1 %v6907_v2, %s6271_s11 }
  0x7b   : > { %1915 = vst.msk [vmem:[#allocation3 + $0x9c] sm:$0xf] %vm278_vm2, %v7037_v37  ;;  %v7050_v54 = vsel %vm6838_vm6, %v5366_v44, %v964_v25  ;;  %v973_v11 = vrot.slane %v971_v61, 4  ;;  %v9144_v39 = vld [vmem:[#allocation23_spill] sm:$0xff]  ;;  %v978_v42 = vrot.slane %v6665_v19, 5  ;;  %v981_v31 = vrot.slane %v6788_v62, 5 }
  0x7c   : > { %v5367_v40 = vrot.slane %v9144_v39, 9  ;;  %v7058_v47 = vsel %vm6838_vm6, %v966_v56, %v967_v50  ;;  %1916 = vst.msk [vmem:[#allocation3 + $0xa4] sm:$0xf] %vm278_vm2, %v7050_v54  ;;  %v5368_v10 = vrot.slane %v6671_v55, 9  ;;  %v985_v25 = vrot.slane %v6678_v38, 5  ;;  %1002 = vrot.lane.b32.xlu0 %v6911_v16, %s6271_s11 }
  0x7d   : > { %1917 = vst.msk [vmem:[#allocation3 + $0xac] sm:$0xf] %vm278_vm2, %v7058_v47  ;;  %v7071_v44 = vsel %vm6838_vm6, %v973_v11, %v974_v6  ;;  %v980_v56 = vrot.slane %v978_v42, 4  ;;  %v988_v62 = vrot.slane %v6808_v35, 5  ;;  %v5369_v11 = vrot.slane %v6691_v3, 9 }
  0x7e   : > { %v7075_v50 = vsel %vm6838_vm6, %v5367_v40, %v971_v61  ;;  %1919 = vst.msk [vmem:[#allocation3 + $0xbc] sm:$0xf] %vm278_vm2, %v7071_v44  ;;  %v7084_v16 = vsel %vm6838_vm6, %v5368_v10, %v978_v42  ;;  %v987_v2 = vrot.slane %v985_v25, 4  ;;  %1008 = vrot.lane.b32.xlu1 %v6927_v21, %s6271_s11 }
  0x7f   : > { %1918 = vst.msk [vmem:[#allocation3 + $0xb4] sm:$0xf] %vm278_vm2, %v7075_v50  ;;  %9145 = vst [vmem:[#allocation25_spill] sm:$0xff] %v7084_v16  ;;  %v7089_v6 = vsel %vm6838_vm6, %v980_v56, %v981_v31  ;;  %v7103_v42 = vsel %vm6838_vm6, %v5369_v11, %v985_v25 }
  0x80   : > { %9146 = vst [vmem:[#allocation15_spill] sm:$0xff] %v7089_v6  ;;  %1920 = vst.msk [vmem:[#allocation3 + $0xc4] sm:$0xf] %vm278_vm2, %v7084_v16  ;;  %v7099_v35 = vsel %vm6838_vm6, %v987_v2, %v988_v62  ;;  %1006 = vrot.lane.b32.xlu0 %v6920_v7, %s6271_s11 }
  0x81   : > { %1921 = vst.msk [vmem:[#allocation3 + $0xcc] sm:$0xf] %vm278_vm2, %v7089_v6  ;;  %9147 = vst [vmem:[#allocation17_spill] sm:$0xff] %v7099_v35 }
  0x82   : > { %9148 = vst [vmem:[#allocation19_spill] sm:$0xff] %v7103_v42  ;;  %1923 = vst.msk [vmem:[#allocation3 + $0xdc] sm:$0xf] %vm278_vm2, %v7099_v35  ;;  %1012 = vrot.lane.b32.xlu1 %v6939_v30, %s6271_s11 }
  0x83   : > { %1922 = vst.msk [vmem:[#allocation3 + $0xd4] sm:$0xf] %vm278_vm2, %v7103_v42 }
  0x84   : > { %1010 = vrot.lane.b32.xlu0 %v6943_v46, %s6271_s11 }
  0x86   : > { %1016 = vrot.lane.b32.xlu1 %v6958_v17, %s6271_s11 }
  0x88   : > { %1014 = vrot.lane.b32.xlu0 %v6952_v20, %s6271_s11 }
  0x8a   : > { %1020 = vrot.lane.b32.xlu1 %v6971_v60, %s6271_s11 }
  0x8c   : > { %1018 = vrot.lane.b32.xlu0 %v6975_v26, %s6271_s11 }
  0x8e   : > { %1024 = vrot.lane.b32.xlu1 %v6992_v41, %s6271_s11 }
  0x90   : > { %1022 = vrot.lane.b32.xlu0 %v6986_v12, %s6271_s11 }
  0x92   : > { %1028 = vrot.lane.b32.xlu1 %v7003_v8, %s6271_s11 }
  0x94   : > { %1026 = vrot.lane.b32.xlu0 %v7007_v32, %s6271_s11 }
  0x96   : > { %1032 = vrot.lane.b32.xlu1 %v7026_v4, %s6271_s11 }
  0x97   : > { %v703_v2 = vpop.permute.xlu1 %702 }
  0x98   : > { %1030 = vrot.lane.b32.xlu0 %v7018_v13, %s6271_s11  ;;  %797 = vst.msk [vmem:[#allocation3 + $0x10] sm:$0xf] %vm794_vm7, %v703_v2  ;;  %v699_v61 = vpop.permute.xlu0 %698 }
  0x99   : > { %795 = vst.msk [vmem:[#allocation3] sm:$0xf] %vm794_vm7, %v699_v61 }
  0x9a   : > { %1036 = vrot.lane.b32.xlu1 %v7037_v37, %s6271_s11 }
  0x9b   : > { %v705_v40 = vpop.permute.xlu1 %704 }
  0x9c   : > { %1034 = vrot.lane.b32.xlu0 %v7041_v28, %s6271_s11  ;;  %798 = vst.msk [vmem:[#allocation3 + $0x18] sm:$0xf] %vm794_vm7, %v705_v40  ;;  %v701_v31 = vpop.permute.xlu0 %700 }
  0x9d   : > { %796 = vst.msk [vmem:[#allocation3 + $0x8] sm:$0xf] %vm794_vm7, %v701_v31 }
  0x9e   : > { %1040 = vrot.lane.b32.xlu1 %v7058_v47, %s6271_s11 }
  0x9f   : > { %v709_v10 = vpop.permute.xlu1 %708 }
  0xa0   : > { %1038 = vrot.lane.b32.xlu0 %v7050_v54, %s6271_s11  ;;  %800 = vst.msk [vmem:[#allocation3 + $0x28] sm:$0xf] %vm794_vm7, %v709_v10 }
  0xa2   : > { %1044 = vrot.lane.b32.xlu1 %v7071_v44, %s6271_s11 }
  0xa3   : > { %v707_v25 = vpop.permute.xlu0 %706 }
  0xa4   : > { %1042 = vrot.lane.b32.xlu0 %v7075_v50, %s6271_s11  ;;  %799 = vst.msk [vmem:[#allocation3 + $0x20] sm:$0xf] %vm794_vm7, %v707_v25 }
  0xa5   : > { %v713_v56 = vpop.permute.xlu1 %712 }
  0xa6   : > { %1048 = vrot.lane.b32.xlu1 %v7089_v6, %s6271_s11  ;;  %802 = vst.msk [vmem:[#allocation3 + $0x38] sm:$0xf] %vm794_vm7, %v713_v56  ;;  %v6129_v6 = vld [vmem:[%s8973_s1 + $0x40] sm:$0xff]  }
  0xa7   : > { %v711_v62 = vpop.permute.xlu0 %710 }
  0xa8   : > { %1046 = vrot.lane.b32.xlu0 %v7084_v16, %s6271_s11  ;;  %801 = vst.msk [vmem:[#allocation3 + $0x30] sm:$0xf] %vm794_vm7, %v711_v62 }
  0xaa   : > { %1052 = vrot.lane.b32.xlu1 %v7099_v35, %s6271_s11  ;;  %v717_v11 = vpop.permute.xlu1 %716  ;;  %v6127_v35 = vld [vmem:[%s8973_s1 + $0x8] sm:$0xff]  }
  0xab   : > { %804 = vst.msk [vmem:[#allocation3 + $0x48] sm:$0xf] %vm794_vm7, %v717_v11 }
  0xac   : > { %1050 = vrot.lane.b32.xlu0 %v7103_v42, %s6271_s11  ;;  %v715_v2 = vpop.permute.xlu0 %714 }
  0xad   : > { %803 = vst.msk [vmem:[#allocation3 + $0x40] sm:$0xf] %vm794_vm7, %v715_v2 }
  0xae   : > { %1123 = vrot.lane.b32.xlu1 %v6371_v1, %s6272_s12 }
  0xb0   : > { %1121 = vrot.lane.b32.xlu0 %v6368_v0, %s6272_s12  ;;  %v721_v61 = vpop.permute.xlu1 %720 }
  0xb1   : > { %806 = vst.msk [vmem:[#allocation3 + $0x58] sm:$0xf] %vm794_vm7, %v721_v61 }
  0xb2   : > { %1127 = vrot.lane.b32.xlu1 %v6403_v22, %s6272_s12  ;;  %v719_v40 = vpop.permute.xlu0 %718 }
  0xb3   : > { %805 = vst.msk [vmem:[#allocation3 + $0x50] sm:$0xf] %vm794_vm7, %v719_v40 }
  0xb4   : > { %1125 = vrot.lane.b32.xlu0 %v6420_v33, %s6272_s12  ;;  %v725_v0 = vpop.permute.xlu1 %724 }
  0xb5   : > { %808 = vst.msk [vmem:[#allocation3 + $0x68] sm:$0xf] %vm794_vm7, %v725_v0 }
  0xb6   : > { %1131 = vrot.lane.b32.xlu1 %v6423_v34, %s6272_s12 }
  0xb8   : > { %1129 = vrot.lane.b32.xlu0 %v6433_v43, %s6272_s12  ;;  %v723_v1 = vpop.permute.xlu0 %722 }
  0xb9   : > { %807 = vst.msk [vmem:[#allocation3 + $0x60] sm:$0xf] %vm794_vm7, %v723_v1  ;;  %v729_v31 = vpop.permute.xlu1 %728 }
  0xba   : > { %1135 = vrot.lane.b32.xlu1 %v6442_v48, %s6272_s12  ;;  %810 = vst.msk [vmem:[#allocation3 + $0x78] sm:$0xf] %vm794_vm7, %v729_v31 }
  0xbc   : > { %1133 = vrot.lane.b32.xlu0 %v6455_v52, %s6272_s12 }
  0xbe   : > { %v727_v10 = vpop.permute.xlu0 %726  ;;  %1139 = vrot.lane.b32.xlu1 %v6458_v53, %s6272_s12 }
  0xbf   : > { %809 = vst.msk [vmem:[#allocation3 + $0x70] sm:$0xf] %vm794_vm7, %v727_v10  ;;  %v733_v25 = vpop.permute.xlu1 %732 }
  0xc0   : > { %1137 = vrot.lane.b32.xlu0 %v6470_v58, %s6272_s12  ;;  %812 = vst.msk [vmem:[#allocation3 + $0x88] sm:$0xf] %vm794_vm7, %v733_v25 }
  0xc2   : > { %v731_v56 = vpop.permute.xlu0 %730  ;;  %1143 = vrot.lane.b32.xlu1 %v6479_v63, %s6272_s12 }
  0xc3   : > { %811 = vst.msk [vmem:[#allocation3 + $0x80] sm:$0xf] %vm794_vm7, %v731_v56 }
  0xc4   : > { %1141 = vrot.lane.b32.xlu0 %v6499_v14, %s6272_s12  ;;  %v737_v62 = vpop.permute.xlu1 %736 }
  0xc5   : > { %814 = vst.msk [vmem:[#allocation3 + $0x98] sm:$0xf] %vm794_vm7, %v737_v62 }
  0xc6   : > { %v735_v11 = vpop.permute.xlu0 %734  ;;  %1147 = vrot.lane.b32.xlu1 %v6502_v15, %s6272_s12 }
  0xc7   : > { %813 = vst.msk [vmem:[#allocation3 + $0x90] sm:$0xf] %vm794_vm7, %v735_v11 }
  0xc8   : > { %1145 = vrot.lane.b32.xlu0 %v6515_v29, %s6272_s12  ;;  %v741_v2 = vpop.permute.xlu1 %740 }
  0xc9   : > { %816 = vst.msk [vmem:[#allocation3 + $0xa8] sm:$0xf] %vm794_vm7, %v741_v2 }
  0xca   : > { %v739_v61 = vpop.permute.xlu0 %738  ;;  %1151 = vrot.lane.b32.xlu1 %v6521_v36, %s6272_s12 }
  0xcb   : > { %815 = vst.msk [vmem:[#allocation3 + $0xa0] sm:$0xf] %vm794_vm7, %v739_v61 }
  0xcc   : > { %1149 = vrot.lane.b32.xlu0 %v6539_v49, %s6272_s12  ;;  %v745_v40 = vpop.permute.xlu1 %744 }
  0xcd   : > { %818 = vst.msk [vmem:[#allocation3 + $0xb8] sm:$0xf] %vm794_vm7, %v745_v40 }
  0xce   : > { %v743_v0 = vpop.permute.xlu0 %742  ;;  %1155 = vrot.lane.b32.xlu1 %v6551_v59, %s6272_s12 }
  0xcf   : > { %817 = vst.msk [vmem:[#allocation3 + $0xb0] sm:$0xf] %vm794_vm7, %v743_v0  ;;  %v6121_v0 = vld [vmem:[%s8973_s1 + $0x38] sm:$0xff]  }
  0xd0   : > { %1153 = vrot.lane.b32.xlu0 %v9139_v51, %s6272_s12  ;;  %v749_v1 = vpop.permute.xlu1 %748 }
  0xd1   : > { %820 = vst.msk [vmem:[#allocation3 + $0xc8] sm:$0xf] %vm794_vm7, %v749_v1 }
  0xd2   : > { %v747_v31 = vpop.permute.xlu0 %746  ;;  %1159 = vrot.lane.b32.xlu1 %v6565_v5, %s6272_s12 }
  0xd3   : > { %819 = vst.msk [vmem:[#allocation3 + $0xc0] sm:$0xf] %vm794_vm7, %v747_v31  ;;  %v9065_v31 = vmov 0  }
  0xd4   : > { %1157 = vrot.lane.b32.xlu0 %v6580_v24, %s6272_s12  ;;  %v753_v10 = vpop.permute.xlu1 %752  ;;  %2232 = vmatprep.subr.bf16.mxu0 %v9065_v31 }
  0xd5   : > { %822 = vst.msk [vmem:[#allocation3 + $0xd8] sm:$0xf] %vm794_vm7, %v753_v10  ;;  %4983 = vmatprep.subr.bf16.mxu1 %v9065_v31  ;;  %2233 = vmatpush1.bf16.msra.mxu0 %v6121_v0 }
  0xd6   : > { %v751_v25 = vpop.permute.xlu0 %750  ;;  %1163 = vrot.lane.b32.xlu1 %v9140_v9, %s6272_s12  ;;  %2234 = vmatprep.subr.bf16.mxu0 %v9065_v31 }
  0xd7   : > { %821 = vst.msk [vmem:[#allocation3 + $0xd0] sm:$0xf] %vm794_vm7, %v751_v25  ;;  %v7258_v25 = vld [vmem:[%s6365_s9 + $0xc4] sm:$0xf] }
  0xd8   : > { %1161 = vrot.lane.b32.xlu0 %v6604_v45, %s6272_s12  ;;  %v757_v56 = vpop.permute.xlu1 %756 }
  0xd9   : > { %824 = vst.msk [vmem:[#allocation3 + $0xe8] sm:$0xf] %vm794_vm7, %v757_v56  ;;  %v6122_v56 = vld [vmem:[%s8973_s1 + $0x30] sm:$0xff]  }
  0xda   : > { %v755_v62 = vpop.permute.xlu0 %754  ;;  %1167 = vrot.lane.b32.xlu1 %v9141_v57, %s6272_s12  ;;  %2235 = vmatpush1.bf16.msra.mxu0 %v6122_v56  ;;  %v6124_v56 = vld [vmem:[%s8973_s1 + $0x20] sm:$0xff]  }
  0xdb   : > { %823 = vst.msk [vmem:[#allocation3 + $0xe0] sm:$0xf] %vm794_vm7, %v755_v62  ;;  %2236 = vmatprep.subr.bf16.mxu0 %v9065_v31 }
  0xdc   : > { %1165 = vrot.lane.b32.xlu0 %v9143_v18, %s6272_s12  ;;  %v761_v11 = vpop.permute.xlu1 %760 }
  0xdd   : > { %826 = vst.msk [vmem:[#allocation3 + $0xf8] sm:$0xf] %vm794_vm7, %v761_v11  ;;  %v7264_v11 = vld [vmem:[%s6365_s9 + $0xc0] sm:$0xf] }
  0xde   : > { %v759_v2 = vpop.permute.xlu0 %758  ;;  %1171 = vrot.lane.b32.xlu1 %v6632_v23, %s6272_s12 }
  0xdf   : > { %825 = vst.msk [vmem:[#allocation3 + $0xf0] sm:$0xf] %vm794_vm7, %v759_v2 }
  0xe0   : > { %1169 = vrot.lane.b32.xlu0 %v9144_v39, %s6272_s12  ;;  %v993_v61 = vpop.permute.xlu1 %992 }
  0xe1   : > { %1088 = vst.msk [vmem:[#allocation3 + $0x8] sm:$0xf] %vm1086_vm8, %v993_v61  ;;  %v6123_v61 = vld [vmem:[%s8973_s1 + $0x28] sm:$0xff]  }
  0xe2   : > { %v991_v40 = vpop.permute.xlu0 %990  ;;  %1175 = vrot.lane.b32.xlu1 %v6665_v19, %s6272_s12  ;;  %2237 = vmatpush1.bf16.msra.mxu0 %v6123_v61  ;;  %v9151_v61 = vld [vmem:[#allocation11_spill] sm:$0xff] }
  0xe3   : > { %1087 = vst.msk [vmem:[#allocation3] sm:$0xf] %vm1086_vm8, %v991_v40  ;;  %2238 = vmatprep.subr.bf16.mxu0 %v9065_v31 }
  0xe4   : > { %1173 = vrot.lane.b32.xlu0 %v6671_v55, %s6272_s12  ;;  %v997_v1 = vpop.permute.xlu1 %996 }
  0xe5   : > { %1090 = vst.msk [vmem:[#allocation3 + $0x18] sm:$0xf] %vm1086_vm8, %v997_v1  ;;  %v9149_v1 = vld [vmem:[#allocation10_spill] sm:$0xff] }
  0xe6   : > { %v995_v10 = vpop.permute.xlu0 %994  ;;  %1179 = vrot.lane.b32.xlu1 %v6678_v38, %s6272_s12  ;;  %2239 = vmatpush1.bf16.msra.mxu0 %v6124_v56  ;;  %v9153_v56 = vld [vmem:[#allocation13_spill] sm:$0xff]  ;;  %v6128_v38 = vld [vmem:[%s8973_s1] sm:$0xff]  }
  0xe7   : > { %1089 = vst.msk [vmem:[#allocation3 + $0x10] sm:$0xf] %vm1086_vm8, %v995_v10  ;;  %v9150_v10 = vld [vmem:[#allocation9_spill] sm:$0xff]  ;;  %2240 = vmatprep.subr.bf16.mxu0 %v9065_v31 }
  0xe8   : > { %1177 = vrot.lane.b32.xlu0 %v6691_v3, %s6272_s12  ;;  %v1001_v62 = vpop.permute.xlu1 %1000 }
  0xe9   : > { %1092 = vst.msk [vmem:[#allocation3 + $0x28] sm:$0xf] %vm1086_vm8, %v1001_v62 }
  0xea   : > { %v999_v2 = vpop.permute.xlu0 %998  ;;  %1183 = vrot.lane.b32.xlu1 %v7258_v25, %s6272_s12 }
  0xeb   : > { %1091 = vst.msk [vmem:[#allocation3 + $0x20] sm:$0xf] %vm1086_vm8, %v999_v2 }
  0xec   : > { %1181 = vrot.lane.b32.xlu0 %v7264_v11, %s6272_s12  ;;  %v1005_v40 = vpop.permute.xlu1 %1004 }
  0xed   : > { %1094 = vst.msk [vmem:[#allocation3 + $0x38] sm:$0xf] %vm1086_vm8, %v1005_v40  ;;  %v9152_v40 = vld [vmem:[#allocation12_spill] sm:$0xff] }
  0xee   : > { %v1003_v0 = vpop.permute.xlu0 %1002  ;;  %1308 = vrot.lane.b32.xlu1 %v9149_v1, %s6274_s25 }
  0xef   : > { %1093 = vst.msk [vmem:[#allocation3 + $0x30] sm:$0xf] %vm1086_vm8, %v1003_v0  ;;  %v6125_v0 = vld [vmem:[%s8973_s1 + $0x18] sm:$0xff]  }
  0xf0   : > { %1306 = vrot.lane.b32.xlu0 %v9150_v10, %s6274_s25  ;;  %v1009_v62 = vpop.permute.xlu1 %1008  ;;  %2241 = vmatpush1.bf16.msra.mxu0 %v6125_v0  ;;  %v6126_v10 = vld [vmem:[%s8973_s1 + $0x10] sm:$0xff]  }
  0xf1   : > { %1096 = vst.msk [vmem:[#allocation3 + $0x48] sm:$0xf] %vm1086_vm8, %v1009_v62  ;;  %2242 = vmatprep.subr.bf16.mxu0 %v9065_v31  ;;  %v9155_v0 = vld [vmem:[#allocation16_spill] sm:$0xff] }
  0xf2   : > { %v1007_v2 = vpop.permute.xlu0 %1006  ;;  %1312 = vrot.lane.b32.xlu1 %v9151_v61, %s6274_s25 }
  0xf3   : > { %1095 = vst.msk [vmem:[#allocation3 + $0x40] sm:$0xf] %vm1086_vm8, %v1007_v2  ;;  %v9154_v2 = vld [vmem:[#allocation14_spill] sm:$0xff] }
  0xf4   : > { %1310 = vrot.lane.b32.xlu0 %v9152_v40, %s6274_s25  ;;  %v1013_v1 = vpop.permute.xlu1 %1012  ;;  %2243 = vmatpush1.bf16.msra.mxu0 %v6126_v10  ;;  %v9157_v10 = vld [vmem:[#allocation21_spill] sm:$0xff] }
  0xf5   : > { %1098 = vst.msk [vmem:[#allocation3 + $0x58] sm:$0xf] %vm1086_vm8, %v1013_v1  ;;  %2244 = vmatprep.subr.bf16.mxu0 %v9065_v31 }
  0xf6   : > { %v1011_v62 = vpop.permute.xlu0 %1010  ;;  %1316 = vrot.lane.b32.xlu1 %v9153_v56, %s6274_s25 }
  0xf7   : > { %1097 = vst.msk [vmem:[#allocation3 + $0x50] sm:$0xf] %vm1086_vm8, %v1011_v62  ;;  %v9156_v62 = vld [vmem:[#allocation18_spill] sm:$0xff] }
  0xf8   : > { %1314 = vrot.lane.b32.xlu0 %v9154_v2, %s6274_s25  ;;  %v1017_v42 = vpop.permute.xlu1 %1016  ;;  %2245 = vmatpush1.bf16.msra.mxu0 %v6127_v35  ;;  %v9159_v35 = vld [vmem:[#allocation50_spill] sm:$0xff] }
  0xf9   : > { %1100 = vst.msk [vmem:[#allocation3 + $0x68] sm:$0xf] %vm1086_vm8, %v1017_v42  ;;  %2246 = vmatprep.subr.bf16.mxu0 %v9065_v31 }
  0xfa   : > { %v1015_v1 = vpop.permute.xlu0 %1014  ;;  %1320 = vrot.lane.b32.xlu1 %v9155_v0, %s6274_s25 }
  0xfb   : > { %1099 = vst.msk [vmem:[#allocation3 + $0x60] sm:$0xf] %vm1086_vm8, %v1015_v1  ;;  %v9158_v1 = vld [vmem:[#allocation22_spill] sm:$0xff] }
  0xfc   : > { %1318 = vrot.lane.b32.xlu0 %v9156_v62, %s6274_s25  ;;  %v1021_v3 = vpop.permute.xlu1 %1020  ;;  %2247 = vmatpush1.bf16.msra.mxu0 %v6128_v38 }
  0xfd   : > { %1102 = vst.msk [vmem:[#allocation3 + $0x78] sm:$0xf] %vm1086_vm8, %v1021_v3  ;;  %2262 = vmatprep.subr.bf16.mxu0 %v9065_v31 }
  0xfe   : > { %v1019_v42 = vpop.permute.xlu0 %1018  ;;  %1324 = vrot.lane.b32.xlu1 %v9157_v10, %s6274_s25 }
  0xff   : > { %1101 = vst.msk [vmem:[#allocation3 + $0x70] sm:$0xf] %vm1086_vm8, %v1019_v42  ;;  %v9160_v42 = vld [vmem:[#allocation48_spill] sm:$0xff] }
 0x100   : > { %1322 = vrot.lane.b32.xlu0 %v9158_v1, %s6274_s25  ;;  %v1025_v16 = vpop.permute.xlu1 %1024  ;;  %2263 = vmatpush2.bf16.msra.mxu0 %v6129_v6  ;;  %v9162_v6 = vld [vmem:[#allocation51_spill] sm:$0xff] }
 0x101   : > { %1104 = vst.msk [vmem:[#allocation3 + $0x88] sm:$0xf] %vm1086_vm8, %v1025_v16 }
 0x102   : > { %v1023_v3 = vpop.permute.xlu0 %1022  ;;  %1445 = vrot.lane.b32.xlu1 %v9159_v35, %s6275_s23 }
 0x103   : > { %1103 = vst.msk [vmem:[#allocation3 + $0x80] sm:$0xf] %vm1086_vm8, %v1023_v3 }
 0x104   : > { %1443 = vrot.lane.b32.xlu0 %v9160_v42, %s6275_s23  ;;  %v1029_v55 = vpop.permute.xlu1 %1028 }
 0x105   : > { %1106 = vst.msk [vmem:[#allocation3 + $0x98] sm:$0xf] %vm1086_vm8, %v1029_v55 }
 0x106   : > { %v1027_v16 = vpop.permute.xlu0 %1026  ;;  %1576 = vrot.lane.b32.xlu1 %v6403_v22, %s6276_s6 }
 0x107   : > { %1105 = vst.msk [vmem:[#allocation3 + $0x90] sm:$0xf] %vm1086_vm8, %v1027_v16 }
 0x108   : > { %1574 = vrot.lane.b32.xlu0 %v6420_v33, %s6276_s6  ;;  %v1033_v38 = vpop.permute.xlu1 %1032  ;;  %v9161_v33 = vld [vmem:[#allocation52_spill] sm:$0xff] }
 0x109   : > { %1108 = vst.msk [vmem:[#allocation3 + $0xa8] sm:$0xf] %vm1086_vm8, %v1033_v38 }
 0x10a   : > { %v1031_v3 = vpop.permute.xlu0 %1030  ;;  %1729 = vrot.lane.b32.xlu1 %v9151_v61, %s6277_s7 }
 0x10b   : > { %1107 = vst.msk [vmem:[#allocation3 + $0xa0] sm:$0xf] %vm1086_vm8, %v1031_v3 }
 0x10c   : > { %1727 = vrot.lane.b32.xlu0 %v9152_v40, %s6277_s7  ;;  %v1037_v55 = vpop.permute.xlu1 %1036 }
 0x10d   : > { %1110 = vst.msk [vmem:[#allocation3 + $0xb8] sm:$0xf] %vm1086_vm8, %v1037_v55 }
 0x10e   : > { %v1035_v22 = vpop.permute.xlu0 %1034  ;;  %1449 = vrot.lane.b32.xlu1 %v9161_v33, %s6275_s23 }
 0x10f   : > { %1109 = vst.msk [vmem:[#allocation3 + $0xb0] sm:$0xf] %vm1086_vm8, %v1035_v22 }
 0x110   : > { %1447 = vrot.lane.b32.xlu0 %v9162_v6, %s6275_s23  ;;  %v1041_v35 = vpop.permute.xlu1 %1040 }
 0x111   : > { %1112 = vst.msk [vmem:[#allocation3 + $0xc8] sm:$0xf] %vm1086_vm8, %v1041_v35 }
 0x112   : > { %v1039_v42 = vpop.permute.xlu0 %1038  ;;  %1580 = vrot.lane.b32.xlu1 %v6423_v34, %s6276_s6  ;;  %v9163_v34 = vld [vmem:[#allocation53_spill] sm:$0xff] }
 0x113   : > { %1111 = vst.msk [vmem:[#allocation3 + $0xc0] sm:$0xf] %vm1086_vm8, %v1039_v42 }
 0x114   : > { %1578 = vrot.lane.b32.xlu0 %v6433_v43, %s6276_s6  ;;  %v1045_v16 = vpop.permute.xlu1 %1044  ;;  %v9164_v43 = vld [vmem:[#allocation54_spill] sm:$0xff] }
 0x115   : > { %1114 = vst.msk [vmem:[#allocation3 + $0xd8] sm:$0xf] %vm1086_vm8, %v1045_v16 }
 0x116   : > { %v1043_v38 = vpop.permute.xlu0 %1042  ;;  %1733 = vrot.lane.b32.xlu1 %v9153_v56, %s6277_s7 }
 0x117   : > { %1113 = vst.msk [vmem:[#allocation3 + $0xd0] sm:$0xf] %vm1086_vm8, %v1043_v38 }
 0x118   : > { %1731 = vrot.lane.b32.xlu0 %v9154_v2, %s6277_s7  ;;  %v1049_v3 = vpop.permute.xlu1 %1048 }
 0x119   : > { %1116 = vst.msk [vmem:[#allocation3 + $0xe8] sm:$0xf] %vm1086_vm8, %v1049_v3 }
 0x11a   : > { %v1047_v55 = vpop.permute.xlu0 %1046  ;;  %1453 = vrot.lane.b32.xlu1 %v9163_v34, %s6275_s23 }
 0x11b   : > { %1115 = vst.msk [vmem:[#allocation3 + $0xe0] sm:$0xf] %vm1086_vm8, %v1047_v55 }
 0x11c   : > { %1451 = vrot.lane.b32.xlu0 %v9164_v43, %s6275_s23  ;;  %v1053_v22 = vpop.permute.xlu1 %1052 }
 0x11d   : > { %1118 = vst.msk [vmem:[#allocation3 + $0xf8] sm:$0xf] %vm1086_vm8, %v1053_v22 }
 0x11e   : > { %v1051_v33 = vpop.permute.xlu0 %1050  ;;  %1584 = vrot.lane.b32.xlu1 %v6442_v48, %s6276_s6 }
 0x11f   : > { %1117 = vst.msk [vmem:[#allocation3 + $0xf0] sm:$0xf] %vm1086_vm8, %v1051_v33 }
 0x120   : > { %1582 = vrot.lane.b32.xlu0 %v6455_v52, %s6276_s6  ;;  %v1124_v6 = vpop.permute.xlu1 %1123 }
 0x121   : > { %1219 = vst.msk [vmem:[#allocation3 + $0x8] sm:$0xf] %vm1217_vm9, %v1124_v6 }
 0x122   : > { %v1122_v35 = vpop.permute.xlu0 %1121  ;;  %1737 = vrot.lane.b32.xlu1 %v9155_v0, %s6277_s7 }
 0x123   : > { %1218 = vst.msk [vmem:[#allocation3] sm:$0xf] %vm1217_vm9, %v1122_v35 }
 0x124   : > { %1735 = vrot.lane.b32.xlu0 %v9156_v62, %s6277_s7  ;;  %v1128_v42 = vpop.permute.xlu1 %1127 }
 0x125   : > { %1221 = vst.msk [vmem:[#allocation3 + $0x18] sm:$0xf] %vm1217_vm9, %v1128_v42 }
 0x126   : > { %v1126_v48 = vpop.permute.xlu0 %1125  ;;  %1457 = vrot.lane.b32.xlu1 %v6927_v21, %s6275_s23 }
 0x127   : > { %1220 = vst.msk [vmem:[#allocation3 + $0x10] sm:$0xf] %vm1217_vm9, %v1126_v48 }
 0x128   : > { %1455 = vrot.lane.b32.xlu0 %v6920_v7, %s6275_s23  ;;  %v1132_v52 = vpop.permute.xlu1 %1131 }
 0x129   : > { %1223 = vst.msk [vmem:[#allocation3 + $0x28] sm:$0xf] %vm1217_vm9, %v1132_v52 }
 0x12a   : > { %v1130_v16 = vpop.permute.xlu0 %1129  ;;  %1588 = vrot.lane.b32.xlu1 %v6458_v53, %s6276_s6 }
 0x12b   : > { %1222 = vst.msk [vmem:[#allocation3 + $0x20] sm:$0xf] %vm1217_vm9, %v1130_v16 }
 0x12c   : > { %1586 = vrot.lane.b32.xlu0 %v6470_v58, %s6276_s6  ;;  %v1136_v38 = vpop.permute.xlu1 %1135 }
 0x12d   : > { %1225 = vst.msk [vmem:[#allocation3 + $0x38] sm:$0xf] %vm1217_vm9, %v1136_v38 }
 0x12e   : > { %v1134_v3 = vpop.permute.xlu0 %1133  ;;  %1741 = vrot.lane.b32.xlu1 %v9157_v10, %s6277_s7 }
 0x12f   : > { %1224 = vst.msk [vmem:[#allocation3 + $0x30] sm:$0xf] %vm1217_vm9, %v1134_v3 }
 0x130   : > { %1739 = vrot.lane.b32.xlu0 %v9158_v1, %s6277_s7  ;;  %v1140_v7 = vpop.permute.xlu1 %1139 }
 0x131   : > { %1227 = vst.msk [vmem:[#allocation3 + $0x48] sm:$0xf] %vm1217_vm9, %v1140_v7 }
 0x132   : > { %v1138_v21 = vpop.permute.xlu0 %1137  ;;  %1461 = vrot.lane.b32.xlu1 %v6939_v30, %s6275_s23  ;;  %v9165_v30 = vld [vmem:[#allocation24_spill] sm:$0xff] }
 0x133   : > { %1226 = vst.msk [vmem:[#allocation3 + $0x40] sm:$0xf] %vm1217_vm9, %v1138_v21 }
 0x134   : > { %1459 = vrot.lane.b32.xlu0 %v6943_v46, %s6275_s23  ;;  %v1144_v53 = vpop.permute.xlu1 %1143  ;;  %v9166_v46 = vld [vmem:[#allocation28_spill] sm:$0xff] }
 0x135   : > { %1229 = vst.msk [vmem:[#allocation3 + $0x58] sm:$0xf] %vm1217_vm9, %v1144_v53 }
 0x136   : > { %v1142_v58 = vpop.permute.xlu0 %1141  ;;  %1592 = vrot.lane.b32.xlu1 %v6479_v63, %s6276_s6 }
 0x137   : > { %1228 = vst.msk [vmem:[#allocation3 + $0x50] sm:$0xf] %vm1217_vm9, %v1142_v58 }
 0x138   : > { %1590 = vrot.lane.b32.xlu0 %v6499_v14, %s6276_s6  ;;  %v1148_v55 = vpop.permute.xlu1 %1147 }
 0x139   : > { %1231 = vst.msk [vmem:[#allocation3 + $0x68] sm:$0xf] %vm1217_vm9, %v1148_v55 }
 0x13a   : > { %v1146_v34 = vpop.permute.xlu0 %1145  ;;  %1745 = vrot.lane.b32.xlu1 %v9165_v30, %s6277_s7 }
 0x13b   : > { %1230 = vst.msk [vmem:[#allocation3 + $0x60] sm:$0xf] %vm1217_vm9, %v1146_v34 }
 0x13c   : > { %1743 = vrot.lane.b32.xlu0 %v9166_v46, %s6277_s7  ;;  %v1152_v43 = vpop.permute.xlu1 %1151 }
 0x13d   : > { %1233 = vst.msk [vmem:[#allocation3 + $0x78] sm:$0xf] %vm1217_vm9, %v1152_v43 }
 0x13e   : > { %v1150_v22 = vpop.permute.xlu0 %1149  ;;  %1328 = vrot.lane.b32.xlu1 %v9165_v30, %s6274_s25 }
 0x13f   : > { %1232 = vst.msk [vmem:[#allocation3 + $0x70] sm:$0xf] %vm1217_vm9, %v1150_v22 }
 0x140   : > { %1326 = vrot.lane.b32.xlu0 %v9166_v46, %s6274_s25  ;;  %v1156_v63 = vpop.permute.xlu1 %1155 }
 0x141   : > { %1235 = vst.msk [vmem:[#allocation3 + $0x88] sm:$0xf] %vm1217_vm9, %v1156_v63 }
 0x142   : > { %v1154_v14 = vpop.permute.xlu0 %1153  ;;  %1465 = vrot.lane.b32.xlu1 %v6958_v17, %s6275_s23  ;;  %v9168_v17 = vld [vmem:[#allocation31_spill] sm:$0xff] }
 0x143   : > { %1234 = vst.msk [vmem:[#allocation3 + $0x80] sm:$0xf] %vm1217_vm9, %v1154_v14 }
 0x144   : > { %1463 = vrot.lane.b32.xlu0 %v6952_v20, %s6275_s23  ;;  %v1160_v33 = vpop.permute.xlu1 %1159  ;;  %v9167_v20 = vld [vmem:[#allocation30_spill] sm:$0xff] }
 0x145   : > { %1237 = vst.msk [vmem:[#allocation3 + $0x98] sm:$0xf] %vm1217_vm9, %v1160_v33 }
 0x146   : > { %v1158_v6 = vpop.permute.xlu0 %1157  ;;  %1596 = vrot.lane.b32.xlu1 %v6502_v15, %s6276_s6 }
 0x147   : > { %1236 = vst.msk [vmem:[#allocation3 + $0x90] sm:$0xf] %vm1217_vm9, %v1158_v6 }
 0x148   : > { %1594 = vrot.lane.b32.xlu0 %v6515_v29, %s6276_s6  ;;  %v1164_v35 = vpop.permute.xlu1 %1163 }
 0x149   : > { %1239 = vst.msk [vmem:[#allocation3 + $0xa8] sm:$0xf] %vm1217_vm9, %v1164_v35  ;;  %v9174_v35 = vld [vmem:[#allocation38_spill] sm:$0xff] }
 0x14a   : > { %v1162_v42 = vpop.permute.xlu0 %1161  ;;  %1749 = vrot.lane.b32.xlu1 %v9167_v20, %s6277_s7 }
 0x14b   : > { %1238 = vst.msk [vmem:[#allocation3 + $0xa0] sm:$0xf] %vm1217_vm9, %v1162_v42 }
 0x14c   : > { %1747 = vrot.lane.b32.xlu0 %v9168_v17, %s6277_s7  ;;  %v1168_v48 = vpop.permute.xlu1 %1167 }
 0x14d   : > { %1241 = vst.msk [vmem:[#allocation3 + $0xb8] sm:$0xf] %vm1217_vm9, %v1168_v48 }
 0x14e   : > { %v1166_v52 = vpop.permute.xlu0 %1165  ;;  %1332 = vrot.lane.b32.xlu1 %v9167_v20, %s6274_s25 }
 0x14f   : > { %1240 = vst.msk [vmem:[#allocation3 + $0xb0] sm:$0xf] %vm1217_vm9, %v1166_v52 }
 0x150   : > { %1330 = vrot.lane.b32.xlu0 %v9168_v17, %s6274_s25  ;;  %v1172_v15 = vpop.permute.xlu1 %1171 }
 0x151   : > { %1243 = vst.msk [vmem:[#allocation3 + $0xc8] sm:$0xf] %vm1217_vm9, %v1172_v15 }
 0x152   : > { %v1170_v29 = vpop.permute.xlu0 %1169  ;;  %1469 = vrot.lane.b32.xlu1 %v6971_v60, %s6275_s23  ;;  %v9169_v60 = vld [vmem:[#allocation32_spill] sm:$0xff] }
 0x153   : > { %1242 = vst.msk [vmem:[#allocation3 + $0xc0] sm:$0xf] %vm1217_vm9, %v1170_v29 }
 0x154   : > { %1467 = vrot.lane.b32.xlu0 %v6975_v26, %s6275_s23  ;;  %v1176_v16 = vpop.permute.xlu1 %1175  ;;  %v9170_v26 = vld [vmem:[#allocation33_spill] sm:$0xff] }
 0x155   : > { %1245 = vst.msk [vmem:[#allocation3 + $0xd8] sm:$0xf] %vm1217_vm9, %v1176_v16  ;;  %v6132_v16 = vld [vmem:[#allocation3 + $0x4] ss:$8 sps:$4 sm:$0xff]  }
 0x156   : > { %v1174_v38 = vpop.permute.xlu0 %1173  ;;  %1600 = vrot.lane.b32.xlu1 %v6521_v36, %s6276_s6  ;;  %5414 = vmatprep.mubr.msk.bf16.mxu0 %vm2183_vm14, %v6132_v16 }
 0x157   : > { %1244 = vst.msk [vmem:[#allocation3 + $0xd0] sm:$0xf] %vm1217_vm9, %v1174_v38  ;;  %v9175_v38 = vld [vmem:[#allocation39_spill] sm:$0xff] }
 0x158   : > { %1598 = vrot.lane.b32.xlu0 %v6539_v49, %s6276_s6  ;;  %v1180_v3 = vpop.permute.xlu1 %1179 }
 0x159   : > { %1247 = vst.msk [vmem:[#allocation3 + $0xe8] sm:$0xf] %vm1217_vm9, %v1180_v3  ;;  %v9176_v3 = vld [vmem:[#allocation40_spill] sm:$0xff] }
 0x15a   : > { %v1178_v7 = vpop.permute.xlu0 %1177  ;;  %1753 = vrot.lane.b32.xlu1 %v9169_v60, %s6277_s7 }
 0x15b   : > { %1246 = vst.msk [vmem:[#allocation3 + $0xe0] sm:$0xf] %vm1217_vm9, %v1178_v7 }
 0x15c   : > { %1751 = vrot.lane.b32.xlu0 %v9170_v26, %s6277_s7  ;;  %v1184_v21 = vpop.permute.xlu1 %1183 }
 0x15d   : > { %1249 = vst.msk [vmem:[#allocation3 + $0xf8] sm:$0xf] %vm1217_vm9, %v1184_v21 }
 0x15e   : > { %v1182_v53 = vpop.permute.xlu0 %1181  ;;  %1336 = vrot.lane.b32.xlu1 %v9169_v60, %s6274_s25 }
 0x15f   : > { %1248 = vst.msk [vmem:[#allocation3 + $0xf0] sm:$0xf] %vm1217_vm9, %v1182_v53 }
 0x160   : > { %1334 = vrot.lane.b32.xlu0 %v9170_v26, %s6274_s25  ;;  %v1309_v36 = vpop.permute.xlu1 %1308 }
 0x161   : > { %1404 = vst.msk [vmem:[#allocation3 + $0x8] sm:$0xf] %vm1402_vm10, %v1309_v36 }
 0x162   : > { %v1307_v49 = vpop.permute.xlu0 %1306  ;;  %1473 = vrot.lane.b32.xlu1 %v6992_v41, %s6275_s23  ;;  %v9172_v41 = vld [vmem:[#allocation36_spill] sm:$0xff] }
 0x163   : > { %1403 = vst.msk [vmem:[#allocation3] sm:$0xf] %vm1402_vm10, %v1307_v49  ;;  %v6133_v49 = vld [vmem:[#allocation3 + $0x14] ss:$8 sps:$4 sm:$0xff]  }
 0x164   : > { %1471 = vrot.lane.b32.xlu0 %v6986_v12, %s6275_s23  ;;  %v1313_v58 = vpop.permute.xlu1 %1312  ;;  %v9171_v12 = vld [vmem:[#allocation35_spill] sm:$0xff] }
 0x165   : > { %1406 = vst.msk [vmem:[#allocation3 + $0x18] sm:$0xf] %vm1402_vm10, %v1313_v58 }
 0x166   : > { %v1311_v55 = vpop.permute.xlu0 %1310  ;;  %1604 = vrot.lane.b32.xlu1 %v6551_v59, %s6276_s6 }
 0x167   : > { %1405 = vst.msk [vmem:[#allocation3 + $0x10] sm:$0xf] %vm1402_vm10, %v1311_v55 }
 0x168   : > { %1602 = vrot.lane.b32.xlu0 %v9139_v51, %s6276_s6  ;;  %v1317_v34 = vpop.permute.xlu1 %1316 }
 0x169   : > { %1408 = vst.msk [vmem:[#allocation3 + $0x28] sm:$0xf] %vm1402_vm10, %v1317_v34 }
 0x16a   : > { %v1315_v43 = vpop.permute.xlu0 %1314  ;;  %1757 = vrot.lane.b32.xlu1 %v9171_v12, %s6277_s7 }
 0x16b   : > { %1407 = vst.msk [vmem:[#allocation3 + $0x20] sm:$0xf] %vm1402_vm10, %v1315_v43 }
 0x16c   : > { %1755 = vrot.lane.b32.xlu0 %v9172_v41, %s6277_s7  ;;  %v1321_v22 = vpop.permute.xlu1 %1320 }
 0x16d   : > { %1410 = vst.msk [vmem:[#allocation3 + $0x38] sm:$0xf] %vm1402_vm10, %v1321_v22  ;;  %v9178_v22 = vld [vmem:[#allocation42_spill] sm:$0xff] }
 0x16e   : > { %v1319_v63 = vpop.permute.xlu0 %1318  ;;  %1340 = vrot.lane.b32.xlu1 %v9171_v12, %s6274_s25 }
 0x16f   : > { %1409 = vst.msk [vmem:[#allocation3 + $0x30] sm:$0xf] %vm1402_vm10, %v1319_v63 }
 0x170   : > { %1338 = vrot.lane.b32.xlu0 %v9172_v41, %s6274_s25  ;;  %v1325_v59 = vpop.permute.xlu1 %1324 }
 0x171   : > { %1412 = vst.msk [vmem:[#allocation3 + $0x48] sm:$0xf] %vm1402_vm10, %v1325_v59 }
 0x172   : > { %v1323_v51 = vpop.permute.xlu0 %1322  ;;  %1477 = vrot.lane.b32.xlu1 %v7003_v8, %s6275_s23 }
 0x173   : > { %1411 = vst.msk [vmem:[#allocation3 + $0x40] sm:$0xf] %vm1402_vm10, %v1323_v51 }
 0x174   : > { %1475 = vrot.lane.b32.xlu0 %v7007_v32, %s6275_s23  ;;  %v1446_v14 = vpop.permute.xlu1 %1445  ;;  %v9173_v32 = vld [vmem:[#allocation37_spill] sm:$0xff] }
 0x175   : > { %1541 = vst.msk [vmem:[#allocation3 + $0x8] sm:$0xf] %vm1539_vm11, %v1446_v14  ;;  %v6135_v14 = vld [vmem:[#allocation3 + $0x24] ss:$8 sps:$4 sm:$0xff]  }
 0x176   : > { %v1444_v33 = vpop.permute.xlu0 %1443  ;;  %1608 = vrot.lane.b32.xlu1 %v6565_v5, %s6276_s6 }
 0x177   : > { %1540 = vst.msk [vmem:[#allocation3] sm:$0xf] %vm1539_vm11, %v1444_v33 }
 0x178   : > { %1606 = vrot.lane.b32.xlu0 %v6580_v24, %s6276_s6  ;;  %v1577_v6 = vpop.permute.xlu1 %1576 }
 0x179   : > { %1672 = vst.msk [vmem:[#allocation3 + $0x8] sm:$0xf] %vm1670_vm12, %v1577_v6 }
 0x17a   : > { %v1575_v8 = vpop.permute.xlu0 %1574  ;;  %1761 = vrot.lane.b32.xlu1 %v9173_v32, %s6277_s7 }
 0x17b   : > { %1671 = vst.msk [vmem:[#allocation3] sm:$0xf] %vm1670_vm12, %v1575_v8 }
 0x17c   : > { %1759 = vrot.lane.b32.xlu0 %v9174_v35, %s6277_s7  ;;  %v1730_v42 = vpop.permute.xlu1 %1729 }
 0x17d   : > { %1825 = vst.msk [vmem:[#allocation3 + $0x8] sm:$0xf] %vm1823_vm13, %v1730_v42 }
 0x17e   : > { %v1728_v5 = vpop.permute.xlu0 %1727  ;;  %1344 = vrot.lane.b32.xlu1 %v9173_v32, %s6274_s25 }
 0x17f   : > { %1824 = vst.msk [vmem:[#allocation3] sm:$0xf] %vm1823_vm13, %v1728_v5 }
 0x180   : > { %1342 = vrot.lane.b32.xlu0 %v9174_v35, %s6274_s25  ;;  %v1450_v24 = vpop.permute.xlu1 %1449 }
 0x181   : > { %1543 = vst.msk [vmem:[#allocation3 + $0x18] sm:$0xf] %vm1539_vm11, %v1450_v24 }
 0x182   : > { %v1448_v48 = vpop.permute.xlu0 %1447  ;;  %1481 = vrot.lane.b32.xlu1 %v7026_v4, %s6275_s23 }
 0x183   : > { %1542 = vst.msk [vmem:[#allocation3 + $0x10] sm:$0xf] %vm1539_vm11, %v1448_v48 }
 0x184   : > { %1479 = vrot.lane.b32.xlu0 %v7018_v13, %s6275_s23  ;;  %v1581_v52 = vpop.permute.xlu1 %1580 }
 0x185   : > { %1674 = vst.msk [vmem:[#allocation3 + $0x18] sm:$0xf] %vm1670_vm12, %v1581_v52  ;;  %v6137_v52 = vld [vmem:[#allocation3 + $0x34] ss:$8 sps:$4 sm:$0xff]  }
 0x186   : > { %v1579_v15 = vpop.permute.xlu0 %1578  ;;  %v6130_v29 = vld [vmem:[#allocation3] ss:$8 sps:$4 sm:$0xff]   ;;  %1612 = vrot.lane.b32.xlu1 %v9140_v9, %s6276_s6 }
 0x187   : > { %1673 = vst.msk [vmem:[#allocation3 + $0x10] sm:$0xf] %vm1670_vm12, %v1579_v15  ;;  %2265 = vmatmul.mubr.bf16.vlgmr.msra.gmra.mxu0 %v6130_v29  ;;  %v9179_v15 = vld [vmem:[#allocation43_spill] sm:$0xff] }
 0x188   : > { %1610 = vrot.lane.b32.xlu0 %v6604_v45, %s6276_s6  ;;  %v1734_v4 = vpop.permute.xlu1 %1733  ;;  %5415 = vmatprep.mubr.msk.bf16.mxu0 %vm2183_vm14, %v6133_v49  ;;  %v6139_v49 = vld [vmem:[#allocation3 + $0x44] ss:$8 sps:$4 sm:$0xff]  }
 0x189   : > { %1827 = vst.msk [vmem:[#allocation3 + $0x18] sm:$0xf] %vm1823_vm13, %v1734_v4 }
 0x18a   : > { %v1732_v13 = vpop.permute.xlu0 %1731  ;;  %1765 = vrot.lane.b32.xlu1 %v9175_v38, %s6277_s7 }
 0x18b   : > { %1826 = vst.msk [vmem:[#allocation3 + $0x10] sm:$0xf] %vm1823_vm13, %v1732_v13 }
 0x18c   : > { %1763 = vrot.lane.b32.xlu0 %v9176_v3, %s6277_s7  ;;  %v1454_v7 = vpop.permute.xlu1 %1453 }
 0x18d   : > { %1545 = vst.msk [vmem:[#allocation3 + $0x28] sm:$0xf] %vm1539_vm11, %v1454_v7 }
 0x18e   : > { %v1452_v9 = vpop.permute.xlu0 %1451  ;;  %1348 = vrot.lane.b32.xlu1 %v9175_v38, %s6274_s25 }
 0x18f   : > { %1544 = vst.msk [vmem:[#allocation3 + $0x20] sm:$0xf] %vm1539_vm11, %v1452_v9 }
 0x190   : > { %1346 = vrot.lane.b32.xlu0 %v9176_v3, %s6274_s25  ;;  %v1585_v45 = vpop.permute.xlu1 %1584  ;;  %v1931_v21 = vld [vmem:[#allocation3 + $0x18] sm:$0xff] }
 0x191   : > { %1676 = vst.msk [vmem:[#allocation3 + $0x28] sm:$0xf] %vm1670_vm12, %v1585_v45 }
 0x192   : > { %v1583_v53 = vpop.permute.xlu0 %1582  ;;  %v1930_v36 = vld [vmem:[#allocation3 + $0x10] sm:$0xff]  ;;  %1485 = vrot.lane.b32.xlu1 %v7037_v37, %s6275_s23 }
 0x193   : > { %1675 = vst.msk [vmem:[#allocation3 + $0x20] sm:$0xf] %vm1670_vm12, %v1583_v53  ;;  %v5375_v58 = vcombine.low %v1930_v36, %v1931_v21 }
 0x194   : > { %1483 = vrot.lane.b32.xlu0 %v7041_v28, %s6275_s23  ;;  %v1738_v55 = vpop.permute.xlu1 %1737  ;;  %v9177_v28 = vld [vmem:[#allocation41_spill] sm:$0xff] }
 0x195   : > { %2273 = vmatmul.mubr.bf16.gmra.mxu0 %v5375_v58  ;;  %1829 = vst.msk [vmem:[#allocation3 + $0x28] sm:$0xf] %vm1823_vm13, %v1738_v55 }
 0x196   : > { %v1736_v34 = vpop.permute.xlu0 %1735  ;;  %1616 = vrot.lane.b32.xlu1 %v9141_v57, %s6276_s6  ;;  %5416 = vmatprep.mubr.msk.bf16.mxu0 %vm2183_vm14, %v6135_v14 }
 0x197   : > { %1828 = vst.msk [vmem:[#allocation3 + $0x20] sm:$0xf] %vm1823_vm13, %v1736_v34  ;;  %v9182_v34 = vld [vmem:[#allocation45_spill] sm:$0xff] }
 0x198   : > { %1614 = vrot.lane.b32.xlu0 %v9143_v18, %s6276_s6  ;;  %v1458_v37 = vpop.permute.xlu1 %1457 }
 0x199   : > { %1547 = vst.msk [vmem:[#allocation3 + $0x38] sm:$0xf] %vm1539_vm11, %v1458_v37  ;;  %v9183_v37 = vld [vmem:[#allocation46_spill] sm:$0xff] }
 0x19a   : > { %v1456_v43 = vpop.permute.xlu0 %1455  ;;  %1769 = vrot.lane.b32.xlu1 %v9177_v28, %s6277_s7 }
 0x19b   : > { %1546 = vst.msk [vmem:[#allocation3 + $0x30] sm:$0xf] %vm1539_vm11, %v1456_v43 }
 0x19c   : > { %1767 = vrot.lane.b32.xlu0 %v9178_v22, %s6277_s7  ;;  %v1589_v63 = vpop.permute.xlu1 %1588  ;;  %v1933_v59 = vld [vmem:[#allocation3 + $0x28] sm:$0xff] }
 0x19d   : > { %1678 = vst.msk [vmem:[#allocation3 + $0x38] sm:$0xf] %vm1670_vm12, %v1589_v63 }
 0x19e   : > { %v1587_v57 = vpop.permute.xlu0 %1586  ;;  %v1932_v51 = vld [vmem:[#allocation3 + $0x20] sm:$0xff]  ;;  %1352 = vrot.lane.b32.xlu1 %v9177_v28, %s6274_s25 }
 0x19f   : > { %1677 = vst.msk [vmem:[#allocation3 + $0x30] sm:$0xf] %vm1670_vm12, %v1587_v57  ;;  %v5377_v18 = vcombine.low %v1932_v51, %v1933_v59  ;;  %v9184_v57 = vld [vmem:[#allocation15_spill] sm:$0xff]  ;;  %v9185_v51 = vld [vmem:[#allocation25_spill] sm:$0xff] }
 0x1a0   : > { %1350 = vrot.lane.b32.xlu0 %v9178_v22, %s6274_s25  ;;  %v1742_v33 = vpop.permute.xlu1 %1741 }
 0x1a1   : > { %2281 = vmatmul.mubr.bf16.gmra.mxu0 %v5377_v18  ;;  %1831 = vst.msk [vmem:[#allocation3 + $0x38] sm:$0xf] %vm1823_vm13, %v1742_v33 }
 0x1a2   : > { %v1740_v6 = vpop.permute.xlu0 %1739  ;;  %1489 = vrot.lane.b32.xlu1 %v7058_v47, %s6275_s23  ;;  %5417 = vmatprep.mubr.msk.bf16.mxu0 %vm2183_vm14, %v6137_v52  ;;  %v1264_v52 = vshrl.u32 %v7258_v25, 16 }
 0x1a3   : > { %1830 = vst.msk [vmem:[#allocation3 + $0x30] sm:$0xf] %vm1823_vm13, %v1740_v6 }
 0x1a4   : > { %1487 = vrot.lane.b32.xlu0 %v7050_v54, %s6275_s23  ;;  %v1462_v8 = vpop.permute.xlu1 %1461  ;;  %v5370_v54 = vrot.slane %v7264_v11, 9 }
 0x1a5   : > { %1549 = vst.msk [vmem:[#allocation3 + $0x48] sm:$0xf] %vm1539_vm11, %v1462_v8  ;;  %v6141_v8 = vld [vmem:[#allocation3 + $0x54] ss:$8 sps:$4 sm:$0xff]  }
 0x1a6   : > { %v1460_v42 = vpop.permute.xlu0 %1459  ;;  %1620 = vrot.lane.b32.xlu1 %v6632_v23, %s6276_s6  ;;  %v9180_v23 = vld [vmem:[#allocation44_spill] sm:$0xff] }
 0x1a7   : > { %1548 = vst.msk [vmem:[#allocation3 + $0x40] sm:$0xf] %vm1539_vm11, %v1460_v42 }
 0x1a8   : > { %1618 = vrot.lane.b32.xlu0 %v9144_v39, %s6276_s6  ;;  %v1593_v5 = vpop.permute.xlu1 %1592  ;;  %v1935_v24 = vld [vmem:[#allocation3 + $0x38] sm:$0xff]  ;;  %v1438_v39 = vrot.slane %v7258_v25, 5 }
 0x1a9   : > { %1680 = vst.msk [vmem:[#allocation3 + $0x48] sm:$0xf] %vm1670_vm12, %v1593_v5  ;;  %v9186_v5 = vld [vmem:[#allocation27_spill] sm:$0xff] }
 0x1aa   : > { %v1591_v47 = vpop.permute.xlu0 %1590  ;;  %v1934_v48 = vld [vmem:[#allocation3 + $0x30] sm:$0xff]  ;;  %1773 = vrot.lane.b32.xlu1 %v9179_v15, %s6277_s7  ;;  %v7599_v13 = vsel %vm6838_vm6, %v5370_v54, %v1438_v39 }
 0x1ab   : > { %1679 = vst.msk [vmem:[#allocation3 + $0x40] sm:$0xf] %vm1670_vm12, %v1591_v47  ;;  %v5379_v29 = vcombine.low %v1934_v48, %v1935_v24  ;;  %v9187_v24 = vld [vmem:[#allocation29_spill] sm:$0xff]  ;;  %v1260_v47 = vshll.u32 %v7258_v25, 16  ;;  %v7648_v48 = vld [vmem:[%s6365_s9 + $0xc8] sm:$0x1] }
 0x1ac   : > { %1771 = vrot.lane.b32.xlu0 %v9180_v23, %s6277_s7  ;;  %v1746_v16 = vpop.permute.xlu1 %1745  ;;  %1924 = vst.msk [vmem:[#allocation3 + $0xe4] sm:$0xf] %vm278_vm2, %v7599_v13 }
 0x1ad   : > { %2289 = vmatmul.mubr.bf16.gmra.mxu0 %v5379_v29  ;;  %1833 = vst.msk [vmem:[#allocation3 + $0x48] sm:$0xf] %vm1823_vm13, %v1746_v16  ;;  %v1251_v29 = vshrl.u32 %v7264_v11, 16  ;;  %v1254_v16 = vshll.u32 %v7264_v11, 16 }
 0x1ae   : > { %v1744_v4 = vpop.permute.xlu0 %1743  ;;  %1356 = vrot.lane.b32.xlu1 %v9179_v15, %s6274_s25  ;;  %5418 = vmatprep.mubr.msk.bf16.mxu0 %vm2183_vm14, %v6139_v49  ;;  %v7672_v49 = vrot.slane %v1264_v52, 4 }
 0x1af   : > { %1832 = vst.msk [vmem:[#allocation3 + $0x40] sm:$0xf] %vm1823_vm13, %v1744_v4  ;;  %v1440_v4 = vrot.slane %v1438_v39, 4  ;;  %v9189_v39 = vld [vmem:[#allocation49_spill] sm:$0xff] }
 0x1b0   : > { %1354 = vrot.lane.b32.xlu0 %v9180_v23, %s6274_s25  ;;  %v1329_v7 = vpop.permute.xlu1 %1328 }
 0x1b1   : > { %1414 = vst.msk [vmem:[#allocation3 + $0x58] sm:$0xf] %vm1402_vm10, %v1329_v7  ;;  %v1441_v7 = vrot.slane %v7648_v48, 5 }
 0x1b2   : > { %v1327_v9 = vpop.permute.xlu0 %1326  ;;  %1493 = vrot.lane.b32.xlu1 %v7071_v44, %s6275_s23  ;;  %v9181_v44 = vld [vmem:[#allocation26_spill] sm:$0xff] }
 0x1b3   : > { %1413 = vst.msk [vmem:[#allocation3 + $0x50] sm:$0xf] %vm1402_vm10, %v1327_v9 }
 0x1b4   : > { %1491 = vrot.lane.b32.xlu0 %v7075_v50, %s6275_s23  ;;  %v1466_v45 = vpop.permute.xlu1 %1465  ;;  %v1937_v21 = vld [vmem:[#allocation3 + $0x48] sm:$0xff] }
 0x1b5   : > { %1551 = vst.msk [vmem:[#allocation3 + $0x58] sm:$0xf] %vm1539_vm11, %v1466_v45  ;;  %v9188_v45 = vld [vmem:[#allocation47_spill] sm:$0xff] }
 0x1b6   : > { %v1464_v53 = vpop.permute.xlu0 %1463  ;;  %v1936_v36 = vld [vmem:[#allocation3 + $0x40] sm:$0xff]  ;;  %1624 = vrot.lane.b32.xlu1 %v6665_v19, %s6276_s6 }
 0x1b7   : > { %1550 = vst.msk [vmem:[#allocation3 + $0x50] sm:$0xf] %vm1539_vm11, %v1464_v53  ;;  %v5381_v58 = vcombine.low %v1936_v36, %v1937_v21  ;;  %v7662_v21 = vsel %vm6838_vm6, %v1440_v4, %v1441_v7  ;;  %v6278_v53 = vmov 0.0   ;;  %v7670_v36 = vrot.slane %v1260_v47, 5 }
 0x1b8   : > { %1622 = vrot.lane.b32.xlu0 %v9181_v44, %s6276_s6  ;;  %v1597_v55 = vpop.permute.xlu1 %1596  ;;  %2425 = vst.msk [vmem:[#allocation2] sm:$0xff] %vm2183_vm14, %v6278_v53  ;;  %2426 = vst.msk [vmem:[#allocation2 + $0x8] sm:$0xff] %vm2183_vm14, %v6278_v53  ;;  %v7676_v44 = vrot.slane %v1251_v29, 4 }
 0x1b9   : > { %2297 = vmatmul.mubr.bf16.gmra.mxu0 %v5381_v58  ;;  %1682 = vst.msk [vmem:[#allocation3 + $0x58] sm:$0xf] %vm1670_vm12, %v1597_v55  ;;  %v7678_v55 = vrot.slane %v1254_v16, 5 }
 0x1ba   : > { %v1595_v50 = vpop.permute.xlu0 %1594  ;;  %1777 = vrot.lane.b32.xlu1 %v9182_v34, %s6277_s7  ;;  %5419 = vmatprep.mubr.msk.bf16.mxu0 %vm2183_vm14, %v6141_v8  ;;  %2430 = vst.msk [vmem:[#allocation2 + $0x198] sm:$0xff] %vm2183_vm14, %v6278_v53  ;;  %2431 = vst.msk [vmem:[#allocation2 + $0x1a0] sm:$0xff] %vm2183_vm14, %v6278_v53 }
 0x1bb   : > { %1681 = vst.msk [vmem:[#allocation3 + $0x50] sm:$0xf] %vm1670_vm12, %v1595_v50 }
 0x1bc   : > { %1775 = vrot.lane.b32.xlu0 %v9183_v37, %s6277_s7  ;;  %v1750_v43 = vpop.permute.xlu1 %1749  ;;  %1925 = vst.msk [vmem:[#allocation3 + $0xec] sm:$0xf] %vm278_vm2, %v7662_v21 }
 0x1bd   : > { %1835 = vst.msk [vmem:[#allocation3 + $0x58] sm:$0xf] %vm1823_vm13, %v1750_v43  ;;  %v7685_v43 = vld [vmem:[%s6365_s9 + $0xcc] sm:$0xf] }
 0x1be   : > { %v1748_v19 = vpop.permute.xlu0 %1747  ;;  %1360 = vrot.lane.b32.xlu1 %v9182_v34, %s6274_s25  ;;  %2428 = vst.msk [vmem:[#allocation2 + $0x10] sm:$0x3] %vm2427_vm15, %v6278_v53  ;;  %2432 = vst.msk [vmem:[#allocation2 + $0x1a8] sm:$0x3] %vm2427_vm15, %v6278_v53 }
 0x1bf   : > { %1834 = vst.msk [vmem:[#allocation3 + $0x50] sm:$0xf] %vm1823_vm13, %v1748_v19  ;;  %v1267_v19 = vor.u32 %v7672_v49, %v7670_v36 }
 0x1c0   : > { %1358 = vrot.lane.b32.xlu0 %v9183_v37, %s6274_s25  ;;  %v1333_v63 = vpop.permute.xlu1 %1332  ;;  %2454 = vst.msk [vmem:[#allocation2 + $0x41] sm:$0x1] %vm2433_vm0, %v6278_v53  ;;  %2434 = vst.msk [vmem:[#allocation2] sm:$0x1] %vm2433_vm0, %v6278_v53 }
 0x1c1   : > { %1416 = vst.msk [vmem:[#allocation3 + $0x68] sm:$0xf] %vm1402_vm10, %v1333_v63  ;;  %v1270_v63 = vshll.u32 %v7648_v48, 16 }
 0x1c2   : > { %v1331_v59 = vpop.permute.xlu0 %1330  ;;  %1497 = vrot.lane.b32.xlu1 %v9184_v57, %s6275_s23  ;;  %2435 = vst.msk [vmem:[#allocation2 + $0x18] sm:$0x1] %vm2433_vm0, %v6278_v53  ;;  %2436 = vst.msk [vmem:[#allocation2 + $0x30] sm:$0x1] %vm2433_vm0, %v6278_v53 }
 0x1c3   : > { %1415 = vst.msk [vmem:[#allocation3 + $0x60] sm:$0xf] %vm1402_vm10, %v1331_v59  ;;  %v5371_v59 = vrot.slane %v7685_v43, 9  ;;  %v1272_v47 = vrot.slane %v1270_v63, 5  ;;  %v1707_v63 = vshll.u32 %v7685_v43, 16 }
 0x1c4   : > { %1495 = vrot.lane.b32.xlu0 %v9185_v51, %s6275_s23  ;;  %v1470_v14 = vpop.permute.xlu1 %1469  ;;  %v1939_v18 = vld [vmem:[#allocation3 + $0x58] sm:$0xff]  ;;  %2437 = vst.msk [vmem:[#allocation2 + $0x48] sm:$0x1] %vm2433_vm0, %v6278_v53  ;;  %2438 = vst.msk [vmem:[#allocation2 + $0x60] sm:$0x1] %vm2433_vm0, %v6278_v53  ;;  %v1257_v51 = vor.u32 %v7678_v55, %v7676_v44 }
 0x1c5   : > { %1553 = vst.msk [vmem:[#allocation3 + $0x68] sm:$0xf] %vm1539_vm11, %v1470_v14  ;;  %v7732_v14 = vld [vmem:[%s6365_s9 + $0xd0] sm:$0xf] }
 0x1c6   : > { %v1468_v33 = vpop.permute.xlu0 %1467  ;;  %v1938_v6 = vld [vmem:[#allocation3 + $0x50] sm:$0xff]  ;;  %1628 = vrot.lane.b32.xlu1 %v9186_v5, %s6276_s6  ;;  %2439 = vst.msk [vmem:[#allocation2 + $0x78] sm:$0x1] %vm2433_vm0, %v6278_v53  ;;  %2440 = vst.msk [vmem:[#allocation2 + $0x90] sm:$0x1] %vm2433_vm0, %v6278_v53  ;;  %v9191_v5 = vld [vmem:[#allocation19_spill] sm:$0xff] }
 0x1c7   : > { %1552 = vst.msk [vmem:[#allocation3 + $0x60] sm:$0xf] %vm1539_vm11, %v1468_v33  ;;  %v5383_v42 = vcombine.low %v1938_v6, %v1939_v18  ;;  %v277_v18 = vld [vmem:[%s6365_s9 + $0xd4] sm:$0x1]  ;;  %v1859_v6 = vrot.slane %v7732_v14, 5  ;;  %v1258_v16 = vrot.slane %v1257_v51, 4 }
 0x1c8   : > { %1626 = vrot.lane.b32.xlu0 %v9187_v24, %s6276_s6  ;;  %v1601_v54 = vpop.permute.xlu1 %1600  ;;  %2441 = vst.msk [vmem:[#allocation2 + $0xa8] sm:$0x1] %vm2433_vm0, %v6278_v53  ;;  %2442 = vst.msk [vmem:[#allocation2 + $0xc0] sm:$0x1] %vm2433_vm0, %v6278_v53  ;;  %v1862_v8 = vrot.slane %v277_v18, 5  ;;  %v1268_v24 = vrot.slane %v1267_v19, 4 }
 0x1c9   : > { %2305 = vmatmul.mubr.bf16.gmra.mxu0 %v5383_v42  ;;  %1684 = vst.msk [vmem:[#allocation3 + $0x68] sm:$0xf] %vm1670_vm12, %v1601_v54  ;;  %v9190_v42 = vld [vmem:[#allocation17_spill] sm:$0xff]  ;;  %v1860_v48 = vsel %vm6838_vm6, %v5371_v59, %v1859_v6  ;;  %v1861_v52 = vrot.slane %v1859_v6, 4  ;;  %v1713_v27 = vshll.u32 %v7732_v14, 16  ;;  %v1717_v55 = vshrl.u32 %v7732_v14, 16 }
 0x1ca   : > { %v1599_v9 = vpop.permute.xlu0 %1598  ;;  %1781 = vrot.lane.b32.xlu1 %v9188_v45, %s6277_s7  ;;  %2443 = vst.msk [vmem:[#allocation2 + $0xd8] sm:$0x1] %vm2433_vm0, %v6278_v53  ;;  %2444 = vst.msk [vmem:[#allocation2 + $0xf0] sm:$0x1] %vm2433_vm0, %v6278_v53  ;;  %v7757_v44 = vsel %vm6414_vm3, %v1268_v24, %v1272_v47  ;;  %v1704_v19 = vshrl.u32 %v7685_v43, 16 }
 0x1cb   : > { %1683 = vst.msk [vmem:[#allocation3 + $0x60] sm:$0xf] %vm1670_vm12, %v1599_v9  ;;  %v6143_v9 = vld [vmem:[#allocation3 + $0x64] ss:$8 sps:$4 sm:$0xff]   ;;  %9193 = vst [vmem:[#allocation34_spill] sm:$0xff] %v7757_v44  ;;  %v1719_v59 = vrot.slane %v1717_v55, 4 }
 0x1cc   : > { %1779 = vrot.lane.b32.xlu0 %v9189_v39, %s6277_s7  ;;  %v1754_v58 = vpop.permute.xlu1 %1753  ;;  %2445 = vst.msk [vmem:[#allocation2 + $0x108] sm:$0x1] %vm2433_vm0, %v6278_v53  ;;  %2446 = vst.msk [vmem:[#allocation2 + $0x120] sm:$0x1] %vm2433_vm0, %v6278_v53  ;;  %5420 = vmatprep.mubr.msk.bf16.mxu0 %vm2183_vm14, %v6143_v9 }
 0x1cd   : > { %1837 = vst.msk [vmem:[#allocation3 + $0x68] sm:$0xf] %vm1823_vm13, %v1754_v58 }
 0x1ce   : > { %v1752_v50 = vpop.permute.xlu0 %1751  ;;  %1364 = vrot.lane.b32.xlu1 %v9188_v45, %s6274_s25  ;;  %2447 = vst.msk [vmem:[#allocation2 + $0x138] sm:$0x1] %vm2433_vm0, %v6278_v53  ;;  %2448 = vst.msk [vmem:[#allocation2 + $0x150] sm:$0x1] %vm2433_vm0, %v6278_v53 }
 0x1cf   : > { %1836 = vst.msk [vmem:[#allocation3 + $0x60] sm:$0xf] %vm1823_vm13, %v1752_v50 }
 0x1d0   : > { %2449 = vst.msk [vmem:[#allocation2 + $0x168] sm:$0x1] %vm2433_vm0, %v6278_v53  ;;  %2450 = vst.msk [vmem:[#allocation2 + $0x180] sm:$0x1] %vm2433_vm0, %v6278_v53  ;;  %1362 = vrot.lane.b32.xlu0 %v9189_v39, %s6274_s25  ;;  %v1337_v57 = vpop.permute.xlu1 %1336 }
 0x1d1   : > { %2451 = vst.msk [vmem:[#allocation2 + $0x198] sm:$0x1] %vm2433_vm0, %v6278_v53  ;;  %2452 = vst.msk [vmem:[#allocation2 + $0x11] sm:$0x1] %vm2433_vm0, %v6278_v53 }
 0x1d2   : > { %2453 = vst.msk [vmem:[#allocation2 + $0x29] sm:$0x1] %vm2433_vm0, %v6278_v53  ;;  %2455 = vst.msk [vmem:[#allocation2 + $0x59] sm:$0x1] %vm2433_vm0, %v6278_v53  ;;  %v1335_v33 = vpop.permute.xlu0 %1334  ;;  %1501 = vrot.lane.b32.xlu1 %v9190_v42, %s6275_s23  ;;  %v1723_v42 = vshll.u32 %v277_v18, 16 }
 0x1d3   : > { %2456 = vst.msk [vmem:[#allocation2 + $0x71] sm:$0x1] %vm2433_vm0, %v6278_v53  ;;  %2457 = vst.msk [vmem:[#allocation2 + $0x89] sm:$0x1] %vm2433_vm0, %v6278_v53 }
 0x1d4   : > { %2458 = vst.msk [vmem:[#allocation2 + $0xa1] sm:$0x1] %vm2433_vm0, %v6278_v53  ;;  %2459 = vst.msk [vmem:[#allocation2 + $0xb9] sm:$0x1] %vm2433_vm0, %v6278_v53  ;;  %1499 = vrot.lane.b32.xlu0 %v9191_v5, %s6275_s23  ;;  %v1474_v54 = vpop.permute.xlu1 %1473  ;;  %v1941_v29 = vld [vmem:[#allocation3 + $0x68] sm:$0xff] }
 0x1d5   : > { %2460 = vst.msk [vmem:[#allocation2 + $0xd1] sm:$0x1] %vm2433_vm0, %v6278_v53  ;;  %2461 = vst.msk [vmem:[#allocation2 + $0xe9] sm:$0x1] %vm2433_vm0, %v6278_v53 }
 0x1d6   : > { %2462 = vst.msk [vmem:[#allocation2 + $0x101] sm:$0x1] %vm2433_vm0, %v6278_v53  ;;  %2463 = vst.msk [vmem:[#allocation2 + $0x119] sm:$0x1] %vm2433_vm0, %v6278_v53  ;;  %v1472_v4 = vpop.permute.xlu0 %1471  ;;  %v1940_v7 = vld [vmem:[#allocation3 + $0x60] sm:$0xff]  ;;  %1632 = vrot.lane.b32.xlu1 %v7258_v25, %s6276_s6  ;;  %v7764_v25 = vsel %vm6414_vm3, %v1258_v16, %v7670_v36  ;;  %v1706_v36 = vrot.slane %v1704_v19, 4 }
 0x1d7   : > { %2464 = vst.msk [vmem:[#allocation2 + $0x131] sm:$0x1] %vm2433_vm0, %v6278_v53  ;;  %2465 = vst.msk [vmem:[#allocation2 + $0x149] sm:$0x1] %vm2433_vm0, %v6278_v53  ;;  %v5385_v49 = vcombine.low %v1940_v7, %v1941_v29  ;;  %v6145_v7 = vld [vmem:[#allocation3 + $0x74] ss:$8 sps:$4 sm:$0xff]  }
 0x1d8   : > { %2466 = vst.msk [vmem:[#allocation2 + $0x161] sm:$0x1] %vm2433_vm0, %v6278_v53  ;;  %2467 = vst.msk [vmem:[#allocation2 + $0x179] sm:$0x1] %vm2433_vm0, %v6278_v53  ;;  %1630 = vrot.lane.b32.xlu0 %v7264_v11, %s6276_s6  ;;  %v1605_v50 = vpop.permute.xlu1 %1604 }
 0x1d9   : > { %2468 = vst.msk [vmem:[#allocation2 + $0x191] sm:$0x1] %vm2433_vm0, %v6278_v53  ;;  %2469 = vst.msk [vmem:[#allocation2 + $0x1a9] sm:$0x1] %vm2433_vm0, %v6278_v53  ;;  %v1863_v53 = vsel %vm6838_vm6, %v1861_v52, %v1862_v8  ;;  %2313 = vmatmul.mubr.bf16.gmra.mxu0 %v5385_v49  ;;  %v1725_v52 = vrot.slane %v1723_v42, 5 }
 0x1da   : > { %1418 = vst.msk [vmem:[#allocation3 + $0x78] sm:$0xf] %vm1402_vm10, %v1337_v57  ;;  %1417 = vst.msk [vmem:[#allocation3 + $0x70] sm:$0xf] %vm1402_vm10, %v1335_v33  ;;  %v1603_v11 = vpop.permute.xlu0 %1602  ;;  %1785 = vrot.lane.b32.xlu1 %v7757_v44, %s6277_s7  ;;  %v1715_v57 = vrot.slane %v1713_v27, 5  ;;  %v1709_v33 = vrot.slane %v1707_v63, 5  ;;  %5421 = vmatprep.mubr.msk.bf16.mxu0 %vm2183_vm14, %v6145_v7 }
 0x1db   : > { %1926 = vst.msk [vmem:[#allocation3 + $0xf4] sm:$0xf] %vm278_vm2, %v1860_v48  ;;  %1927 = vst.msk [vmem:[#allocation3 + $0xfc] sm:$0xf] %vm278_vm2, %v1863_v53  ;;  %v2695_v27 = vld [vmem:[#allocation2 + $0x1] sm:$0xff] }
 0x1dc   : > { %1555 = vst.msk [vmem:[#allocation3 + $0x78] sm:$0xf] %vm1539_vm11, %v1474_v54  ;;  %1554 = vst.msk [vmem:[#allocation3 + $0x70] sm:$0xf] %vm1539_vm11, %v1472_v4  ;;  %1783 = vrot.lane.b32.xlu0 %v7764_v25, %s6277_s7  ;;  %v1758_v51 = vpop.permute.xlu1 %1757  ;;  %v1720_v8 = vor.u32 %v1719_v59, %v1715_v57  ;;  %v1710_v24 = vor.u32 %v1709_v33, %v1706_v36  ;;  %v6147_v36 = vld [vmem:[#allocation3 + $0x84] ss:$8 sps:$4 sm:$0xff]  }
 0x1dd   : > { %9194 = vst [vmem:[#allocation20_spill] sm:$0xff] %v7764_v25  ;;  %1686 = vst.msk [vmem:[#allocation3 + $0x78] sm:$0xf] %vm1670_vm12, %v1605_v50 }
 0x1de   : > { %1685 = vst.msk [vmem:[#allocation3 + $0x70] sm:$0xf] %vm1670_vm12, %v1603_v11  ;;  %v1756_v6 = vpop.permute.xlu0 %1755  ;;  %1368 = vrot.lane.b32.xlu1 %v7757_v44, %s6274_s25  ;;  %v1721_v48 = vrot.slane %v1720_v8, 4  ;;  %v1711_v16 = vrot.slane %v1710_v24, 4 }
 0x1df   : > { %1839 = vst.msk [vmem:[#allocation3 + $0x78] sm:$0xf] %vm1823_vm13, %v1758_v51  ;;  %1838 = vst.msk [vmem:[#allocation3 + $0x70] sm:$0xf] %vm1823_vm13, %v1756_v6 }
 0x1e0   : > { %1366 = vrot.lane.b32.xlu0 %v7764_v25, %s6274_s25  ;;  %v1341_v5 = vpop.permute.xlu1 %1340  ;;  %v1716_v49 = vsel %vm6414_vm3, %v1711_v16, %v1715_v57  ;;  %v6149_v16 = vld [vmem:[#allocation3 + $0x94] ss:$8 sps:$4 sm:$0xff]  }
 0x1e1   : > { %1420 = vst.msk [vmem:[#allocation3 + $0x88] sm:$0xf] %vm1402_vm10, %v1341_v5 }
 0x1e2   : > { %v1339_v47 = vpop.permute.xlu0 %1338  ;;  %1505 = vrot.lane.b32.xlu1 %v7662_v21, %s6275_s23  ;;  %v2696_v21 = vld [vmem:[#allocation2 + $0x9] sm:$0xff] }
 0x1e3   : > { %1419 = vst.msk [vmem:[#allocation3 + $0x80] sm:$0xf] %vm1402_vm10, %v1339_v47 }
 0x1e4   : > { %1503 = vrot.lane.b32.xlu0 %v7599_v13, %s6275_s23  ;;  %v1478_v54 = vpop.permute.xlu1 %1477  ;;  %v1726_v13 = vsel %vm6414_vm3, %v1721_v48, %v1725_v52 }
 0x1e5   : > { %1557 = vst.msk [vmem:[#allocation3 + $0x88] sm:$0xf] %vm1539_vm11, %v1478_v54 }
 0x1e6   : > { %v1943_v29 = vld [vmem:[#allocation3 + $0x78] sm:$0xff]  ;;  %v1476_v18 = vpop.permute.xlu0 %1475  ;;  %v1942_v4 = vld [vmem:[#allocation3 + $0x70] sm:$0xff]  ;;  %1636 = vrot.lane.b32.xlu1 %v7732_v14, %s6276_s6  ;;  %v5814_v14 = vpack.c.bf16 %v2696_v21, %v2696_v21 }
 0x1e7   : > { %1556 = vst.msk [vmem:[#allocation3 + $0x80] sm:$0xf] %vm1539_vm11, %v1476_v18  ;;  %v5387_v9 = vcombine.low %v1942_v4, %v1943_v29 }
 0x1e8   : > { %1634 = vrot.lane.b32.xlu0 %v7685_v43, %s6276_s6  ;;  %v1609_v53 = vpop.permute.xlu1 %1608  ;;  %v5813_v43 = vpack.c.bf16 %v2695_v27, %v2695_v27 }
 0x1e9   : > { %2321 = vmatmul.mubr.bf16.gmra.mxu0 %v5387_v9  ;;  %1688 = vst.msk [vmem:[#allocation3 + $0x88] sm:$0xf] %vm1670_vm12, %v1609_v53 }
 0x1ea   : > { %v1607_v55 = vpop.permute.xlu0 %1606  ;;  %1789 = vrot.lane.b32.xlu1 %v1726_v13, %s6277_s7  ;;  %5422 = vmatprep.mubr.msk.bf16.mxu0 %vm2183_vm14, %v6147_v36  ;;  %v6153_v36 = vld [vmem:[#allocation3 + $0xb4] ss:$8 sps:$4 sm:$0xff]  }
 0x1eb   : > { %1687 = vst.msk [vmem:[#allocation3 + $0x80] sm:$0xf] %vm1670_vm12, %v1607_v55 }
 0x1ec   : > { %1787 = vrot.lane.b32.xlu0 %v1716_v49, %s6277_s7  ;;  %v1762_v50 = vpop.permute.xlu1 %1761 }
 0x1ed   : > { %1841 = vst.msk [vmem:[#allocation3 + $0x88] sm:$0xf] %vm1823_vm13, %v1762_v50 }
 0x1ee   : > { %v1760_v19 = vpop.permute.xlu0 %1759  ;;  %2825 = vrot.lane.b32.xlu1 %v5814_v14, %s6270_s10 }
 0x1ef   : > { %1840 = vst.msk [vmem:[#allocation3 + $0x80] sm:$0xf] %vm1823_vm13, %v1760_v19 }
 0x1f0   : > { %2823 = vrot.lane.b32.xlu0 %v5813_v43, %s6270_s10  ;;  %v1345_v58 = vpop.permute.xlu1 %1344  ;;  %v6151_v43 = vld [vmem:[#allocation3 + $0xa4] ss:$8 sps:$4 sm:$0xff]  }
 0x1f1   : > { %1422 = vst.msk [vmem:[#allocation3 + $0x98] sm:$0xf] %vm1402_vm10, %v1345_v58 }
 0x1f2   : > { %v1343_v63 = vpop.permute.xlu0 %1342 }
 0x1f3   : > { %1421 = vst.msk [vmem:[#allocation3 + $0x90] sm:$0xf] %vm1402_vm10, %v1343_v63 }
 0x1f4   : > { %v1482_v11 = vpop.permute.xlu1 %1481  ;;  %v1945_v59 = vld [vmem:[#allocation3 + $0x88] sm:$0xff] }
 0x1f5   : > { %1559 = vst.msk [vmem:[#allocation3 + $0x98] sm:$0xf] %vm1539_vm11, %v1482_v11 }
 0x1f6   : > { %v1480_v57 = vpop.permute.xlu0 %1479  ;;  %v1944_v51 = vld [vmem:[#allocation3 + $0x80] sm:$0xff] }
 0x1f7   : > { %1558 = vst.msk [vmem:[#allocation3 + $0x90] sm:$0xf] %vm1539_vm11, %v1480_v57  ;;  %v5389_v33 = vcombine.low %v1944_v51, %v1945_v59 }
 0x1f8   : > { %v1613_v6 = vpop.permute.xlu1 %1612 }
 0x1f9   : > { %2329 = vmatmul.mubr.bf16.gmra.mxu0 %v5389_v33  ;;  %1690 = vst.msk [vmem:[#allocation3 + $0x98] sm:$0xf] %vm1670_vm12, %v1613_v6 }
 0x1fa   : > { %v1611_v8 = vpop.permute.xlu0 %1610  ;;  %5423 = vmatprep.mubr.msk.bf16.mxu0 %vm2183_vm14, %v6149_v16 }
 0x1fb   : > { %1689 = vst.msk [vmem:[#allocation3 + $0x90] sm:$0xf] %vm1670_vm12, %v1611_v8 }
 0x1fc   : > { %v1766_v42 = vpop.permute.xlu1 %1765 }
 0x1fd   : > { %1843 = vst.msk [vmem:[#allocation3 + $0x98] sm:$0xf] %vm1823_vm13, %v1766_v42 }
 0x1fe   : > { %v1764_v5 = vpop.permute.xlu0 %1763 }
 0x1ff   : > { %1842 = vst.msk [vmem:[#allocation3 + $0x90] sm:$0xf] %vm1823_vm13, %v1764_v5 }
 0x200   : > { %v1349_v24 = vpop.permute.xlu1 %1348 }
 0x201   : > { %1424 = vst.msk [vmem:[#allocation3 + $0xa8] sm:$0xf] %vm1402_vm10, %v1349_v24 }
 0x202   : > { %v1347_v47 = vpop.permute.xlu0 %1346 }
 0x203   : > { %1423 = vst.msk [vmem:[#allocation3 + $0xa0] sm:$0xf] %vm1402_vm10, %v1347_v47 }
 0x204   : > { %v1486_v48 = vpop.permute.xlu1 %1485  ;;  %v1947_v52 = vld [vmem:[#allocation3 + $0x98] sm:$0xff] }
 0x205   : > { %1561 = vst.msk [vmem:[#allocation3 + $0xa8] sm:$0xf] %vm1539_vm11, %v1486_v48 }
 0x206   : > { %v1484_v54 = vpop.permute.xlu0 %1483  ;;  %v1946_v29 = vld [vmem:[#allocation3 + $0x90] sm:$0xff] }
 0x207   : > { %1560 = vst.msk [vmem:[#allocation3 + $0xa0] sm:$0xf] %vm1539_vm11, %v1484_v54  ;;  %v5391_v18 = vcombine.low %v1946_v29, %v1947_v52 }
 0x208   : > { %v1617_v4 = vpop.permute.xlu1 %1616 }
 0x209   : > { %2337 = vmatmul.mubr.bf16.gmra.mxu0 %v5391_v18  ;;  %1692 = vst.msk [vmem:[#allocation3 + $0xa8] sm:$0xf] %vm1670_vm12, %v1617_v4 }
 0x20a   : > { %v1615_v7 = vpop.permute.xlu0 %1614  ;;  %5424 = vmatprep.mubr.msk.bf16.mxu0 %vm2183_vm14, %v6151_v43 }
 0x20b   : > { %1691 = vst.msk [vmem:[#allocation3 + $0xa0] sm:$0xf] %vm1670_vm12, %v1615_v7 }
 0x20c   : > { %v1770_v9 = vpop.permute.xlu1 %1769 }
 0x20d   : > { %1845 = vst.msk [vmem:[#allocation3 + $0xa8] sm:$0xf] %vm1823_vm13, %v1770_v9 }
 0x20e   : > { %v1768_v13 = vpop.permute.xlu0 %1767 }
 0x20f   : > { %1844 = vst.msk [vmem:[#allocation3 + $0xa0] sm:$0xf] %vm1823_vm13, %v1768_v13 }
 0x210   : > { %v1353_v21 = vpop.permute.xlu1 %1352 }
 0x211   : > { %1426 = vst.msk [vmem:[#allocation3 + $0xb8] sm:$0xf] %vm1402_vm10, %v1353_v21 }
 0x212   : > { %v1351_v53 = vpop.permute.xlu0 %1350 }
 0x213   : > { %1425 = vst.msk [vmem:[#allocation3 + $0xb0] sm:$0xf] %vm1402_vm10, %v1351_v53  ;;  %v7855_v53 = vld [vmem:[%s8974_s2] ss:$0 sm:$0xff] }
 0x214   : > { %v1490_v49 = vpop.permute.xlu1 %1489  ;;  %v1949_v27 = vld [vmem:[#allocation3 + $0xa8] sm:$0xff] }
 0x215   : > { %1563 = vst.msk [vmem:[#allocation3 + $0xb8] sm:$0xf] %vm1539_vm11, %v1490_v49 }
 0x216   : > { %v1488_v55 = vpop.permute.xlu0 %1487  ;;  %v1948_v14 = vld [vmem:[#allocation3 + $0xa0] sm:$0xff] }
 0x217   : > { %1562 = vst.msk [vmem:[#allocation3 + $0xb0] sm:$0xf] %vm1539_vm11, %v1488_v55  ;;  %v5393_v50 = vcombine.low %v1948_v14, %v1949_v27 }
 0x218   : > { %v1621_v19 = vpop.permute.xlu1 %1620 }
 0x219   : > { %2345 = vmatmul.mubr.bf16.gmra.mxu0 %v5393_v50  ;;  %1694 = vst.msk [vmem:[#allocation3 + $0xb8] sm:$0xf] %vm1670_vm12, %v1621_v19  ;;  %v2503_v19 = vld [vmem:[#allocation2] sm:$0xff] }
 0x21a   : > { %v1619_v58 = vpop.permute.xlu0 %1618  ;;  %5425 = vmatprep.mubr.msk.bf16.mxu0 %vm2183_vm14, %v6153_v36 }
 0x21b   : > { %1693 = vst.msk [vmem:[#allocation3 + $0xb0] sm:$0xf] %vm1670_vm12, %v1619_v58 }
 0x21c   : > { %v1774_v63 = vpop.permute.xlu1 %1773 }
 0x21d   : > { %1847 = vst.msk [vmem:[#allocation3 + $0xb8] sm:$0xf] %vm1823_vm13, %v1774_v63 }
 0x21e   : > { %v1772_v11 = vpop.permute.xlu0 %1771 }
 0x21f   : > { %1846 = vst.msk [vmem:[#allocation3 + $0xb0] sm:$0xf] %vm1823_vm13, %v1772_v11  ;;  %v5781_v11 = vpack.c.bf16 %v2503_v19, %v2503_v19 }
 0x220   : > { %v1357_v59 = vpop.permute.xlu1 %1356 }
 0x221   : > { %1428 = vst.msk [vmem:[#allocation3 + $0xc8] sm:$0xf] %vm1402_vm10, %v1357_v59 }
 0x222   : > { %v1355_v57 = vpop.permute.xlu0 %1354  ;;  %2663 = vst.msk [vmem:[#allocation4] sm:$0xf] %vm278_vm2, %v5781_v11 }
 0x223   : > { %1427 = vst.msk [vmem:[#allocation3 + $0xc0] sm:$0xf] %vm1402_vm10, %v1355_v57 }
 0x224   : > { %v1494_v51 = vpop.permute.xlu1 %1493 }
 0x225   : > { %1565 = vst.msk [vmem:[#allocation3 + $0xc8] sm:$0xf] %vm1539_vm11, %v1494_v51  ;;  %v2504_v51 = vld [vmem:[#allocation2 + $0x8] sm:$0xff] }
 0x226   : > { %v6155_v33 = vld [vmem:[#allocation3 + $0xb0] ss:$8 sps:$4 sm:$0xff]   ;;  %v1492_v6 = vpop.permute.xlu0 %1491 }
 0x227   : > { %1564 = vst.msk [vmem:[#allocation3 + $0xc0] sm:$0xf] %vm1539_vm11, %v1492_v6  ;;  %2353 = vmatmul.mubr.bf16.gmra.mxu0 %v6155_v33  ;;  %v5782_v33 = vpack.c.bf16 %v2504_v51, %v2504_v51 }
 0x228   : > { %v1625_v8 = vpop.permute.xlu1 %1624 }
 0x229   : > { %1696 = vst.msk [vmem:[#allocation3 + $0xc8] sm:$0xf] %vm1670_vm12, %v1625_v8 }
 0x22a   : > { %v1623_v42 = vpop.permute.xlu0 %1622  ;;  %2664 = vst.msk [vmem:[#allocation4 + $0x8] sm:$0xf] %vm278_vm2, %v5782_v33 }
 0x22b   : > { %1695 = vst.msk [vmem:[#allocation3 + $0xc0] sm:$0xf] %vm1670_vm12, %v1623_v42 }
 0x22c   : > { %v1778_v5 = vpop.permute.xlu1 %1777 }
 0x22d   : > { %1849 = vst.msk [vmem:[#allocation3 + $0xc8] sm:$0xf] %vm1823_vm13, %v1778_v5 }
 0x22e   : > { %v1776_v24 = vpop.permute.xlu0 %1775 }
 0x22f   : > { %1848 = vst.msk [vmem:[#allocation3 + $0xc0] sm:$0xf] %vm1823_vm13, %v1776_v24 }
 0x230   : > { %v1361_v47 = vpop.permute.xlu1 %1360 }
 0x231   : > { %1430 = vst.msk [vmem:[#allocation3 + $0xd8] sm:$0xf] %vm1402_vm10, %v1361_v47 }
 0x232   : > { %v1359_v48 = vpop.permute.xlu0 %1358 }
 0x233   : > { %1429 = vst.msk [vmem:[#allocation3 + $0xd0] sm:$0xf] %vm1402_vm10, %v1359_v48 }
 0x234   : > { %v1498_v52 = vpop.permute.xlu1 %1497 }
 0x235   : > { %1567 = vst.msk [vmem:[#allocation3 + $0xd8] sm:$0xf] %vm1539_vm11, %v1498_v52 }
 0x236   : > { %v1496_v54 = vpop.permute.xlu0 %1495 }
 0x237   : > { %1566 = vst.msk [vmem:[#allocation3 + $0xd0] sm:$0xf] %vm1539_vm11, %v1496_v54 }
 0x238   : > { %v1629_v29 = vpop.permute.xlu1 %1628 }
 0x239   : > { %1698 = vst.msk [vmem:[#allocation3 + $0xd8] sm:$0xf] %vm1670_vm12, %v1629_v29 }
 0x23a   : > { %v1627_v16 = vpop.permute.xlu0 %1626 }
 0x23b   : > { %1697 = vst.msk [vmem:[#allocation3 + $0xd0] sm:$0xf] %vm1670_vm12, %v1627_v16 }
 0x23c   : > { %v1782_v18 = vpop.permute.xlu1 %1781 }
 0x23d   : > { %1851 = vst.msk [vmem:[#allocation3 + $0xd8] sm:$0xf] %vm1823_vm13, %v1782_v18 }
 0x23e   : > { %v1780_v4 = vpop.permute.xlu0 %1779 }
 0x23f   : > { %1850 = vst.msk [vmem:[#allocation3 + $0xd0] sm:$0xf] %vm1823_vm13, %v1780_v4 }
 0x240   : > { %v1365_v7 = vpop.permute.xlu1 %1364 }
 0x241   : > { %1432 = vst.msk [vmem:[#allocation3 + $0xe8] sm:$0xf] %vm1402_vm10, %v1365_v7 }
 0x242   : > { %v1363_v9 = vpop.permute.xlu0 %1362 }
 0x243   : > { %1431 = vst.msk [vmem:[#allocation3 + $0xe0] sm:$0xf] %vm1402_vm10, %v1363_v9 }
 0x244   : > { %v1502_v13 = vpop.permute.xlu1 %1501 }
 0x245   : > { %1569 = vst.msk [vmem:[#allocation3 + $0xe8] sm:$0xf] %vm1539_vm11, %v1502_v13 }
 0x246   : > { %v1500_v21 = vpop.permute.xlu0 %1499 }
 0x247   : > { %1568 = vst.msk [vmem:[#allocation3 + $0xe0] sm:$0xf] %vm1539_vm11, %v1500_v21  ;;  %v2266_v49 = vpop.f32.mrf.mxu0 }
 0x248   : > { %v1633_v27 = vpop.permute.xlu1 %1632  ;;  %v2267_v55 = vadd.f32 %v7855_v53, %v2266_v49 }
 0x249   : > { %1700 = vst.msk [vmem:[#allocation3 + $0xe8] sm:$0xf] %vm1670_vm12, %v1633_v27  ;;  %v2268_v43 = vpop.f32.mrf.mxu0 }
 0x24a   : > { %v1631_v14 = vpop.permute.xlu0 %1630  ;;  %v2393_v50 = vmax.f32 %v2267_v55, 0.0 }
 0x24b   : > { %1699 = vst.msk [vmem:[#allocation3 + $0xe0] sm:$0xf] %vm1670_vm12, %v1631_v14  ;;  %v2269_v58 = vpop.f32.mrf.mxu0 }
 0x24c   : > { %v1786_v63 = vpop.permute.xlu1 %1785  ;;  %2471 = vst.msk [vmem:[#allocation2 + $0x19] sm:$0xff] %vm2183_vm14, %v2393_v50  ;;  %v2270_v59 = vadd.f32 %v7855_v53, %v2269_v58 }
 0x24d   : > { %1853 = vst.msk [vmem:[#allocation3 + $0xe8] sm:$0xf] %vm1823_vm13, %v1786_v63  ;;  %v2271_v36 = vpop.f32.mrf.mxu0 }
 0x24e   : > { %v1784_v57 = vpop.permute.xlu0 %1783  ;;  %v2394_v6 = vmax.f32 %v2270_v59, 0.0 }
 0x24f   : > { %1852 = vst.msk [vmem:[#allocation3 + $0xe0] sm:$0xf] %vm1823_vm13, %v1784_v57 }
 0x250   : > { %v1369_v8 = vpop.permute.xlu1 %1368  ;;  %2472 = vst.msk [vmem:[#allocation2 + $0x21] sm:$0xff] %vm2183_vm14, %v2394_v6 }
 0x251   : > { %1434 = vst.msk [vmem:[#allocation3 + $0xf8] sm:$0xf] %vm1402_vm10, %v1369_v8 }
 0x252   : > { %v1367_v42 = vpop.permute.xlu0 %1366 }
 0x253   : > { %1433 = vst.msk [vmem:[#allocation3 + $0xf0] sm:$0xf] %vm1402_vm10, %v1367_v42  ;;  %v2697_v24 = vld [vmem:[#allocation2 + $0x19] sm:$0xff] }
 0x254   : > { %v1506_v47 = vpop.permute.xlu1 %1505  ;;  %v2505_v48 = vld [vmem:[#allocation2 + $0x18] sm:$0xff]  ;;  %v7871_v54 = vpack.c.bf16 %v2697_v24, %v2697_v24 }
 0x255   : > { %v2274_v5 = vpop.f32.mrf.mxu0  ;;  %1571 = vst.msk [vmem:[#allocation3 + $0xf8] sm:$0xf] %vm1539_vm11, %v1506_v47  ;;  %v7874_v16 = vpack.c.bf16 %v2505_v48, %v2505_v48 }
 0x256   : > { %v2275_v52 = vadd.f32 %v7855_v53, %v2274_v5  ;;  %v1504_v29 = vpop.permute.xlu0 %1503  ;;  %2827 = vrot.lane.b32.xlu0 %v7871_v54, %s6270_s10 }
 0x257   : > { %v2276_v18 = vpop.f32.mrf.mxu0  ;;  %1570 = vst.msk [vmem:[#allocation3 + $0xf0] sm:$0xf] %vm1539_vm11, %v1504_v29  ;;  %v2698_v9 = vld [vmem:[#allocation2 + $0x21] sm:$0xff] }
 0x258   : > { %v2395_v4 = vmax.f32 %v2275_v52, 0.0  ;;  %2665 = vst.msk [vmem:[#allocation4 + $0x10] sm:$0xf] %vm278_vm2, %v7874_v16  ;;  %v1637_v13 = vpop.permute.xlu1 %1636  ;;  %v2506_v21 = vld [vmem:[#allocation2 + $0x20] sm:$0xff]  ;;  %v7883_v27 = vpack.c.bf16 %v2698_v9, %v2698_v9 }
 0x259   : > { %v2277_v7 = vpop.f32.mrf.mxu0  ;;  %1702 = vst.msk [vmem:[#allocation3 + $0xf8] sm:$0xf] %vm1670_vm12, %v1637_v13  ;;  %v7886_v14 = vpack.c.bf16 %v2506_v21, %v2506_v21 }
 0x25a   : > { %2473 = vst.msk [vmem:[#allocation2 + $0x31] sm:$0xff] %vm2183_vm14, %v2395_v4  ;;  %v2278_v49 = vadd.f32 %v7855_v53, %v2277_v7  ;;  %v1635_v55 = vpop.permute.xlu0 %1634  ;;  %2829 = vrot.lane.b32.xlu1 %v7883_v27, %s6270_s10 }
 0x25b   : > { %v2279_v43 = vpop.f32.mrf.mxu0  ;;  %1701 = vst.msk [vmem:[#allocation3 + $0xf0] sm:$0xf] %vm1670_vm12, %v1635_v55 }
 0x25c   : > { %v2396_v50 = vmax.f32 %v2278_v49, 0.0  ;;  %2666 = vst.msk [vmem:[#allocation4 + $0x18] sm:$0xf] %vm278_vm2, %v7886_v14  ;;  %v1790_v19 = vpop.permute.xlu1 %1789 }
 0x25d   : > { %1855 = vst.msk [vmem:[#allocation3 + $0xf8] sm:$0xf] %vm1823_vm13, %v1790_v19 }
 0x25e   : > { %2474 = vst.msk [vmem:[#allocation2 + $0x39] sm:$0xff] %vm2183_vm14, %v2396_v50  ;;  %v1788_v58 = vpop.permute.xlu0 %1787 }
 0x25f   : > { %1854 = vst.msk [vmem:[#allocation3 + $0xf0] sm:$0xf] %vm1823_vm13, %v1788_v58 }
 0x260   : > { %v2826_v59 = vpop.permute.xlu1 %2825 }
 0x261   : > { %v2282_v63 = vpop.f32.mrf.mxu0  ;;  %v2699_v11 = vld [vmem:[#allocation2 + $0x31] sm:$0xff]  ;;  %2920 = vst.msk [vmem:[#allocation4 + $0x8] sm:$0xf] %vm794_vm7, %v2826_v59 }
 0x262   : > { %v2507_v57 = vld [vmem:[#allocation2 + $0x30] sm:$0xff]  ;;  %v2283_v51 = vadd.f32 %v7855_v53, %v2282_v63  ;;  %v7897_v36 = vpack.c.bf16 %v2699_v11, %v2699_v11  ;;  %v2824_v33 = vpop.permute.xlu0 %2823 }
 0x263   : > { %v7900_v6 = vpack.c.bf16 %v2507_v57, %v2507_v57  ;;  %v2284_v8 = vpop.f32.mrf.mxu0  ;;  %2919 = vst.msk [vmem:[#allocation4] sm:$0xf] %vm794_vm7, %v2824_v33 }
 0x264   : > { %v2397_v42 = vmax.f32 %v2283_v51, 0.0  ;;  %2831 = vrot.lane.b32.xlu0 %v7897_v36, %s6270_s10 }
 0x265   : > { %2667 = vst.msk [vmem:[#allocation4 + $0x20] sm:$0xf] %vm278_vm2, %v7900_v6  ;;  %v4488_v5 = vld [vmem:[#allocation2 + $0x32] sm:$0xff]  ;;  %v4489_v24 = vld [vmem:[#allocation2 + $0x3a] sm:$0xff]  ;;  %v2285_v47 = vpop.f32.mrf.mxu0 }
 0x266   : > { %v2700_v48 = vld [vmem:[#allocation2 + $0x39] sm:$0xff]  ;;  %v7907_v52 = vpack.c.bf16 %v4488_v5, %v4488_v5  ;;  %v7909_v29 = vpack.c.bf16 %v4489_v24, %v4489_v24  ;;  %2475 = vst.msk [vmem:[#allocation2 + $0x49] sm:$0xff] %vm2183_vm14, %v2397_v42  ;;  %v2286_v18 = vadd.f32 %v7855_v53, %v2285_v47 }
 0x267   : > { %v7913_v4 = vpack.c.bf16 %v2700_v48, %v2700_v48  ;;  %v2508_v7 = vld [vmem:[#allocation2 + $0x38] sm:$0xff]  ;;  %v2287_v9 = vpop.f32.mrf.mxu0 }
 0x268   : > { %v7915_v13 = vpack.c.bf16 %v2508_v7, %v2508_v7  ;;  %4648 = vst.msk [vmem:[#allocation4 + $0x4] sm:$0xf] %vm278_vm2, %v7907_v52  ;;  %4649 = vst.msk [vmem:[#allocation4 + $0xc] sm:$0xf] %vm278_vm2, %v7909_v29  ;;  %v2398_v21 = vmax.f32 %v2286_v18, 0.0 }
 0x269   : > { %2833 = vrot.lane.b32.xlu1 %v7913_v4, %s6270_s10 }
 0x26a   : > { %2668 = vst.msk [vmem:[#allocation4 + $0x28] sm:$0xf] %vm278_vm2, %v7915_v13 }
 0x26b   : > { %2476 = vst.msk [vmem:[#allocation2 + $0x51] sm:$0xff] %vm2183_vm14, %v2398_v21 }
 0x26d   : > { %v2290_v49 = vpop.f32.mrf.mxu0  ;;  %v2701_v55 = vld [vmem:[#allocation2 + $0x49] sm:$0xff] }
 0x26e   : > { %v2509_v43 = vld [vmem:[#allocation2 + $0x48] sm:$0xff]  ;;  %v2291_v50 = vadd.f32 %v7855_v53, %v2290_v49  ;;  %v7927_v19 = vpack.c.bf16 %v2701_v55, %v2701_v55 }
 0x26f   : > { %v7929_v58 = vpack.c.bf16 %v2509_v43, %v2509_v43  ;;  %v2292_v63 = vpop.f32.mrf.mxu0 }
 0x270   : > { %v2399_v11 = vmax.f32 %v2291_v50, 0.0  ;;  %2835 = vrot.lane.b32.xlu0 %v7927_v19, %s6270_s10 }
 0x271   : > { %2669 = vst.msk [vmem:[#allocation4 + $0x30] sm:$0xf] %vm278_vm2, %v7929_v58  ;;  %v2293_v51 = vpop.f32.mrf.mxu0 }
 0x272   : > { %v4490_v59 = vld [vmem:[#allocation2 + $0x4a] sm:$0xff]  ;;  %v4491_v57 = vld [vmem:[#allocation2 + $0x52] sm:$0xff]  ;;  %2477 = vst.msk [vmem:[#allocation2 + $0x61] sm:$0xff] %vm2183_vm14, %v2399_v11  ;;  %v2294_v5 = vadd.f32 %v7855_v53, %v2293_v51 }
 0x273   : > { %v2702_v33 = vld [vmem:[#allocation2 + $0x51] sm:$0xff]  ;;  %v7935_v8 = vpack.c.bf16 %v4490_v59, %v4490_v59  ;;  %v7937_v42 = vpack.c.bf16 %v4491_v57, %v4491_v57  ;;  %v2295_v48 = vpop.f32.mrf.mxu0 }
 0x274   : > { %v7941_v24 = vpack.c.bf16 %v2702_v33, %v2702_v33  ;;  %v2510_v47 = vld [vmem:[#allocation2 + $0x50] sm:$0xff]  ;;  %v2400_v7 = vmax.f32 %v2294_v5, 0.0 }
 0x275   : > { %v7943_v18 = vpack.c.bf16 %v2510_v47, %v2510_v47  ;;  %4650 = vst.msk [vmem:[#allocation4 + $0x14] sm:$0xf] %vm278_vm2, %v7935_v8  ;;  %4651 = vst.msk [vmem:[#allocation4 + $0x1c] sm:$0xf] %vm278_vm2, %v7937_v42 }
 0x276   : > { %2837 = vrot.lane.b32.xlu1 %v7941_v24, %s6270_s10  ;;  %2478 = vst.msk [vmem:[#allocation2 + $0x69] sm:$0xff] %vm2183_vm14, %v2400_v7 }
 0x277   : > { %2670 = vst.msk [vmem:[#allocation4 + $0x38] sm:$0xf] %vm278_vm2, %v7943_v18 }
 0x279   : > { %v2298_v9 = vpop.f32.mrf.mxu0  ;;  %v2703_v21 = vld [vmem:[#allocation2 + $0x61] sm:$0xff] }
 0x27a   : > { %v2511_v49 = vld [vmem:[#allocation2 + $0x60] sm:$0xff]  ;;  %v2299_v55 = vadd.f32 %v7855_v53, %v2298_v9  ;;  %v7955_v43 = vpack.c.bf16 %v2703_v21, %v2703_v21 }
 0x27b   : > { %v7957_v50 = vpack.c.bf16 %v2511_v49, %v2511_v49  ;;  %v2300_v63 = vpop.f32.mrf.mxu0 }
 0x27c   : > { %v2401_v11 = vmax.f32 %v2299_v55, 0.0  ;;  %2839 = vrot.lane.b32.xlu0 %v7955_v43, %s6270_s10 }
 0x27d   : > { %2671 = vst.msk [vmem:[#allocation4 + $0x40] sm:$0xf] %vm278_vm2, %v7957_v50  ;;  %v4492_v59 = vld [vmem:[#allocation2 + $0x62] sm:$0xff]  ;;  %v4493_v57 = vld [vmem:[#allocation2 + $0x6a] sm:$0xff]  ;;  %v2301_v51 = vpop.f32.mrf.mxu0 }
 0x27e   : > { %v2704_v33 = vld [vmem:[#allocation2 + $0x69] sm:$0xff]  ;;  %v7963_v5 = vpack.c.bf16 %v4492_v59, %v4492_v59  ;;  %v6042_v47 = vpack.c.bf16 %v4493_v57, %v4493_v57  ;;  %2479 = vst.msk [vmem:[#allocation2 + $0x79] sm:$0xff] %vm2183_vm14, %v2401_v11  ;;  %v2302_v48 = vadd.f32 %v7855_v53, %v2301_v51 }
 0x27f   : > { %v7967_v7 = vpack.c.bf16 %v2704_v33, %v2704_v33  ;;  %v2512_v9 = vld [vmem:[#allocation2 + $0x68] sm:$0xff]  ;;  %v2303_v21 = vpop.f32.mrf.mxu0  ;;  %v1952_v51 = vld [vmem:[#allocation3 + $0xc0] sm:$0xff]  ;;  %v1953_v33 = vld [vmem:[#allocation3 + $0xc8] sm:$0xff] }
 0x280   : > { %v7969_v49 = vpack.c.bf16 %v2512_v9, %v2512_v9  ;;  %4652 = vst.msk [vmem:[#allocation4 + $0x24] sm:$0xf] %vm278_vm2, %v7963_v5  ;;  %4653 = vst.msk [vmem:[#allocation4 + $0x2c] sm:$0xf] %vm278_vm2, %v6042_v47  ;;  %v2402_v55 = vmax.f32 %v2302_v48, 0.0  ;;  %v5397_v34 = vcombine.low %v1952_v51, %v1953_v33 }
 0x281   : > { %2841 = vrot.lane.b32.xlu1 %v7967_v7, %s6270_s10  ;;  %v6156_v47 = vld [vmem:[#allocation3 + $0xc4] ss:$8 sps:$4 sm:$0xff]  }
 0x282   : > { %2672 = vst.msk [vmem:[#allocation4 + $0x48] sm:$0xf] %vm278_vm2, %v7969_v49  ;;  %5426 = vmatprep.mubr.msk.bf16.mxu0 %vm2183_vm14, %v6156_v47 }
 0x283   : > { %2480 = vst.msk [vmem:[#allocation2 + $0x81] sm:$0xff] %vm2183_vm14, %v2402_v55  ;;  %2361 = vmatmul.mubr.bf16.gmra.mxu0 %v5397_v34  ;;  %v1954_v34 = vld [vmem:[#allocation3 + $0xd0] sm:$0xff] }
 0x285   : > { %v2705_v63 = vld [vmem:[#allocation2 + $0x79] sm:$0xff] }
 0x286   : > { %v2513_v11 = vld [vmem:[#allocation2 + $0x78] sm:$0xff]  ;;  %v7979_v59 = vpack.c.bf16 %v2705_v63, %v2705_v63 }
 0x287   : > { %v7981_v57 = vpack.c.bf16 %v2513_v11, %v2513_v11 }
 0x288   : > { %2843 = vrot.lane.b32.xlu0 %v7979_v59, %s6270_s10 }
 0x289   : > { %2673 = vst.msk [vmem:[#allocation4 + $0x50] sm:$0xf] %vm278_vm2, %v7981_v57  ;;  %v2306_v21 = vpop.f32.mrf.mxu0 }
 0x28a   : > { %v4494_v48 = vld [vmem:[#allocation2 + $0x7a] sm:$0xff]  ;;  %v4495_v9 = vld [vmem:[#allocation2 + $0x82] sm:$0xff]  ;;  %v2307_v63 = vadd.f32 %v7855_v53, %v2306_v21 }
 0x28b   : > { %v2706_v31 = vld [vmem:[#allocation2 + $0x81] sm:$0xff]  ;;  %v6043_v55 = vpack.c.bf16 %v4494_v48, %v4494_v48  ;;  %v6044_v44 = vpack.c.bf16 %v4495_v9, %v4495_v9  ;;  %v2308_v45 = vpop.f32.mrf.mxu0 }
 0x28c   : > { %v7988_v25 = vpack.c.bf16 %v2706_v31, %v2706_v31  ;;  %v2514_v11 = vld [vmem:[#allocation2 + $0x80] sm:$0xff]  ;;  %v2403_v37 = vmax.f32 %v2307_v63, 0.0 }
 0x28d   : > { %v7991_v39 = vpack.c.bf16 %v2514_v11, %v2514_v11  ;;  %4654 = vst.msk [vmem:[#allocation4 + $0x34] sm:$0xf] %vm278_vm2, %v6043_v55  ;;  %4655 = vst.msk [vmem:[#allocation4 + $0x3c] sm:$0xf] %vm278_vm2, %v6044_v44  ;;  %v2309_v48 = vpop.f32.mrf.mxu0  ;;  %v6158_v21 = vld [vmem:[#allocation3 + $0xd4] ss:$8 sps:$4 sm:$0xff]  }
 0x28e   : > { %2845 = vrot.lane.b32.xlu1 %v7988_v25, %s6270_s10  ;;  %2481 = vst.msk [vmem:[#allocation2 + $0x91] sm:$0xff] %vm2183_vm14, %v2403_v37  ;;  %v2310_v31 = vadd.f32 %v7855_v53, %v2309_v48  ;;  %v1955_v37 = vld [vmem:[#allocation3 + $0xd8] sm:$0xff]  ;;  %5427 = vmatprep.mubr.msk.bf16.mxu0 %vm2183_vm14, %v6158_v21 }
 0x28f   : > { %2674 = vst.msk [vmem:[#allocation4 + $0x58] sm:$0xf] %vm278_vm2, %v7991_v39  ;;  %v2311_v45 = vpop.f32.mrf.mxu0  ;;  %v5399_v28 = vcombine.low %v1954_v34, %v1955_v37 }
 0x290   : > { %v2404_v47 = vmax.f32 %v2310_v31, 0.0 }
 0x291   : > { %2369 = vmatmul.mubr.bf16.gmra.mxu0 %v5399_v28  ;;  %v1957_v28 = vld [vmem:[#allocation3 + $0xe8] sm:$0xff] }
 0x292   : > { %2482 = vst.msk [vmem:[#allocation2 + $0x99] sm:$0xff] %vm2183_vm14, %v2404_v47 }
 0x295   : > { %v2707_v51 = vld [vmem:[#allocation2 + $0x91] sm:$0xff] }
 0x296   : > { %v2515_v33 = vld [vmem:[#allocation2 + $0x90] sm:$0xff]  ;;  %v8002_v44 = vpack.c.bf16 %v2707_v51, %v2707_v51 }
 0x297   : > { %v8004_v9 = vpack.c.bf16 %v2515_v33, %v2515_v33 }
 0x298   : > { %2847 = vrot.lane.b32.xlu0 %v8002_v44, %s6270_s10 }
 0x299   : > { %2675 = vst.msk [vmem:[#allocation4 + $0x60] sm:$0xf] %vm278_vm2, %v8004_v9  ;;  %v4496_v55 = vld [vmem:[#allocation2 + $0x92] sm:$0xff]  ;;  %v4497_v63 = vld [vmem:[#allocation2 + $0x9a] sm:$0xff]  ;;  %v2314_v11 = vpop.f32.mrf.mxu0 }
 0x29a   : > { %v2708_v48 = vld [vmem:[#allocation2 + $0x99] sm:$0xff]  ;;  %v6045_v31 = vpack.c.bf16 %v4496_v55, %v4496_v55  ;;  %v6046_v45 = vpack.c.bf16 %v4497_v63, %v4497_v63  ;;  %v2315_v47 = vadd.f32 %v7855_v53, %v2314_v11 }
 0x29b   : > { %v5826_v51 = vpack.c.bf16 %v2708_v48, %v2708_v48  ;;  %v2516_v33 = vld [vmem:[#allocation2 + $0x98] sm:$0xff]  ;;  %v2316_v15 = vpop.f32.mrf.mxu0  ;;  %v1956_v48 = vld [vmem:[#allocation3 + $0xe0] sm:$0xff] }
 0x29c   : > { %v8012_v23 = vpack.c.bf16 %v2516_v33, %v2516_v33  ;;  %4656 = vst.msk [vmem:[#allocation4 + $0x44] sm:$0xf] %vm278_vm2, %v6045_v31  ;;  %4657 = vst.msk [vmem:[#allocation4 + $0x4c] sm:$0xf] %vm278_vm2, %v6046_v45  ;;  %v2405_v22 = vmax.f32 %v2315_v47, 0.0 }
 0x29d   : > { %2849 = vrot.lane.b32.xlu1 %v5826_v51, %s6270_s10  ;;  %v2317_v38 = vpop.f32.mrf.mxu0  ;;  %v6160_v31 = vld [vmem:[#allocation3 + $0xe4] ss:$8 sps:$4 sm:$0xff]  }
 0x29e   : > { %2676 = vst.msk [vmem:[#allocation4 + $0x68] sm:$0xf] %vm278_vm2, %v8012_v23  ;;  %v2318_v21 = vadd.f32 %v7855_v53, %v2317_v38  ;;  %5428 = vmatprep.mubr.msk.bf16.mxu0 %vm2183_vm14, %v6160_v31 }
 0x29f   : > { %2483 = vst.msk [vmem:[#allocation2 + $0xa9] sm:$0xff] %vm2183_vm14, %v2405_v22  ;;  %v2319_v15 = vpop.f32.mrf.mxu0 }
 0x2a0   : > { %v2406_v55 = vmax.f32 %v2318_v21, 0.0 }
 0x2a2   : > { %2484 = vst.msk [vmem:[#allocation2 + $0xb1] sm:$0xff] %vm2183_vm14, %v2406_v55 }
 0x2a6   : > { %v2709_v34 = vld [vmem:[#allocation2 + $0xa9] sm:$0xff] }
 0x2a7   : > { %v2517_v37 = vld [vmem:[#allocation2 + $0xa8] sm:$0xff]  ;;  %v5827_v63 = vpack.c.bf16 %v2709_v34, %v2709_v34 }
 0x2a8   : > { %v8022_v11 = vpack.c.bf16 %v2517_v37, %v2517_v37 }
 0x2a9   : > { %2851 = vrot.lane.b32.xlu0 %v5827_v63, %s6270_s10  ;;  %v4498_v22 = vld [vmem:[#allocation2 + $0xaa] sm:$0xff]  ;;  %v4499_v45 = vld [vmem:[#allocation2 + $0xb2] sm:$0xff]  ;;  %v2322_v38 = vpop.f32.mrf.mxu0  ;;  %v5401_v63 = vcombine.low %v1956_v48, %v1957_v28 }
 0x2aa   : > { %2677 = vst.msk [vmem:[#allocation4 + $0x70] sm:$0xf] %vm278_vm2, %v8022_v11  ;;  %v2710_v47 = vld [vmem:[#allocation2 + $0xb1] sm:$0xff]  ;;  %v6047_v51 = vpack.c.bf16 %v4498_v22, %v4498_v22  ;;  %v6048_v33 = vpack.c.bf16 %v4499_v45, %v4499_v45  ;;  %v2323_v21 = vadd.f32 %v7855_v53, %v2322_v38 }
 0x2ab   : > { %v5828_v15 = vpack.c.bf16 %v2710_v47, %v2710_v47  ;;  %v2518_v55 = vld [vmem:[#allocation2 + $0xb0] sm:$0xff]  ;;  %v2324_v34 = vpop.f32.mrf.mxu0  ;;  %2377 = vmatmul.mubr.bf16.gmra.mxu0 %v5401_v63 }
 0x2ac   : > { %v8029_v37 = vpack.c.bf16 %v2518_v55, %v2518_v55  ;;  %4658 = vst.msk [vmem:[#allocation4 + $0x54] sm:$0xf] %vm278_vm2, %v6047_v51  ;;  %4659 = vst.msk [vmem:[#allocation4 + $0x5c] sm:$0xf] %vm278_vm2, %v6048_v33  ;;  %v2407_v3 = vmax.f32 %v2323_v21, 0.0  ;;  %v1958_v51 = vld [vmem:[#allocation3 + $0xf0] sm:$0xff] }
 0x2ad   : > { %2853 = vrot.lane.b32.xlu1 %v5828_v15, %s6270_s10  ;;  %v2325_v32 = vpop.f32.mrf.mxu0  ;;  %v1959_v33 = vld [vmem:[#allocation3 + $0xf8] sm:$0xff] }
 0x2ae   : > { %2678 = vst.msk [vmem:[#allocation4 + $0x78] sm:$0xf] %vm278_vm2, %v8029_v37  ;;  %v2326_v31 = vadd.f32 %v7855_v53, %v2325_v32  ;;  %v6162_v21 = vld [vmem:[#allocation3 + $0xf4] ss:$8 sps:$4 sm:$0xff]  }
 0x2af   : > { %2485 = vst.msk [vmem:[#allocation2 + $0xc1] sm:$0xff] %vm2183_vm14, %v2407_v3  ;;  %v2327_v22 = vpop.f32.mrf.mxu0  ;;  %5429 = vmatprep.mubr.msk.bf16.mxu0 %vm2183_vm14, %v6162_v21 }
 0x2b0   : > { %v2408_v45 = vmax.f32 %v2326_v31, 0.0 }
 0x2b2   : > { %2486 = vst.msk [vmem:[#allocation2 + $0xc9] sm:$0xff] %vm2183_vm14, %v2408_v45 }
 0x2b6   : > { %v2711_v48 = vld [vmem:[#allocation2 + $0xc1] sm:$0xff] }
 0x2b7   : > { %v2519_v28 = vld [vmem:[#allocation2 + $0xc0] sm:$0xff]  ;;  %v5829_v38 = vpack.c.bf16 %v2711_v48, %v2711_v48 }
 0x2b8   : > { %v8039_v47 = vpack.c.bf16 %v2519_v28, %v2519_v28 }
 0x2b9   : > { %2855 = vrot.lane.b32.xlu0 %v5829_v38, %s6270_s10  ;;  %v4500_v3 = vld [vmem:[#allocation2 + $0xc2] sm:$0xff]  ;;  %v4501_v15 = vld [vmem:[#allocation2 + $0xca] sm:$0xff]  ;;  %v2330_v32 = vpop.f32.mrf.mxu0  ;;  %v5403_v38 = vcombine.low %v1958_v51, %v1959_v33 }
 0x2ba   : > { %2679 = vst.msk [vmem:[#allocation4 + $0x80] sm:$0xf] %vm278_vm2, %v8039_v47  ;;  %v2712_v55 = vld [vmem:[#allocation2 + $0xc9] sm:$0xff]  ;;  %v6049_v34 = vpack.c.bf16 %v4500_v3, %v4500_v3  ;;  %v6050_v63 = vpack.c.bf16 %v4501_v15, %v4501_v15  ;;  %v2331_v31 = vadd.f32 %v7855_v53, %v2330_v32 }
 0x2bb   : > { %v5830_v22 = vpack.c.bf16 %v2712_v55, %v2712_v55  ;;  %v2520_v45 = vld [vmem:[#allocation2 + $0xc8] sm:$0xff]  ;;  %v2332_v48 = vpop.f32.mrf.mxu0  ;;  %2385 = vmatmul.mubr.bf16.gmra.mxu0 %v5403_v38 }
 0x2bc   : > { %v8046_v28 = vpack.c.bf16 %v2520_v45, %v2520_v45  ;;  %4660 = vst.msk [vmem:[#allocation4 + $0x64] sm:$0xf] %vm278_vm2, %v6049_v34  ;;  %4661 = vst.msk [vmem:[#allocation4 + $0x6c] sm:$0xf] %vm278_vm2, %v6050_v63  ;;  %v2409_v35 = vmax.f32 %v2331_v31, 0.0 }
 0x2bd   : > { %2857 = vrot.lane.b32.xlu1 %v5830_v22, %s6270_s10  ;;  %v2333_v12 = vpop.f32.mrf.mxu0 }
 0x2be   : > { %2680 = vst.msk [vmem:[#allocation4 + $0x88] sm:$0xf] %vm278_vm2, %v8046_v28  ;;  %v2334_v21 = vadd.f32 %v7855_v53, %v2333_v12 }
 0x2bf   : > { %2487 = vst.msk [vmem:[#allocation2 + $0xd9] sm:$0xff] %vm2183_vm14, %v2409_v35  ;;  %v2335_v3 = vpop.f32.mrf.mxu0 }
 0x2c0   : > { %v2410_v15 = vmax.f32 %v2334_v21, 0.0 }
 0x2c2   : > { %2488 = vst.msk [vmem:[#allocation2 + $0xe1] sm:$0xff] %vm2183_vm14, %v2410_v15 }
 0x2c6   : > { %v2713_v51 = vld [vmem:[#allocation2 + $0xd9] sm:$0xff] }
 0x2c7   : > { %v2521_v33 = vld [vmem:[#allocation2 + $0xd8] sm:$0xff]  ;;  %v5831_v32 = vpack.c.bf16 %v2713_v51, %v2713_v51 }
 0x2c8   : > { %v8056_v55 = vpack.c.bf16 %v2521_v33, %v2521_v33  ;;  %v2828_v48 = vpop.permute.xlu0 %2827 }
 0x2c9   : > { %2859 = vrot.lane.b32.xlu0 %v5831_v32, %s6270_s10  ;;  %v4502_v34 = vld [vmem:[#allocation2 + $0xda] sm:$0xff]  ;;  %v4503_v63 = vld [vmem:[#allocation2 + $0xe2] sm:$0xff]  ;;  %v2338_v31 = vpop.f32.mrf.mxu0  ;;  %2921 = vst.msk [vmem:[#allocation4 + $0x10] sm:$0xf] %vm794_vm7, %v2828_v48 }
 0x2ca   : > { %2681 = vst.msk [vmem:[#allocation4 + $0x90] sm:$0xf] %vm278_vm2, %v8056_v55  ;;  %v2714_v35 = vld [vmem:[#allocation2 + $0xe1] sm:$0xff]  ;;  %v6051_v22 = vpack.c.bf16 %v4502_v34, %v4502_v34  ;;  %v6052_v12 = vpack.c.bf16 %v4503_v63, %v4503_v63  ;;  %v2339_v45 = vadd.f32 %v7855_v53, %v2338_v31 }
 0x2cb   : > { %v5832_v38 = vpack.c.bf16 %v2714_v35, %v2714_v35  ;;  %v2522_v21 = vld [vmem:[#allocation2 + $0xe0] sm:$0xff]  ;;  %v2340_v3 = vpop.f32.mrf.mxu0 }
 0x2cc   : > { %v8063_v15 = vpack.c.bf16 %v2522_v21, %v2522_v21  ;;  %4662 = vst.msk [vmem:[#allocation4 + $0x74] sm:$0xf] %vm278_vm2, %v6051_v22  ;;  %4663 = vst.msk [vmem:[#allocation4 + $0x7c] sm:$0xf] %vm278_vm2, %v6052_v12  ;;  %v2411_v51 = vmax.f32 %v2339_v45, 0.0  ;;  %v2830_v34 = vpop.permute.xlu1 %2829 }
 0x2cd   : > { %2861 = vrot.lane.b32.xlu1 %v5832_v38, %s6270_s10  ;;  %v2341_v33 = vpop.f32.mrf.mxu0  ;;  %2922 = vst.msk [vmem:[#allocation4 + $0x18] sm:$0xf] %vm794_vm7, %v2830_v34 }
 0x2ce   : > { %2682 = vst.msk [vmem:[#allocation4 + $0x98] sm:$0xf] %vm278_vm2, %v8063_v15  ;;  %v2342_v32 = vadd.f32 %v7855_v53, %v2341_v33 }
 0x2cf   : > { %2489 = vst.msk [vmem:[#allocation2 + $0xf1] sm:$0xff] %vm2183_vm14, %v2411_v51  ;;  %v2343_v63 = vpop.f32.mrf.mxu0 }
 0x2d0   : > { %v2412_v31 = vmax.f32 %v2342_v32, 0.0 }
 0x2d2   : > { %2490 = vst.msk [vmem:[#allocation2 + $0xf9] sm:$0xff] %vm2183_vm14, %v2412_v31 }
 0x2d6   : > { %v2715_v35 = vld [vmem:[#allocation2 + $0xf1] sm:$0xff]  ;;  %v2832_v12 = vpop.permute.xlu0 %2831 }
 0x2d7   : > { %v2523_v22 = vld [vmem:[#allocation2 + $0xf0] sm:$0xff]  ;;  %v5833_v45 = vpack.c.bf16 %v2715_v35, %v2715_v35  ;;  %2923 = vst.msk [vmem:[#allocation4 + $0x20] sm:$0xf] %vm794_vm7, %v2832_v12 }
 0x2d8   : > { %v8074_v48 = vpack.c.bf16 %v2523_v22, %v2523_v22 }
 0x2d9   : > { %2863 = vrot.lane.b32.xlu0 %v5833_v45, %s6270_s10  ;;  %v4504_v38 = vld [vmem:[#allocation2 + $0xf2] sm:$0xff]  ;;  %v4505_v21 = vld [vmem:[#allocation2 + $0xfa] sm:$0xff]  ;;  %v2346_v3 = vpop.f32.mrf.mxu0 }
 0x2da   : > { %2683 = vst.msk [vmem:[#allocation4 + $0xa0] sm:$0xf] %vm278_vm2, %v8074_v48  ;;  %v2716_v51 = vld [vmem:[#allocation2 + $0xf9] sm:$0xff]  ;;  %v6053_v33 = vpack.c.bf16 %v4504_v38, %v4504_v38  ;;  %v6054_v32 = vpack.c.bf16 %v4505_v21, %v4505_v21  ;;  %v2347_v34 = vadd.f32 %v7855_v53, %v2346_v3 }
 0x2db   : > { %v2834_v63 = vpop.permute.xlu1 %2833  ;;  %v5834_v31 = vpack.c.bf16 %v2716_v51, %v2716_v51  ;;  %v2524_v35 = vld [vmem:[#allocation2 + $0xf8] sm:$0xff]  ;;  %v2348_v22 = vpop.f32.mrf.mxu0 }
 0x2dc   : > { %2924 = vst.msk [vmem:[#allocation4 + $0x28] sm:$0xf] %vm794_vm7, %v2834_v63  ;;  %v8082_v12 = vpack.c.bf16 %v2524_v35, %v2524_v35  ;;  %v2413_v45 = vmax.f32 %v2347_v34, 0.0  ;;  %v2951_v35 = vld [vmem:[#allocation2 + $0x2] sm:$0xff] }
 0x2dd   : > { %4664 = vst.msk [vmem:[#allocation4 + $0x84] sm:$0xf] %vm278_vm2, %v6053_v33  ;;  %4665 = vst.msk [vmem:[#allocation4 + $0x8c] sm:$0xf] %vm278_vm2, %v6054_v32  ;;  %2865 = vrot.lane.b32.xlu1 %v5834_v31, %s6270_s10  ;;  %v2349_v41 = vpop.f32.mrf.mxu0 }
 0x2de   : > { %2684 = vst.msk [vmem:[#allocation4 + $0xa8] sm:$0xf] %vm278_vm2, %v8082_v12  ;;  %v2350_v38 = vadd.f32 %v7855_v53, %v2349_v41 }
 0x2df   : > { %2491 = vst.msk [vmem:[#allocation2 + $0x109] sm:$0xff] %vm2183_vm14, %v2413_v45  ;;  %v2351_v21 = vpop.f32.mrf.mxu0 }
 0x2e0   : > { %v2414_v3 = vmax.f32 %v2350_v38, 0.0 }
 0x2e2   : > { %2492 = vst.msk [vmem:[#allocation2 + $0x111] sm:$0xff] %vm2183_vm14, %v2414_v3  ;;  %v2836_v51 = vpop.permute.xlu0 %2835 }
 0x2e3   : > { %2925 = vst.msk [vmem:[#allocation4 + $0x30] sm:$0xf] %vm794_vm7, %v2836_v51 }
 0x2e6   : > { %v2717_v33 = vld [vmem:[#allocation2 + $0x109] sm:$0xff] }
 0x2e7   : > { %v2525_v32 = vld [vmem:[#allocation2 + $0x108] sm:$0xff]  ;;  %v5835_v63 = vpack.c.bf16 %v2717_v33, %v2717_v33  ;;  %v2354_v45 = vpop.f32.mrf.mxu0 }
 0x2e8   : > { %v2838_v34 = vpop.permute.xlu1 %2837  ;;  %v8093_v31 = vpack.c.bf16 %v2525_v32, %v2525_v32  ;;  %v2355_v51 = vadd.f32 %v7855_v53, %v2354_v45  ;;  %v6164_v32 = vld [vmem:[%s8975_s3 + $0x38] sm:$0xff]   ;;  %v9195_v45 = vmov 0  }
 0x2e9   : > { %2926 = vst.msk [vmem:[#allocation4 + $0x38] sm:$0xf] %vm794_vm7, %v2838_v34  ;;  %2867 = vrot.lane.b32.xlu0 %v5835_v63, %s6270_s10  ;;  %v4506_v41 = vld [vmem:[#allocation2 + $0x10a] sm:$0xff]  ;;  %v4507_v22 = vld [vmem:[#allocation2 + $0x112] sm:$0xff]  ;;  %v2356_v34 = vpop.f32.mrf.mxu0  ;;  %4984 = vmatpush1.bf16.msra.mxu1 %v6164_v32 }
 0x2ea   : > { %2685 = vst.msk [vmem:[#allocation4 + $0xb0] sm:$0xf] %vm278_vm2, %v8093_v31  ;;  %v2718_v38 = vld [vmem:[#allocation2 + $0x111] sm:$0xff]  ;;  %v6055_v21 = vpack.c.bf16 %v4506_v41, %v4506_v41  ;;  %v6056_v3 = vpack.c.bf16 %v4507_v22, %v4507_v22  ;;  %v2415_v26 = vmax.f32 %v2355_v51, 0.0  ;;  %v5845_v41 = vpack.c.bf16 %v2951_v35, %v2951_v35  ;;  %4985 = vmatprep.subr.bf16.mxu1 %v9195_v45 }
 0x2eb   : > { %v5836_v60 = vpack.c.bf16 %v2718_v38, %v2718_v38  ;;  %v2526_v33 = vld [vmem:[#allocation2 + $0x110] sm:$0xff]  ;;  %v2357_v22 = vpop.f32.mrf.mxu0 }
 0x2ec   : > { %v8103_v63 = vpack.c.bf16 %v2526_v33, %v2526_v33  ;;  %4666 = vst.msk [vmem:[#allocation4 + $0x94] sm:$0xf] %vm278_vm2, %v6055_v21  ;;  %4667 = vst.msk [vmem:[#allocation4 + $0x9c] sm:$0xf] %vm278_vm2, %v6056_v3  ;;  %v2358_v38 = vadd.f32 %v7855_v53, %v2357_v22  ;;  %v6165_v21 = vld [vmem:[%s8975_s3 + $0x30] sm:$0xff]   ;;  %v6167_v22 = vld [vmem:[%s8975_s3 + $0x20] sm:$0xff]  }
 0x2ed   : > { %2869 = vrot.lane.b32.xlu1 %v5836_v60, %s6270_s10  ;;  %2493 = vst.msk [vmem:[#allocation2 + $0x121] sm:$0xff] %vm2183_vm14, %v2415_v26  ;;  %v2359_v60 = vpop.f32.mrf.mxu0  ;;  %4986 = vmatpush1.bf16.msra.mxu1 %v6165_v21  ;;  %v6166_v26 = vld [vmem:[%s8975_s3 + $0x28] sm:$0xff]  }
 0x2ee   : > { %2686 = vst.msk [vmem:[#allocation4 + $0xb8] sm:$0xf] %vm278_vm2, %v8103_v63  ;;  %v2840_v33 = vpop.permute.xlu0 %2839  ;;  %v2416_v35 = vmax.f32 %v2358_v38, 0.0  ;;  %4987 = vmatprep.subr.bf16.mxu1 %v9195_v45  ;;  %v2952_v51 = vld [vmem:[#allocation2 + $0xa] sm:$0xff]  ;;  %v3719_v38 = vld [vmem:[#allocation2 + $0x1a] sm:$0xff] }
 0x2ef   : > { %2927 = vst.msk [vmem:[#allocation4 + $0x40] sm:$0xf] %vm794_vm7, %v2840_v33 }
 0x2f0   : > { %2494 = vst.msk [vmem:[#allocation2 + $0x129] sm:$0xff] %vm2183_vm14, %v2416_v35 }
 0x2f1   : > { %3079 = vrot.lane.b32.xlu1 %v5845_v41, %s6271_s11  ;;  %4988 = vmatpush1.bf16.msra.mxu1 %v6166_v26 }
 0x2f2   : > { %4989 = vmatprep.subr.bf16.mxu1 %v9195_v45 }
 0x2f3   : > { %v2842_v3 = vpop.permute.xlu1 %2841 }
 0x2f4   : > { %2928 = vst.msk [vmem:[#allocation4 + $0x48] sm:$0xf] %vm794_vm7, %v2842_v3  ;;  %v2719_v53 = vld [vmem:[#allocation2 + $0x121] sm:$0xff] }
 0x2f5   : > { %3335 = vrot.lane.b32.xlu1 %v7874_v16, %s6272_s12  ;;  %v2527_v32 = vld [vmem:[#allocation2 + $0x120] sm:$0xff]  ;;  %v5837_v34 = vpack.c.bf16 %v2719_v53, %v2719_v53  ;;  %v5846_v16 = vpack.c.bf16 %v2952_v51, %v2952_v51  ;;  %4990 = vmatpush1.bf16.msra.mxu1 %v6167_v22  ;;  %v5941_v53 = vpack.c.bf16 %v3719_v38, %v3719_v38  ;;  %v6170_v22 = vld [vmem:[%s8975_s3 + $0x8] sm:$0xff]  }
 0x2f6   : > { %v8127_v41 = vpack.c.bf16 %v2527_v32, %v2527_v32  ;;  %4991 = vmatprep.subr.bf16.mxu1 %v9195_v45  ;;  %v3720_v38 = vld [vmem:[#allocation2 + $0x22] sm:$0xff] }
 0x2f7   : > { %2871 = vrot.lane.b32.xlu0 %v5837_v34, %s6270_s10  ;;  %v4508_v33 = vld [vmem:[#allocation2 + $0x122] sm:$0xff]  ;;  %v4509_v21 = vld [vmem:[#allocation2 + $0x12a] sm:$0xff] }
 0x2f8   : > { %2687 = vst.msk [vmem:[#allocation4 + $0xc0] sm:$0xf] %vm278_vm2, %v8127_v41  ;;  %v3997_v60 = vld [vmem:[#allocation2 + $0x128] sm:$0xff]  ;;  %v6057_v35 = vpack.c.bf16 %v4508_v33, %v4508_v33  ;;  %v6058_v3 = vpack.c.bf16 %v4509_v21, %v4509_v21  ;;  %v6169_v34 = vld [vmem:[%s8975_s3 + $0x10] sm:$0xff]  }
 0x2f9   : > { %3591 = vrot.lane.b32.xlu1 %v7871_v54, %s6274_s25  ;;  %v6168_v54 = vld [vmem:[%s8975_s3 + $0x18] sm:$0xff]   ;;  %v8141_v32 = vpack.c.bf16 %v3997_v60, %v3997_v60 }
 0x2fa   : > { %v2844_v26 = vpop.permute.xlu0 %2843  ;;  %4668 = vst.msk [vmem:[#allocation4 + $0xa4] sm:$0xf] %vm278_vm2, %v6057_v35  ;;  %4669 = vst.msk [vmem:[#allocation4 + $0xac] sm:$0xf] %vm278_vm2, %v6058_v3  ;;  %4992 = vmatpush1.bf16.msra.mxu1 %v6168_v54  ;;  %v8254_v35 = vld [vmem:[%s8974_s2] ss:$0 sm:$0xff] }
 0x2fb   : > { %2929 = vst.msk [vmem:[#allocation4 + $0x50] sm:$0xf] %vm794_vm7, %v2844_v26  ;;  %3081 = vrot.lane.b32.xlu0 %v5846_v16, %s6271_s11  ;;  %4993 = vmatprep.subr.bf16.mxu1 %v9195_v45  ;;  %v5942_v16 = vpack.c.bf16 %v3720_v38, %v3720_v38 }
 0x2fc   : > { %2688 = vst.msk [vmem:[#allocation4 + $0xc8] sm:$0xf] %vm278_vm2, %v8141_v32 }
 0x2fd   : > { %3847 = vrot.lane.b32.xlu1 %v5941_v53, %s6275_s23 }
 0x2fe   : > { %4994 = vmatpush1.bf16.msra.mxu1 %v6169_v34  ;;  %v3727_v34 = vld [vmem:[#allocation2 + $0x7a] sm:$0xff] }
 0x2ff   : > { %3337 = vrot.lane.b32.xlu0 %v7886_v14, %s6272_s12  ;;  %4995 = vmatprep.subr.bf16.mxu1 %v9195_v45  ;;  %v6171_v14 = vld [vmem:[%s8975_s3] sm:$0xff]   ;;  %v5949_v38 = vpack.c.bf16 %v3727_v34, %v3727_v34 }
 0x300   : > { %v2846_v51 = vpop.permute.xlu1 %2845 }
 0x301   : > { %2930 = vst.msk [vmem:[#allocation4 + $0x58] sm:$0xf] %vm794_vm7, %v2846_v51  ;;  %4104 = vrot.lane.b32.xlu1 %v7900_v6, %s6276_s6 }
 0x302   : > { %4996 = vmatpush1.bf16.msra.mxu1 %v6170_v22 }
 0x303   : > { %3593 = vrot.lane.b32.xlu0 %v7883_v27, %s6274_s25  ;;  %4997 = vmatprep.subr.bf16.mxu1 %v9195_v45  ;;  %v6172_v27 = vld [vmem:[%s8975_s3 + $0x40] sm:$0xff]  }
 0x305   : > { %4360 = vrot.lane.b32.xlu1 %v7897_v36, %s6277_s7 }
 0x306   : > { %4998 = vmatpush1.bf16.msra.mxu1 %v6171_v14 }
 0x307   : > { %3849 = vrot.lane.b32.xlu0 %v5942_v16, %s6275_s23  ;;  %5013 = vmatprep.subr.bf16.mxu1 %v9195_v45 }
 0x309   : > { %3083 = vrot.lane.b32.xlu1 %v5941_v53, %s6271_s11 }
 0x30a   : > { %v2848_v33 = vpop.permute.xlu0 %2847  ;;  %5014 = vmatpush2.bf16.msra.mxu1 %v6172_v27 }
 0x30b   : > { %2931 = vst.msk [vmem:[#allocation4 + $0x60] sm:$0xf] %vm794_vm7, %v2848_v33  ;;  %4106 = vrot.lane.b32.xlu0 %v7915_v13, %s6276_s6 }
 0x30d   : > { %3339 = vrot.lane.b32.xlu1 %v7900_v6, %s6272_s12 }
 0x30f   : > { %v2850_v21 = vpop.permute.xlu1 %2849  ;;  %4362 = vrot.lane.b32.xlu0 %v7913_v4, %s6277_s7 }
 0x310   : > { %2932 = vst.msk [vmem:[#allocation4 + $0x68] sm:$0xf] %vm794_vm7, %v2850_v21 }
 0x311   : > { %3595 = vrot.lane.b32.xlu1 %v7897_v36, %s6274_s25 }
 0x313   : > { %3085 = vrot.lane.b32.xlu0 %v5942_v16, %s6271_s11 }
 0x315   : > { %3851 = vrot.lane.b32.xlu1 %v7907_v52, %s6275_s23 }
 0x317   : > { %3341 = vrot.lane.b32.xlu0 %v7915_v13, %s6272_s12  ;;  %v2956_v13 = vld [vmem:[#allocation2 + $0x3a] sm:$0xff] }
 0x318   : > { %v5850_v45 = vpack.c.bf16 %v2956_v13, %v2956_v13 }
 0x319   : > { %4108 = vrot.lane.b32.xlu1 %v7929_v58, %s6276_s6 }
 0x31b   : > { %v2852_v6 = vpop.permute.xlu0 %2851  ;;  %3597 = vrot.lane.b32.xlu0 %v7913_v4, %s6274_s25 }
 0x31c   : > { %2933 = vst.msk [vmem:[#allocation4 + $0x70] sm:$0xf] %vm794_vm7, %v2852_v6 }
 0x31d   : > { %4364 = vrot.lane.b32.xlu1 %v7927_v19, %s6277_s7 }
 0x31f   : > { %v2854_v36 = vpop.permute.xlu1 %2853  ;;  %3853 = vrot.lane.b32.xlu0 %v7909_v29, %s6275_s23 }
 0x320   : > { %2934 = vst.msk [vmem:[#allocation4 + $0x78] sm:$0xf] %vm794_vm7, %v2854_v36 }
 0x321   : > { %3087 = vrot.lane.b32.xlu1 %v7907_v52, %s6271_s11 }
 0x323   : > { %4110 = vrot.lane.b32.xlu0 %v7943_v18, %s6276_s6 }
 0x325   : > { %3343 = vrot.lane.b32.xlu1 %v7929_v58, %s6272_s12  ;;  %v2958_v58 = vld [vmem:[#allocation2 + $0x52] sm:$0xff] }
 0x327   : > { %4366 = vrot.lane.b32.xlu0 %v7941_v24, %s6277_s7 }
 0x329   : > { %3599 = vrot.lane.b32.xlu1 %v7927_v19, %s6274_s25 }
 0x32b   : > { %v2856_v4 = vpop.permute.xlu0 %2855  ;;  %3089 = vrot.lane.b32.xlu0 %v5850_v45, %s6271_s11 }
 0x32c   : > { %2935 = vst.msk [vmem:[#allocation4 + $0x80] sm:$0xf] %vm794_vm7, %v2856_v4 }
 0x32d   : > { %3855 = vrot.lane.b32.xlu1 %v7935_v8, %s6275_s23 }
 0x32f   : > { %v2858_v52 = vpop.permute.xlu1 %2857  ;;  %3345 = vrot.lane.b32.xlu0 %v7943_v18, %s6272_s12  ;;  %v3726_v18 = vld [vmem:[#allocation2 + $0x6a] sm:$0xff] }
 0x330   : > { %2936 = vst.msk [vmem:[#allocation4 + $0x88] sm:$0xf] %vm794_vm7, %v2858_v52  ;;  %v5948_v60 = vpack.c.bf16 %v3726_v18, %v3726_v18 }
 0x331   : > { %4112 = vrot.lane.b32.xlu1 %v7957_v50, %s6276_s6 }
 0x333   : > { %3601 = vrot.lane.b32.xlu0 %v7941_v24, %s6274_s25  ;;  %v2959_v24 = vld [vmem:[#allocation2 + $0x62] sm:$0xff] }
 0x335   : > { %4368 = vrot.lane.b32.xlu1 %v7955_v43, %s6277_s7 }
 0x337   : > { %3857 = vrot.lane.b32.xlu0 %v7937_v42, %s6275_s23 }
 0x339   : > { %3091 = vrot.lane.b32.xlu1 %v7935_v8, %s6271_s11  ;;  %v5852_v8 = vpack.c.bf16 %v2958_v58, %v2958_v58 }
 0x33b   : > { %v2860_v29 = vpop.permute.xlu0 %2859  ;;  %4114 = vrot.lane.b32.xlu0 %v7969_v49, %s6276_s6 }
 0x33c   : > { %2937 = vst.msk [vmem:[#allocation4 + $0x90] sm:$0xf] %vm794_vm7, %v2860_v29 }
 0x33d   : > { %3347 = vrot.lane.b32.xlu1 %v7957_v50, %s6272_s12 }
 0x33f   : > { %v2862_v19 = vpop.permute.xlu1 %2861  ;;  %4370 = vrot.lane.b32.xlu0 %v7967_v7, %s6277_s7 }
 0x340   : > { %2938 = vst.msk [vmem:[#allocation4 + $0x98] sm:$0xf] %vm794_vm7, %v2862_v19 }
 0x341   : > { %3603 = vrot.lane.b32.xlu1 %v7955_v43, %s6274_s25 }
 0x343   : > { %3093 = vrot.lane.b32.xlu0 %v5852_v8, %s6271_s11  ;;  %v2362_v43 = vpop.f32.mrf.mxu0 }
 0x345   : > { %3859 = vrot.lane.b32.xlu1 %v7963_v5, %s6275_s23  ;;  %v5853_v5 = vpack.c.bf16 %v2959_v24, %v2959_v24  ;;  %v2364_v3 = vpop.f32.mrf.mxu0 }
 0x347   : > { %3349 = vrot.lane.b32.xlu0 %v7969_v49, %s6272_s12  ;;  %v2363_v49 = vadd.f32 %v8254_v35, %v2362_v43 }
 0x349   : > { %4116 = vrot.lane.b32.xlu1 %v7981_v57, %s6276_s6  ;;  %v2417_v26 = vmax.f32 %v2363_v49, 0.0 }
 0x34b   : > { %v2864_v42 = vpop.permute.xlu0 %2863  ;;  %3605 = vrot.lane.b32.xlu0 %v7967_v7, %s6274_s25  ;;  %v2365_v7 = vpop.f32.mrf.mxu0  ;;  %2495 = vst.msk [vmem:[#allocation2 + $0x139] sm:$0xff] %vm2183_vm14, %v2417_v26 }
 0x34c   : > { %2939 = vst.msk [vmem:[#allocation4 + $0xa0] sm:$0xf] %vm794_vm7, %v2864_v42  ;;  %v2366_v53 = vadd.f32 %v8254_v35, %v2365_v7 }
 0x34d   : > { %4372 = vrot.lane.b32.xlu1 %v7979_v59, %s6277_s7  ;;  %v2367_v54 = vpop.f32.mrf.mxu0 }
 0x34e   : > { %v2418_v51 = vmax.f32 %v2366_v53, 0.0 }
 0x34f   : > { %v2866_v50 = vpop.permute.xlu1 %2865  ;;  %3861 = vrot.lane.b32.xlu0 %v5948_v60, %s6275_s23 }
 0x350   : > { %2940 = vst.msk [vmem:[#allocation4 + $0xa8] sm:$0xf] %vm794_vm7, %v2866_v50 }
 0x351   : > { %3095 = vrot.lane.b32.xlu1 %v5853_v5, %s6271_s11  ;;  %2496 = vst.msk [vmem:[#allocation2 + $0x141] sm:$0xff] %vm2183_vm14, %v2418_v51  ;;  %v2370_v14 = vpop.f32.mrf.mxu0 }
 0x352   : > { %v3998_v36 = vld [vmem:[#allocation2 + $0x138] sm:$0xff] }
 0x353   : > { %4118 = vrot.lane.b32.xlu0 %v7991_v39, %s6276_s6  ;;  %v2372_v6 = vpop.f32.mrf.mxu0  ;;  %v8288_v45 = vpack.c.bf16 %v3998_v36, %v3998_v36 }
 0x355   : > { %3351 = vrot.lane.b32.xlu1 %v7981_v57, %s6272_s12  ;;  %v2373_v29 = vpop.f32.mrf.mxu0  ;;  %2689 = vst.msk [vmem:[#allocation4 + $0xd0] sm:$0xf] %vm278_vm2, %v8288_v45 }
 0x356   : > { %v2374_v8 = vadd.f32 %v8254_v35, %v2373_v29 }
 0x357   : > { %4374 = vrot.lane.b32.xlu0 %v7988_v25, %s6277_s7  ;;  %v3472_v25 = vld [vmem:[#allocation2 + $0x81] sm:$0xff]  ;;  %v2375_v42 = vpop.f32.mrf.mxu0 }
 0x358   : > { %v4510_v57 = vld [vmem:[#allocation2 + $0x13a] sm:$0xff]  ;;  %v4511_v16 = vld [vmem:[#allocation2 + $0x142] sm:$0xff]  ;;  %v5918_v58 = vpack.c.bf16 %v3472_v25, %v3472_v25  ;;  %v2420_v24 = vmax.f32 %v2374_v8, 0.0 }
 0x359   : > { %3607 = vrot.lane.b32.xlu1 %v7979_v59, %s6274_s25  ;;  %v8274_v27 = vpack.c.bf16 %v4510_v57, %v4510_v57  ;;  %v8276_v21 = vpack.c.bf16 %v4511_v16, %v4511_v16  ;;  %v2371_v59 = vadd.f32 %v8254_v35, %v2370_v14  ;;  %v3999_v13 = vld [vmem:[#allocation2 + $0x140] sm:$0xff]  ;;  %v4242_v42 = vld [vmem:[#allocation2 + $0xa9] sm:$0xff] }
 0x35a   : > { %v8290_v52 = vpack.c.bf16 %v3999_v13, %v3999_v13  ;;  %2498 = vst.msk [vmem:[#allocation2 + $0x159] sm:$0xff] %vm2183_vm14, %v2420_v24 }
 0x35b   : > { %v2868_v22 = vpop.permute.xlu0 %2867  ;;  %3097 = vrot.lane.b32.xlu0 %v5948_v60, %s6271_s11  ;;  %4670 = vst.msk [vmem:[#allocation4 + $0xb4] sm:$0xf] %vm278_vm2, %v8274_v27  ;;  %4671 = vst.msk [vmem:[#allocation4 + $0xbc] sm:$0xf] %vm278_vm2, %v8276_v21  ;;  %v2419_v4 = vmax.f32 %v2371_v59, 0.0  ;;  %v3473_v60 = vld [vmem:[#allocation2 + $0x91] sm:$0xff] }
 0x35c   : > { %2941 = vst.msk [vmem:[#allocation4 + $0xb0] sm:$0xf] %vm794_vm7, %v2868_v22  ;;  %v5919_v49 = vpack.c.bf16 %v3473_v60, %v3473_v60 }
 0x35d   : > { %3863 = vrot.lane.b32.xlu1 %v5949_v38, %s6275_s23  ;;  %2497 = vst.msk [vmem:[#allocation2 + $0x151] sm:$0xff] %vm2183_vm14, %v2419_v4 }
 0x35e   : > { %2690 = vst.msk [vmem:[#allocation4 + $0xd8] sm:$0xf] %vm278_vm2, %v8290_v52 }
 0x35f   : > { %v2870_v33 = vpop.permute.xlu1 %2869  ;;  %3353 = vrot.lane.b32.xlu0 %v7991_v39, %s6272_s12  ;;  %v3728_v39 = vld [vmem:[#allocation2 + $0x82] sm:$0xff] }
 0x360   : > { %2942 = vst.msk [vmem:[#allocation4 + $0xb8] sm:$0xf] %vm794_vm7, %v2870_v33  ;;  %v5950_v43 = vpack.c.bf16 %v3728_v39, %v3728_v39 }
 0x361   : > { %4120 = vrot.lane.b32.xlu1 %v8004_v9, %s6276_s6  ;;  %v4513_v26 = vld [vmem:[#allocation2 + $0x15a] sm:$0xff] }
 0x362   : > { %v8314_v22 = vpack.c.bf16 %v4513_v26, %v4513_v26 }
 0x363   : > { %v3080_v19 = vpop.permute.xlu1 %3079  ;;  %3609 = vrot.lane.b32.xlu0 %v5918_v58, %s6274_s25 }
 0x364   : > { %3175 = vst.msk [vmem:[#allocation4] sm:$0xf] %vm1086_vm8, %v3080_v19  ;;  %v4512_v3 = vld [vmem:[#allocation2 + $0x152] sm:$0xff] }
 0x365   : > { %4376 = vrot.lane.b32.xlu1 %v8002_v44, %s6277_s7  ;;  %v4241_v44 = vld [vmem:[#allocation2 + $0x99] sm:$0xff]  ;;  %v8312_v34 = vpack.c.bf16 %v4512_v3, %v4512_v3  ;;  %v4000_v14 = vld [vmem:[#allocation2 + $0x150] sm:$0xff]  ;;  %4673 = vst.msk [vmem:[#allocation4 + $0xcc] sm:$0xf] %vm278_vm2, %v8314_v22 }
 0x366   : > { %v6014_v51 = vpack.c.bf16 %v4241_v44, %v4241_v44  ;;  %v4001_v16 = vld [vmem:[#allocation2 + $0x158] sm:$0xff]  ;;  %v8327_v25 = vpack.c.bf16 %v4000_v14, %v4000_v14 }
 0x367   : > { %v3336_v18 = vpop.permute.xlu1 %3335  ;;  %3865 = vrot.lane.b32.xlu0 %v5950_v43, %s6275_s23  ;;  %4672 = vst.msk [vmem:[#allocation4 + $0xc4] sm:$0xf] %vm278_vm2, %v8312_v34  ;;  %v8325_v59 = vpack.c.bf16 %v4001_v16, %v4001_v16 }
 0x368   : > { %3431 = vst.msk [vmem:[#allocation4] sm:$0xf] %vm1217_vm9, %v3336_v18 }
 0x369   : > { %3099 = vrot.lane.b32.xlu1 %v5949_v38, %s6271_s11  ;;  %v2872_v5 = vpop.permute.xlu0 %2871  ;;  %2692 = vst.msk [vmem:[#allocation4 + $0xe8] sm:$0xf] %vm278_vm2, %v8325_v59  ;;  %2691 = vst.msk [vmem:[#allocation4 + $0xe0] sm:$0xf] %vm278_vm2, %v8327_v25 }
 0x36a   : > { %2943 = vst.msk [vmem:[#allocation4 + $0xc0] sm:$0xf] %vm794_vm7, %v2872_v5 }
 0x36b   : > { %v3592_v50 = vpop.permute.xlu1 %3591  ;;  %4122 = vrot.lane.b32.xlu0 %v8012_v23, %s6276_s6  ;;  %v2378_v7 = vpop.f32.mrf.mxu0 }
 0x36c   : > { %3687 = vst.msk [vmem:[#allocation4] sm:$0xf] %vm1402_vm10, %v3592_v50  ;;  %v2379_v38 = vadd.f32 %v8254_v35, %v2378_v7  ;;  %v6015_v50 = vpack.c.bf16 %v4242_v42, %v4242_v42 }
 0x36d   : > { %3355 = vrot.lane.b32.xlu1 %v8004_v9, %s6272_s12  ;;  %v3082_v54 = vpop.permute.xlu0 %3081  ;;  %v3729_v9 = vld [vmem:[#allocation2 + $0x92] sm:$0xff]  ;;  %v2380_v57 = vpop.f32.mrf.mxu0 }
 0x36e   : > { %3176 = vst.msk [vmem:[#allocation4 + $0x8] sm:$0xf] %vm1086_vm8, %v3082_v54  ;;  %v2421_v33 = vmax.f32 %v2379_v38, 0.0  ;;  %v5951_v4 = vpack.c.bf16 %v3729_v9, %v3729_v9 }
 0x36f   : > { %v3848_v53 = vpop.permute.xlu1 %3847  ;;  %4378 = vrot.lane.b32.xlu0 %v6014_v51, %s6277_s7  ;;  %v2381_v6 = vpop.f32.mrf.mxu0 }
 0x370   : > { %3943 = vst.msk [vmem:[#allocation4] sm:$0xf] %vm1539_vm11, %v3848_v53  ;;  %v2382_v29 = vadd.f32 %v8254_v35, %v2381_v6 }
 0x371   : > { %3611 = vrot.lane.b32.xlu1 %v5919_v49, %s6274_s25  ;;  %v3338_v13 = vpop.permute.xlu0 %3337  ;;  %2499 = vst.msk [vmem:[#allocation2 + $0x169] sm:$0xff] %vm2183_vm14, %v2421_v33  ;;  %v2383_v19 = vpop.f32.mrf.mxu0 }
 0x372   : > { %3432 = vst.msk [vmem:[#allocation4 + $0x8] sm:$0xf] %vm1217_vm9, %v3338_v13  ;;  %v2422_v58 = vmax.f32 %v2382_v29, 0.0  ;;  %v4243_v13 = vld [vmem:[#allocation2 + $0xb1] sm:$0xff] }
 0x373   : > { %v4105_v36 = vpop.permute.xlu1 %4104  ;;  %3101 = vrot.lane.b32.xlu0 %v5950_v43, %s6271_s11  ;;  %v3730_v43 = vld [vmem:[#allocation2 + $0x9a] sm:$0xff] }
 0x374   : > { %4200 = vst.msk [vmem:[#allocation4] sm:$0xf] %vm1670_vm12, %v4105_v36  ;;  %v5952_v26 = vpack.c.bf16 %v3730_v43, %v3730_v43 }
 0x375   : > { %3867 = vrot.lane.b32.xlu1 %v5951_v4, %s6275_s23  ;;  %v3594_v39 = vpop.permute.xlu0 %3593  ;;  %2500 = vst.msk [vmem:[#allocation2 + $0x171] sm:$0xff] %vm2183_vm14, %v2422_v58  ;;  %v6016_v58 = vpack.c.bf16 %v4243_v13, %v4243_v13 }
 0x376   : > { %3688 = vst.msk [vmem:[#allocation4 + $0x8] sm:$0xf] %vm1402_vm10, %v3594_v39 }
 0x377   : > { %v4361_v8 = vpop.permute.xlu1 %4360  ;;  %3357 = vrot.lane.b32.xlu0 %v8012_v23, %s6272_s12 }
 0x378   : > { %4456 = vst.msk [vmem:[#allocation4] sm:$0xf] %vm1823_vm13, %v4361_v8  ;;  %v4002_v9 = vld [vmem:[#allocation2 + $0x168] sm:$0xff] }
 0x379   : > { %4124 = vrot.lane.b32.xlu1 %v8022_v11, %s6276_s6  ;;  %v3850_v18 = vpop.permute.xlu0 %3849  ;;  %v8365_v16 = vpack.c.bf16 %v4002_v9, %v4002_v9  ;;  %v3731_v8 = vld [vmem:[#allocation2 + $0xaa] sm:$0xff] }
 0x37a   : > { %3944 = vst.msk [vmem:[#allocation4 + $0x8] sm:$0xf] %vm1539_vm11, %v3850_v18  ;;  %v5953_v42 = vpack.c.bf16 %v3731_v8, %v3731_v8  ;;  %v6175_v18 = vld [vmem:[#allocation4 + $0x4] ss:$8 sps:$4 sm:$0xff]  }
 0x37b   : > { %v3084_v24 = vpop.permute.xlu1 %3083  ;;  %3613 = vrot.lane.b32.xlu0 %v6014_v51, %s6274_s25  ;;  %v2386_v44 = vpop.f32.mrf.mxu0  ;;  %2693 = vst.msk [vmem:[#allocation4 + $0xf0] sm:$0xf] %vm278_vm2, %v8365_v16  ;;  %5760 = vmatprep.mubr.msk.bf16.mxu1 %vm2183_vm14, %v6175_v18  ;;  %v4246_v18 = vld [vmem:[#allocation2 + $0xd9] sm:$0xff] }
 0x37c   : > { %3177 = vst.msk [vmem:[#allocation4 + $0x10] sm:$0xf] %vm1086_vm8, %v3084_v24  ;;  %v4514_v5 = vld [vmem:[#allocation2 + $0x16a] sm:$0xff]  ;;  %v4515_v60 = vld [vmem:[#allocation2 + $0x172] sm:$0xff]  ;;  %v2387_v53 = vadd.f32 %v8254_v35, %v2386_v44 }
 0x37d   : > { %4380 = vrot.lane.b32.xlu1 %v6015_v50, %s6277_s7  ;;  %v4107_v3 = vpop.permute.xlu0 %4106  ;;  %v8350_v7 = vpack.c.bf16 %v4514_v5, %v4514_v5  ;;  %v8352_v23 = vpack.c.bf16 %v4515_v60, %v4515_v60  ;;  %v2388_v54 = vpop.f32.mrf.mxu0  ;;  %v4003_v38 = vld [vmem:[#allocation2 + $0x170] sm:$0xff] }
 0x37e   : > { %4201 = vst.msk [vmem:[#allocation4 + $0x8] sm:$0xf] %vm1670_vm12, %v4107_v3  ;;  %v2423_v51 = vmax.f32 %v2387_v53, 0.0  ;;  %v8363_v57 = vpack.c.bf16 %v4003_v38, %v4003_v38  ;;  %v4244_v3 = vld [vmem:[#allocation2 + $0xc1] sm:$0xff]  ;;  %v3732_v38 = vld [vmem:[#allocation2 + $0xb2] sm:$0xff] }
 0x37f   : > { %v3340_v49 = vpop.permute.xlu1 %3339  ;;  %3869 = vrot.lane.b32.xlu0 %v5952_v26, %s6275_s23  ;;  %4674 = vst.msk [vmem:[#allocation4 + $0xd4] sm:$0xf] %vm278_vm2, %v8350_v7  ;;  %4675 = vst.msk [vmem:[#allocation4 + $0xdc] sm:$0xf] %vm278_vm2, %v8352_v23  ;;  %v2389_v14 = vpop.f32.mrf.mxu0  ;;  %v6017_v54 = vpack.c.bf16 %v4244_v3, %v4244_v3 }
 0x380   : > { %3433 = vst.msk [vmem:[#allocation4 + $0x10] sm:$0xf] %vm1217_vm9, %v3340_v49  ;;  %v2390_v36 = vadd.f32 %v8254_v35, %v2389_v14 }
 0x381   : > { %3103 = vrot.lane.b32.xlu1 %v5951_v4, %s6271_s11  ;;  %v4363_v6 = vpop.permute.xlu0 %4362  ;;  %2501 = vst.msk [vmem:[#allocation2 + $0x181] sm:$0xff] %vm2183_vm14, %v2423_v51  ;;  %v2391_v4 = vpop.f32.mrf.mxu0  ;;  %v5954_v51 = vpack.c.bf16 %v3732_v38, %v3732_v38  ;;  %v4247_v38 = vld [vmem:[#allocation2 + $0xe1] sm:$0xff] }
 0x382   : > { %2694 = vst.msk [vmem:[#allocation4 + $0xf8] sm:$0xf] %vm278_vm2, %v8363_v57  ;;  %v2424_v29 = vmax.f32 %v2390_v36, 0.0 }
 0x383   : > { %v3596_v33 = vpop.permute.xlu1 %3595  ;;  %4457 = vst.msk [vmem:[#allocation4 + $0x8] sm:$0xf] %vm1823_vm13, %v4363_v6  ;;  %4126 = vrot.lane.b32.xlu0 %v8029_v37, %s6276_s6  ;;  %v4245_v6 = vld [vmem:[#allocation2 + $0xc9] sm:$0xff] }
 0x384   : > { %3689 = vst.msk [vmem:[#allocation4 + $0x10] sm:$0xf] %vm1402_vm10, %v3596_v33  ;;  %v6018_v4 = vpack.c.bf16 %v4245_v6, %v4245_v6 }
 0x385   : > { %3359 = vrot.lane.b32.xlu1 %v8022_v11, %s6272_s12  ;;  %v3086_v19 = vpop.permute.xlu0 %3085  ;;  %2502 = vst.msk [vmem:[#allocation2 + $0x189] sm:$0xff] %vm2183_vm14, %v2424_v29  ;;  %v3733_v29 = vld [vmem:[#allocation2 + $0xc2] sm:$0xff] }
 0x386   : > { %3178 = vst.msk [vmem:[#allocation4 + $0x18] sm:$0xf] %vm1086_vm8, %v3086_v19 }
 0x387   : > { %v3852_v35 = vpop.permute.xlu1 %3851  ;;  %4382 = vrot.lane.b32.xlu0 %v6016_v58, %s6277_s7 }
 0x388   : > { %3945 = vst.msk [vmem:[#allocation4 + $0x10] sm:$0xf] %vm1539_vm11, %v3852_v35 }
 0x389   : > { %3615 = vrot.lane.b32.xlu1 %v6015_v50, %s6274_s25  ;;  %v3342_v11 = vpop.permute.xlu0 %3341 }
 0x38a   : > { %v6173_v24 = vld [vmem:[#allocation4] ss:$8 sps:$4 sm:$0xff]   ;;  %3434 = vst.msk [vmem:[#allocation4 + $0x18] sm:$0xf] %vm1217_vm9, %v3342_v11 }
 0x38b   : > { %v4109_v39 = vpop.permute.xlu1 %4108  ;;  %3105 = vrot.lane.b32.xlu0 %v5952_v26, %s6271_s11  ;;  %5016 = vmatmul.mubr.bf16.vlgmr.msra.gmra.mxu1 %v6173_v24 }
 0x38c   : > { %4202 = vst.msk [vmem:[#allocation4 + $0x10] sm:$0xf] %vm1670_vm12, %v4109_v39  ;;  %v4516_v43 = vld [vmem:[#allocation2 + $0x182] sm:$0xff]  ;;  %v4517_v5 = vld [vmem:[#allocation2 + $0x18a] sm:$0xff] }
 0x38d   : > { %3871 = vrot.lane.b32.xlu1 %v5953_v42, %s6275_s23  ;;  %v3598_v60 = vpop.permute.xlu0 %3597  ;;  %v8389_v44 = vpack.c.bf16 %v4516_v43, %v4516_v43  ;;  %v8391_v49 = vpack.c.bf16 %v4517_v5, %v4517_v5  ;;  %v6176_v39 = vld [vmem:[#allocation4 + $0x14] ss:$8 sps:$4 sm:$0xff]  }
 0x38e   : > { %3690 = vst.msk [vmem:[#allocation4 + $0x18] sm:$0xf] %vm1402_vm10, %v3598_v60  ;;  %5761 = vmatprep.mubr.msk.bf16.mxu1 %vm2183_vm14, %v6176_v39  ;;  %v3734_v60 = vld [vmem:[#allocation2 + $0xca] sm:$0xff] }
 0x38f   : > { %v4365_v50 = vpop.permute.xlu1 %4364  ;;  %3361 = vrot.lane.b32.xlu0 %v8029_v37, %s6272_s12  ;;  %4676 = vst.msk [vmem:[#allocation4 + $0xe4] sm:$0xf] %vm278_vm2, %v8389_v44  ;;  %4677 = vst.msk [vmem:[#allocation4 + $0xec] sm:$0xf] %vm278_vm2, %v8391_v49 }
 0x390   : > { %4458 = vst.msk [vmem:[#allocation4 + $0x10] sm:$0xf] %vm1823_vm13, %v4365_v50  ;;  %v6019_v50 = vpack.c.bf16 %v4246_v18, %v4246_v18 }
 0x391   : > { %4128 = vrot.lane.b32.xlu1 %v8039_v47, %s6276_s6  ;;  %v3854_v53 = vpop.permute.xlu0 %3853 }
 0x392   : > { %3946 = vst.msk [vmem:[#allocation4 + $0x18] sm:$0xf] %vm1539_vm11, %v3854_v53  ;;  %v5956_v53 = vpack.c.bf16 %v3734_v60, %v3734_v60 }
 0x393   : > { %v3088_v26 = vpop.permute.xlu1 %3087  ;;  %3617 = vrot.lane.b32.xlu0 %v6016_v58, %s6274_s25  ;;  %v5955_v58 = vpack.c.bf16 %v3733_v29, %v3733_v29 }
 0x394   : > { %3179 = vst.msk [vmem:[#allocation4 + $0x20] sm:$0xf] %vm1086_vm8, %v3088_v26 }
 0x395   : > { %4384 = vrot.lane.b32.xlu1 %v6017_v54, %s6277_s7  ;;  %v4111_v37 = vpop.permute.xlu0 %4110 }
 0x396   : > { %4203 = vst.msk [vmem:[#allocation4 + $0x18] sm:$0xf] %vm1670_vm12, %v4111_v37 }
 0x397   : > { %v3344_v9 = vpop.permute.xlu1 %3343  ;;  %3873 = vrot.lane.b32.xlu0 %v5954_v51, %s6275_s23  ;;  %v4682_v8 = vld [vmem:[#allocation4 + $0x10] sm:$0xff] }
 0x398   : > { %3435 = vst.msk [vmem:[#allocation4 + $0x20] sm:$0xf] %vm1217_vm9, %v3344_v9 }
 0x399   : > { %3107 = vrot.lane.b32.xlu1 %v5953_v42, %s6271_s11  ;;  %v4367_v33 = vpop.permute.xlu0 %4366 }
 0x39a   : > { %4459 = vst.msk [vmem:[#allocation4 + $0x18] sm:$0xf] %vm1823_vm13, %v4367_v33 }
 0x39b   : > { %v3600_v14 = vpop.permute.xlu1 %3599  ;;  %4130 = vrot.lane.b32.xlu0 %v8046_v28, %s6276_s6 }
 0x39c   : > { %3691 = vst.msk [vmem:[#allocation4 + $0x20] sm:$0xf] %vm1402_vm10, %v3600_v14  ;;  %v3735_v14 = vld [vmem:[#allocation2 + $0xda] sm:$0xff] }
 0x39d   : > { %3363 = vrot.lane.b32.xlu1 %v8039_v47, %s6272_s12  ;;  %v3090_v13 = vpop.permute.xlu0 %3089 }
 0x39e   : > { %3180 = vst.msk [vmem:[#allocation4 + $0x28] sm:$0xf] %vm1086_vm8, %v3090_v13 }
 0x39f   : > { %v3856_v36 = vpop.permute.xlu1 %3855  ;;  %4386 = vrot.lane.b32.xlu0 %v6018_v4, %s6277_s7 }
 0x3a0   : > { %3947 = vst.msk [vmem:[#allocation4 + $0x20] sm:$0xf] %vm1539_vm11, %v3856_v36  ;;  %v5957_v36 = vpack.c.bf16 %v3735_v14, %v3735_v14 }
 0x3a1   : > { %3619 = vrot.lane.b32.xlu1 %v6017_v54, %s6274_s25  ;;  %v3346_v19 = vpop.permute.xlu0 %3345  ;;  %v4683_v47 = vld [vmem:[#allocation4 + $0x18] sm:$0xff] }
 0x3a2   : > { %3436 = vst.msk [vmem:[#allocation4 + $0x28] sm:$0xf] %vm1217_vm9, %v3346_v19  ;;  %v5721_v11 = vcombine.low %v4682_v8, %v4683_v47 }
 0x3a3   : > { %v4113_v35 = vpop.permute.xlu1 %4112  ;;  %3109 = vrot.lane.b32.xlu0 %v5954_v51, %s6271_s11  ;;  %v6020_v51 = vpack.c.bf16 %v4247_v38, %v4247_v38 }
 0x3a4   : > { %4204 = vst.msk [vmem:[#allocation4 + $0x20] sm:$0xf] %vm1670_vm12, %v4113_v35  ;;  %5024 = vmatmul.mubr.bf16.gmra.mxu1 %v5721_v11  ;;  %v3736_v11 = vld [vmem:[#allocation2 + $0xe2] sm:$0xff] }
 0x3a5   : > { %3875 = vrot.lane.b32.xlu1 %v5955_v58, %s6275_s23  ;;  %v3602_v24 = vpop.permute.xlu0 %3601  ;;  %v5958_v18 = vpack.c.bf16 %v3736_v11, %v3736_v11  ;;  %v3739_v11 = vld [vmem:[#allocation2 + $0x10a] sm:$0xff] }
 0x3a6   : > { %3692 = vst.msk [vmem:[#allocation4 + $0x28] sm:$0xf] %vm1402_vm10, %v3602_v24 }
 0x3a7   : > { %v4369_v42 = vpop.permute.xlu1 %4368  ;;  %3365 = vrot.lane.b32.xlu0 %v8046_v28, %s6272_s12 }
 0x3a8   : > { %4460 = vst.msk [vmem:[#allocation4 + $0x20] sm:$0xf] %vm1823_vm13, %v4369_v42 }
 0x3a9   : > { %4132 = vrot.lane.b32.xlu1 %v8056_v55, %s6276_s6  ;;  %v3858_v5 = vpop.permute.xlu0 %3857 }
 0x3aa   : > { %3948 = vst.msk [vmem:[#allocation4 + $0x28] sm:$0xf] %vm1539_vm11, %v3858_v5  ;;  %v4249_v5 = vld [vmem:[#allocation2 + $0xf9] sm:$0xff] }
 0x3ab   : > { %v3092_v43 = vpop.permute.xlu1 %3091  ;;  %3621 = vrot.lane.b32.xlu0 %v6018_v4, %s6274_s25  ;;  %v6178_v4 = vld [vmem:[#allocation4 + $0x24] ss:$8 sps:$4 sm:$0xff]  }
 0x3ac   : > { %3181 = vst.msk [vmem:[#allocation4 + $0x30] sm:$0xf] %vm1086_vm8, %v3092_v43  ;;  %5762 = vmatprep.mubr.msk.bf16.mxu1 %vm2183_vm14, %v6178_v4 }
 0x3ad   : > { %4388 = vrot.lane.b32.xlu1 %v6019_v50, %s6277_s7  ;;  %v4115_v26 = vpop.permute.xlu0 %4114 }
 0x3ae   : > { %4205 = vst.msk [vmem:[#allocation4 + $0x28] sm:$0xf] %vm1670_vm12, %v4115_v26  ;;  %v3737_v26 = vld [vmem:[#allocation2 + $0xf2] sm:$0xff] }
 0x3af   : > { %v3348_v3 = vpop.permute.xlu1 %3347  ;;  %3877 = vrot.lane.b32.xlu0 %v5956_v53, %s6275_s23  ;;  %v4684_v13 = vld [vmem:[#allocation4 + $0x20] sm:$0xff] }
 0x3b0   : > { %3437 = vst.msk [vmem:[#allocation4 + $0x30] sm:$0xf] %vm1217_vm9, %v3348_v3  ;;  %v6022_v3 = vpack.c.bf16 %v4249_v5, %v4249_v5 }
 0x3b1   : > { %3111 = vrot.lane.b32.xlu1 %v5955_v58, %s6271_s11  ;;  %v4371_v54 = vpop.permute.xlu0 %4370  ;;  %v4248_v58 = vld [vmem:[#allocation2 + $0xf1] sm:$0xff] }
 0x3b2   : > { %4461 = vst.msk [vmem:[#allocation4 + $0x28] sm:$0xf] %vm1823_vm13, %v4371_v54  ;;  %v6021_v39 = vpack.c.bf16 %v4248_v58, %v4248_v58  ;;  %v5959_v54 = vpack.c.bf16 %v3737_v26, %v3737_v26  ;;  %v4251_v58 = vld [vmem:[#allocation2 + $0x111] sm:$0xff] }
 0x3b3   : > { %v3604_v28 = vpop.permute.xlu1 %3603  ;;  %4134 = vrot.lane.b32.xlu0 %v8063_v15, %s6276_s6 }
 0x3b4   : > { %3693 = vst.msk [vmem:[#allocation4 + $0x30] sm:$0xf] %vm1402_vm10, %v3604_v28 }
 0x3b5   : > { %3367 = vrot.lane.b32.xlu1 %v8056_v55, %s6272_s12  ;;  %v3094_v37 = vpop.permute.xlu0 %3093 }
 0x3b6   : > { %3182 = vst.msk [vmem:[#allocation4 + $0x38] sm:$0xf] %vm1086_vm8, %v3094_v37 }
 0x3b7   : > { %v3860_v9 = vpop.permute.xlu1 %3859  ;;  %4390 = vrot.lane.b32.xlu0 %v6020_v51, %s6277_s7 }
 0x3b8   : > { %3949 = vst.msk [vmem:[#allocation4 + $0x30] sm:$0xf] %vm1539_vm11, %v3860_v9  ;;  %v6180_v9 = vld [vmem:[#allocation4 + $0x34] ss:$8 sps:$4 sm:$0xff]  }
 0x3b9   : > { %3623 = vrot.lane.b32.xlu1 %v6019_v50, %s6274_s25  ;;  %v3350_v6 = vpop.permute.xlu0 %3349  ;;  %v4685_v55 = vld [vmem:[#allocation4 + $0x28] sm:$0xff] }
 0x3ba   : > { %3438 = vst.msk [vmem:[#allocation4 + $0x38] sm:$0xf] %vm1217_vm9, %v3350_v6  ;;  %v5723_v29 = vcombine.low %v4684_v13, %v4685_v55  ;;  %v3738_v55 = vld [vmem:[#allocation2 + $0xfa] sm:$0xff] }
 0x3bb   : > { %v4117_v33 = vpop.permute.xlu1 %4116  ;;  %3113 = vrot.lane.b32.xlu0 %v5956_v53, %s6271_s11 }
 0x3bc   : > { %4206 = vst.msk [vmem:[#allocation4 + $0x30] sm:$0xf] %vm1670_vm12, %v4117_v33  ;;  %5032 = vmatmul.mubr.bf16.gmra.mxu1 %v5723_v29  ;;  %v4250_v33 = vld [vmem:[#allocation2 + $0x109] sm:$0xff] }
 0x3bd   : > { %3879 = vrot.lane.b32.xlu1 %v5957_v36, %s6275_s23  ;;  %v3606_v19 = vpop.permute.xlu0 %3605  ;;  %5763 = vmatprep.mubr.msk.bf16.mxu1 %vm2183_vm14, %v6180_v9  ;;  %v6023_v13 = vpack.c.bf16 %v4250_v33, %v4250_v33 }
 0x3be   : > { %3694 = vst.msk [vmem:[#allocation4 + $0x38] sm:$0xf] %vm1402_vm10, %v3606_v19 }
 0x3bf   : > { %v4373_v35 = vpop.permute.xlu1 %4372  ;;  %3369 = vrot.lane.b32.xlu0 %v8063_v15, %s6272_s12 }
 0x3c0   : > { %4462 = vst.msk [vmem:[#allocation4 + $0x30] sm:$0xf] %vm1823_vm13, %v4373_v35  ;;  %v5960_v35 = vpack.c.bf16 %v3738_v55, %v3738_v55 }
 0x3c1   : > { %4136 = vrot.lane.b32.xlu1 %v8074_v48, %s6276_s6  ;;  %v3862_v47 = vpop.permute.xlu0 %3861 }
 0x3c2   : > { %3950 = vst.msk [vmem:[#allocation4 + $0x38] sm:$0xf] %vm1539_vm11, %v3862_v47 }
 0x3c3   : > { %v3096_v8 = vpop.permute.xlu1 %3095  ;;  %3625 = vrot.lane.b32.xlu0 %v6020_v51, %s6274_s25 }
 0x3c4   : > { %3183 = vst.msk [vmem:[#allocation4 + $0x40] sm:$0xf] %vm1086_vm8, %v3096_v8 }
 0x3c5   : > { %4392 = vrot.lane.b32.xlu1 %v6021_v39, %s6277_s7  ;;  %v4119_v24 = vpop.permute.xlu0 %4118 }
 0x3c6   : > { %4207 = vst.msk [vmem:[#allocation4 + $0x38] sm:$0xf] %vm1670_vm12, %v4119_v24 }
 0x3c7   : > { %v3352_v42 = vpop.permute.xlu1 %3351  ;;  %3881 = vrot.lane.b32.xlu0 %v5958_v18, %s6275_s23  ;;  %v4686_v38 = vld [vmem:[#allocation4 + $0x30] sm:$0xff] }
 0x3c8   : > { %3439 = vst.msk [vmem:[#allocation4 + $0x40] sm:$0xf] %vm1217_vm9, %v3352_v42 }
 0x3c9   : > { %3115 = vrot.lane.b32.xlu1 %v5957_v36, %s6271_s11  ;;  %v4375_v43 = vpop.permute.xlu0 %4374 }
 0x3ca   : > { %4463 = vst.msk [vmem:[#allocation4 + $0x38] sm:$0xf] %vm1823_vm13, %v4375_v43  ;;  %v6182_v43 = vld [vmem:[#allocation4 + $0x44] ss:$8 sps:$4 sm:$0xff]  }
 0x3cb   : > { %v3608_v15 = vpop.permute.xlu1 %3607  ;;  %4138 = vrot.lane.b32.xlu0 %v8082_v12, %s6276_s6 }
 0x3cc   : > { %3695 = vst.msk [vmem:[#allocation4 + $0x40] sm:$0xf] %vm1402_vm10, %v3608_v15 }
 0x3cd   : > { %3371 = vrot.lane.b32.xlu1 %v8074_v48, %s6272_s12  ;;  %v3098_v60 = vpop.permute.xlu0 %3097 }
 0x3ce   : > { %3184 = vst.msk [vmem:[#allocation4 + $0x48] sm:$0xf] %vm1086_vm8, %v3098_v60 }
 0x3cf   : > { %v3864_v50 = vpop.permute.xlu1 %3863  ;;  %4394 = vrot.lane.b32.xlu0 %v6022_v3, %s6277_s7 }
 0x3d0   : > { %3951 = vst.msk [vmem:[#allocation4 + $0x40] sm:$0xf] %vm1539_vm11, %v3864_v50 }
 0x3d1   : > { %3627 = vrot.lane.b32.xlu1 %v6021_v39, %s6274_s25  ;;  %v3354_v28 = vpop.permute.xlu0 %3353  ;;  %v4687_v48 = vld [vmem:[#allocation4 + $0x38] sm:$0xff]  ;;  %v6024_v39 = vpack.c.bf16 %v4251_v58, %v4251_v58 }
 0x3d2   : > { %3440 = vst.msk [vmem:[#allocation4 + $0x48] sm:$0xf] %vm1217_vm9, %v3354_v28  ;;  %v5725_v37 = vcombine.low %v4686_v38, %v4687_v48 }
 0x3d3   : > { %v4121_v53 = vpop.permute.xlu1 %4120  ;;  %3117 = vrot.lane.b32.xlu0 %v5958_v18, %s6271_s11  ;;  %v5961_v18 = vpack.c.bf16 %v3739_v11, %v3739_v11 }
 0x3d4   : > { %4208 = vst.msk [vmem:[#allocation4 + $0x40] sm:$0xf] %vm1670_vm12, %v4121_v53  ;;  %5040 = vmatmul.mubr.bf16.gmra.mxu1 %v5725_v37 }
 0x3d5   : > { %3883 = vrot.lane.b32.xlu1 %v5959_v54, %s6275_s23  ;;  %v3610_v14 = vpop.permute.xlu0 %3609  ;;  %5764 = vmatprep.mubr.msk.bf16.mxu1 %vm2183_vm14, %v6182_v43  ;;  %v4255_v43 = vld [vmem:[#allocation2 + $0x141] sm:$0xff] }
 0x3d6   : > { %3696 = vst.msk [vmem:[#allocation4 + $0x48] sm:$0xf] %vm1402_vm10, %v3610_v14 }
 0x3d7   : > { %v4377_v51 = vpop.permute.xlu1 %4376  ;;  %3373 = vrot.lane.b32.xlu0 %v8082_v12, %s6272_s12 }
 0x3d8   : > { %4464 = vst.msk [vmem:[#allocation4 + $0x40] sm:$0xf] %vm1823_vm13, %v4377_v51  ;;  %v4253_v51 = vld [vmem:[#allocation2 + $0x129] sm:$0xff] }
 0x3d9   : > { %4140 = vrot.lane.b32.xlu1 %v8093_v31, %s6276_s6  ;;  %v3866_v36 = vpop.permute.xlu0 %3865 }
 0x3da   : > { %3952 = vst.msk [vmem:[#allocation4 + $0x48] sm:$0xf] %vm1539_vm11, %v3866_v36  ;;  %v3741_v36 = vld [vmem:[#allocation2 + $0x122] sm:$0xff] }
 0x3db   : > { %v3100_v6 = vpop.permute.xlu1 %3099  ;;  %3629 = vrot.lane.b32.xlu0 %v6022_v3, %s6274_s25  ;;  %v4252_v3 = vld [vmem:[#allocation2 + $0x121] sm:$0xff] }
 0x3dc   : > { %3185 = vst.msk [vmem:[#allocation4 + $0x50] sm:$0xf] %vm1086_vm8, %v3100_v6  ;;  %v6025_v28 = vpack.c.bf16 %v4252_v3, %v4252_v3  ;;  %v6026_v6 = vpack.c.bf16 %v4253_v51, %v4253_v51 }
 0x3dd   : > { %4396 = vrot.lane.b32.xlu1 %v6023_v13, %s6277_s7  ;;  %v4123_v29 = vpop.permute.xlu0 %4122 }
 0x3de   : > { %4209 = vst.msk [vmem:[#allocation4 + $0x48] sm:$0xf] %vm1670_vm12, %v4123_v29 }
 0x3df   : > { %v3356_v4 = vpop.permute.xlu1 %3355  ;;  %3885 = vrot.lane.b32.xlu0 %v5960_v35, %s6275_s23  ;;  %v4688_v15 = vld [vmem:[#allocation4 + $0x40] sm:$0xff] }
 0x3e0   : > { %3441 = vst.msk [vmem:[#allocation4 + $0x50] sm:$0xf] %vm1217_vm9, %v3356_v4  ;;  %v5963_v4 = vpack.c.bf16 %v3741_v36, %v3741_v36  ;;  %v4256_v36 = vld [vmem:[#allocation2 + $0x151] sm:$0xff] }
 0x3e1   : > { %3119 = vrot.lane.b32.xlu1 %v5959_v54, %s6271_s11  ;;  %v4379_v19 = vpop.permute.xlu0 %4378  ;;  %v3740_v54 = vld [vmem:[#allocation2 + $0x112] sm:$0xff] }
 0x3e2   : > { %4465 = vst.msk [vmem:[#allocation4 + $0x48] sm:$0xf] %vm1823_vm13, %v4379_v19  ;;  %v5962_v9 = vpack.c.bf16 %v3740_v54, %v3740_v54  ;;  %v6186_v54 = vld [vmem:[#allocation4 + $0x64] ss:$8 sps:$4 sm:$0xff]  }
 0x3e3   : > { %v3612_v12 = vpop.permute.xlu1 %3611  ;;  %4142 = vrot.lane.b32.xlu0 %v8103_v63, %s6276_s6 }
 0x3e4   : > { %3697 = vst.msk [vmem:[#allocation4 + $0x50] sm:$0xf] %vm1402_vm10, %v3612_v12 }
 0x3e5   : > { %3375 = vrot.lane.b32.xlu1 %v8093_v31, %s6272_s12  ;;  %v3102_v47 = vpop.permute.xlu0 %3101 }
 0x3e6   : > { %3186 = vst.msk [vmem:[#allocation4 + $0x58] sm:$0xf] %vm1086_vm8, %v3102_v47 }
 0x3e7   : > { %v3868_v8 = vpop.permute.xlu1 %3867  ;;  %4398 = vrot.lane.b32.xlu0 %v6024_v39, %s6277_s7 }
 0x3e8   : > { %3953 = vst.msk [vmem:[#allocation4 + $0x50] sm:$0xf] %vm1539_vm11, %v3868_v8  ;;  %v4254_v8 = vld [vmem:[#allocation2 + $0x139] sm:$0xff] }
 0x3e9   : > { %3631 = vrot.lane.b32.xlu1 %v6023_v13, %s6274_s25  ;;  %v3358_v24 = vpop.permute.xlu0 %3357  ;;  %v4689_v31 = vld [vmem:[#allocation4 + $0x48] sm:$0xff]  ;;  %v8548_v11 = vpack.c.bf16 %v4254_v8, %v4254_v8 }
 0x3ea   : > { %3442 = vst.msk [vmem:[#allocation4 + $0x58] sm:$0xf] %vm1217_vm9, %v3358_v24  ;;  %v5727_v5 = vcombine.low %v4688_v15, %v4689_v31 }
 0x3eb   : > { %v4125_v42 = vpop.permute.xlu1 %4124  ;;  %3121 = vrot.lane.b32.xlu0 %v5960_v35, %s6271_s11  ;;  %v6184_v35 = vld [vmem:[#allocation4 + $0x54] ss:$8 sps:$4 sm:$0xff]  }
 0x3ec   : > { %4210 = vst.msk [vmem:[#allocation4 + $0x50] sm:$0xf] %vm1670_vm12, %v4125_v42  ;;  %5048 = vmatmul.mubr.bf16.gmra.mxu1 %v5727_v5  ;;  %v3742_v42 = vld [vmem:[#allocation2 + $0x12a] sm:$0xff] }
 0x3ed   : > { %3887 = vrot.lane.b32.xlu1 %v5961_v18, %s6275_s23  ;;  %v3614_v60 = vpop.permute.xlu0 %3613  ;;  %5765 = vmatprep.mubr.msk.bf16.mxu1 %vm2183_vm14, %v6184_v35  ;;  %v5964_v15 = vpack.c.bf16 %v3742_v42, %v3742_v42  ;;  %v4259_v42 = vld [vmem:[#allocation2 + $0x171] sm:$0xff] }
 0x3ee   : > { %3698 = vst.msk [vmem:[#allocation4 + $0x58] sm:$0xf] %vm1402_vm10, %v3614_v60  ;;  %v6028_v60 = vpack.c.bf16 %v4255_v43, %v4255_v43 }
 0x3ef   : > { %v4381_v50 = vpop.permute.xlu1 %4380  ;;  %3377 = vrot.lane.b32.xlu0 %v8103_v63, %s6272_s12 }
 0x3f0   : > { %4466 = vst.msk [vmem:[#allocation4 + $0x50] sm:$0xf] %vm1823_vm13, %v4381_v50 }
 0x3f1   : > { %4144 = vrot.lane.b32.xlu1 %v8127_v41, %s6276_s6  ;;  %v3870_v53 = vpop.permute.xlu0 %3869 }
 0x3f2   : > { %3954 = vst.msk [vmem:[#allocation4 + $0x58] sm:$0xf] %vm1539_vm11, %v3870_v53 }
 0x3f3   : > { %v3104_v26 = vpop.permute.xlu1 %3103  ;;  %3633 = vrot.lane.b32.xlu0 %v6024_v39, %s6274_s25 }
 0x3f4   : > { %3187 = vst.msk [vmem:[#allocation4 + $0x60] sm:$0xf] %vm1086_vm8, %v3104_v26 }
 0x3f5   : > { %4400 = vrot.lane.b32.xlu1 %v6025_v28, %s6277_s7  ;;  %v4127_v48 = vpop.permute.xlu0 %4126 }
 0x3f6   : > { %4211 = vst.msk [vmem:[#allocation4 + $0x58] sm:$0xf] %vm1670_vm12, %v4127_v48 }
 0x3f7   : > { %v3360_v38 = vpop.permute.xlu1 %3359  ;;  %3889 = vrot.lane.b32.xlu0 %v5962_v9, %s6275_s23  ;;  %v4690_v29 = vld [vmem:[#allocation4 + $0x50] sm:$0xff] }
 0x3f8   : > { %3443 = vst.msk [vmem:[#allocation4 + $0x60] sm:$0xf] %vm1217_vm9, %v3360_v38 }
 0x3f9   : > { %3123 = vrot.lane.b32.xlu1 %v5961_v18, %s6271_s11  ;;  %v4383_v37 = vpop.permute.xlu0 %4382 }
 0x3fa   : > { %4467 = vst.msk [vmem:[#allocation4 + $0x58] sm:$0xf] %vm1823_vm13, %v4383_v37  ;;  %v4257_v37 = vld [vmem:[#allocation2 + $0x159] sm:$0xff] }
 0x3fb   : > { %v3616_v63 = vpop.permute.xlu1 %3615  ;;  %4146 = vrot.lane.b32.xlu0 %v8141_v32, %s6276_s6 }
 0x3fc   : > { %3699 = vst.msk [vmem:[#allocation4 + $0x60] sm:$0xf] %vm1402_vm10, %v3616_v63 }
 0x3fd   : > { %3379 = vrot.lane.b32.xlu1 %v8127_v41, %s6272_s12  ;;  %v3106_v33 = vpop.permute.xlu0 %3105 }
 0x3fe   : > { %3188 = vst.msk [vmem:[#allocation4 + $0x68] sm:$0xf] %vm1086_vm8, %v3106_v33  ;;  %v6030_v33 = vpack.c.bf16 %v4257_v37, %v4257_v37 }
 0x3ff   : > { %v3872_v14 = vpop.permute.xlu1 %3871  ;;  %4402 = vrot.lane.b32.xlu0 %v6026_v6, %s6277_s7 }
 0x400   : > { %3955 = vst.msk [vmem:[#allocation4 + $0x60] sm:$0xf] %vm1539_vm11, %v3872_v14 }
 0x401   : > { %3635 = vrot.lane.b32.xlu1 %v6025_v28, %s6274_s25  ;;  %v3362_v55 = vpop.permute.xlu0 %3361  ;;  %v4691_v41 = vld [vmem:[#allocation4 + $0x58] sm:$0xff] }
 0x402   : > { %3444 = vst.msk [vmem:[#allocation4 + $0x68] sm:$0xf] %vm1217_vm9, %v3362_v55  ;;  %v5729_v12 = vcombine.low %v4690_v29, %v4691_v41 }
 0x403   : > { %v4129_v13 = vpop.permute.xlu1 %4128  ;;  %3125 = vrot.lane.b32.xlu0 %v5962_v9, %s6271_s11 }
 0x404   : > { %4212 = vst.msk [vmem:[#allocation4 + $0x60] sm:$0xf] %vm1670_vm12, %v4129_v13  ;;  %5056 = vmatmul.mubr.bf16.gmra.mxu1 %v5729_v12 }
 0x405   : > { %3891 = vrot.lane.b32.xlu1 %v5963_v4, %s6275_s23  ;;  %v3618_v58 = vpop.permute.xlu0 %3617  ;;  %5766 = vmatprep.mubr.msk.bf16.mxu1 %vm2183_vm14, %v6186_v54 }
 0x406   : > { %3700 = vst.msk [vmem:[#allocation4 + $0x68] sm:$0xf] %vm1402_vm10, %v3618_v58 }
 0x407   : > { %v4385_v19 = vpop.permute.xlu1 %4384  ;;  %3381 = vrot.lane.b32.xlu0 %v8141_v32, %s6272_s12 }
 0x408   : > { %4468 = vst.msk [vmem:[#allocation4 + $0x60] sm:$0xf] %vm1823_vm13, %v4385_v19  ;;  %v6188_v19 = vld [vmem:[#allocation4 + $0x74] ss:$8 sps:$4 sm:$0xff]  }
 0x409   : > { %4148 = vrot.lane.b32.xlu1 %v8288_v45, %s6276_s6  ;;  %v3874_v39 = vpop.permute.xlu0 %3873 }
 0x40a   : > { %3956 = vst.msk [vmem:[#allocation4 + $0x68] sm:$0xf] %vm1539_vm11, %v3874_v39 }
 0x40b   : > { %v3108_v47 = vpop.permute.xlu1 %3107  ;;  %3637 = vrot.lane.b32.xlu0 %v6026_v6, %s6274_s25 }
 0x40c   : > { %3189 = vst.msk [vmem:[#allocation4 + $0x70] sm:$0xf] %vm1086_vm8, %v3108_v47 }
 0x40d   : > { %4404 = vrot.lane.b32.xlu1 %v8548_v11, %s6277_s7  ;;  %v4131_v18 = vpop.permute.xlu0 %4130 }
 0x40e   : > { %4213 = vst.msk [vmem:[#allocation4 + $0x68] sm:$0xf] %vm1670_vm12, %v4131_v18  ;;  %v8628_v18 = vpack.c.bf16 %v4259_v42, %v4259_v42 }
 0x40f   : > { %v3364_v24 = vpop.permute.xlu1 %3363  ;;  %3893 = vrot.lane.b32.xlu0 %v5964_v15, %s6275_s23  ;;  %v4692_v53 = vld [vmem:[#allocation4 + $0x60] sm:$0xff] }
 0x410   : > { %3445 = vst.msk [vmem:[#allocation4 + $0x70] sm:$0xf] %vm1217_vm9, %v3364_v24 }
 0x411   : > { %2873 = vrot.lane.b32.xlu1 %v6026_v6, %s6270_s10  ;;  %v4387_v31 = vpop.permute.xlu0 %4386 }
 0x412   : > { %4469 = vst.msk [vmem:[#allocation4 + $0x68] sm:$0xf] %vm1823_vm13, %v4387_v31 }
 0x413   : > { %v3620_v32 = vpop.permute.xlu1 %3619  ;;  %4150 = vrot.lane.b32.xlu0 %v8290_v52, %s6276_s6 }
 0x414   : > { %3701 = vst.msk [vmem:[#allocation4 + $0x70] sm:$0xf] %vm1402_vm10, %v3620_v32  ;;  %v4258_v32 = vld [vmem:[#allocation2 + $0x169] sm:$0xff] }
 0x415   : > { %3129 = vrot.lane.b32.xlu1 %v5964_v15, %s6271_s11  ;;  %v3110_v50 = vpop.permute.xlu0 %3109 }
 0x416   : > { %3190 = vst.msk [vmem:[#allocation4 + $0x78] sm:$0xf] %vm1086_vm8, %v3110_v50 }
 0x417   : > { %v3876_v5 = vpop.permute.xlu1 %3875  ;;  %4406 = vrot.lane.b32.xlu0 %v6028_v60, %s6277_s7 }
 0x418   : > { %3957 = vst.msk [vmem:[#allocation4 + $0x70] sm:$0xf] %vm1539_vm11, %v3876_v5  ;;  %v8641_v5 = vpack.c.bf16 %v4258_v32, %v4258_v32 }
 0x419   : > { %3385 = vrot.lane.b32.xlu1 %v8290_v52, %s6272_s12  ;;  %v3366_v26 = vpop.permute.xlu0 %3365  ;;  %v4693_v28 = vld [vmem:[#allocation4 + $0x68] sm:$0xff] }
 0x41a   : > { %3446 = vst.msk [vmem:[#allocation4 + $0x78] sm:$0xf] %vm1217_vm9, %v3366_v26  ;;  %v5731_v38 = vcombine.low %v4692_v53, %v4693_v28  ;;  %v8653_v53 = vld [vmem:[%s8976_s4] ss:$0 sm:$0xff]  ;;  %v9196_v28 = vld [vmem:[#allocation9_spill] sm:$0xff] }
 0x41b   : > { %v4133_v3 = vpop.permute.xlu1 %4132  ;;  %3127 = vrot.lane.b32.xlu0 %v5963_v4, %s6271_s11  ;;  %v8596_v4 = vpack.c.bf16 %v4256_v36, %v4256_v36  ;;  %v5144_v54 = vunpack.c.l.bf16 %v9196_v28 }
 0x41c   : > { %4214 = vst.msk [vmem:[#allocation4 + $0x70] sm:$0xf] %vm1670_vm12, %v4133_v3  ;;  %5064 = vmatmul.mubr.bf16.gmra.mxu1 %v5731_v38  ;;  %v6190_v3 = vld [vmem:[#allocation4 + $0x84] ss:$8 sps:$4 sm:$0xff]  }
 0x41d   : > { %3641 = vrot.lane.b32.xlu1 %v6028_v60, %s6274_s25  ;;  %v3622_v52 = vpop.permute.xlu0 %3621  ;;  %5767 = vmatprep.mubr.msk.bf16.mxu1 %vm2183_vm14, %v6188_v19  ;;  %v4261_v19 = vld [vmem:[#allocation2 + $0x189] sm:$0xff] }
 0x41e   : > { %3702 = vst.msk [vmem:[#allocation4 + $0x78] sm:$0xf] %vm1402_vm10, %v3622_v52 }
 0x41f   : > { %v4389_v48 = vpop.permute.xlu1 %4388  ;;  %3383 = vrot.lane.b32.xlu0 %v8288_v45, %s6272_s12 }
 0x420   : > { %4470 = vst.msk [vmem:[#allocation4 + $0x70] sm:$0xf] %vm1823_vm13, %v4389_v48 }
 0x421   : > { %3897 = vrot.lane.b32.xlu1 %v8276_v21, %s6275_s23  ;;  %v3878_v63 = vpop.permute.xlu0 %3877 }
 0x422   : > { %3958 = vst.msk [vmem:[#allocation4 + $0x78] sm:$0xf] %vm1539_vm11, %v3878_v63  ;;  %v9197_v63 = vld [vmem:[#allocation10_spill] sm:$0xff] }
 0x423   : > { %v3112_v9 = vpop.permute.xlu1 %3111  ;;  %3639 = vrot.lane.b32.xlu0 %v8548_v11, %s6274_s25  ;;  %v5145_v37 = vunpack.c.l.bf16 %v9197_v63  ;;  %v4007_v63 = vld [vmem:[#allocation2 + $0x1a0] sm:$0xff] }
 0x424   : > { %3191 = vst.msk [vmem:[#allocation4 + $0x80] sm:$0xf] %vm1086_vm8, %v3112_v9 }
 0x425   : > { %4154 = vrot.lane.b32.xlu1 %v8325_v59, %s6276_s6  ;;  %v4135_v14 = vpop.permute.xlu0 %4134 }
 0x426   : > { %4215 = vst.msk [vmem:[#allocation4 + $0x78] sm:$0xf] %vm1670_vm12, %v4135_v14 }
 0x427   : > { %v3368_v51 = vpop.permute.xlu1 %3367  ;;  %3895 = vrot.lane.b32.xlu0 %v8274_v27, %s6275_s23  ;;  %v4694_v35 = vld [vmem:[#allocation4 + $0x70] sm:$0xff] }
 0x428   : > { %3447 = vst.msk [vmem:[#allocation4 + $0x80] sm:$0xf] %vm1217_vm9, %v3368_v51 }
 0x429   : > { %4410 = vrot.lane.b32.xlu1 %v6030_v33, %s6277_s7  ;;  %v4391_v6 = vpop.permute.xlu0 %4390 }
 0x42a   : > { %4471 = vst.msk [vmem:[#allocation4 + $0x78] sm:$0xf] %vm1823_vm13, %v4391_v6 }
 0x42b   : > { %v3624_v45 = vpop.permute.xlu1 %3623  ;;  %4152 = vrot.lane.b32.xlu0 %v8327_v25, %s6276_s6 }
 0x42c   : > { %3703 = vst.msk [vmem:[#allocation4 + $0x80] sm:$0xf] %vm1402_vm10, %v3624_v45 }
 0x42d   : > { %2877 = vrot.lane.b32.xlu1 %v6028_v60, %s6270_s10  ;;  %v3114_v55 = vpop.permute.xlu0 %3113 }
 0x42e   : > { %3192 = vst.msk [vmem:[#allocation4 + $0x88] sm:$0xf] %vm1086_vm8, %v3114_v55 }
 0x42f   : > { %v3880_v13 = vpop.permute.xlu1 %3879  ;;  %4408 = vrot.lane.b32.xlu0 %v8596_v4, %s6277_s7 }
 0x430   : > { %3959 = vst.msk [vmem:[#allocation4 + $0x80] sm:$0xf] %vm1539_vm11, %v3880_v13 }
 0x431   : > { %3133 = vrot.lane.b32.xlu1 %v8276_v21, %s6271_s11  ;;  %v3370_v41 = vpop.permute.xlu0 %3369  ;;  %v4695_v12 = vld [vmem:[#allocation4 + $0x78] sm:$0xff] }
 0x432   : > { %3448 = vst.msk [vmem:[#allocation4 + $0x88] sm:$0xf] %vm1217_vm9, %v3370_v41  ;;  %v5733_v58 = vcombine.low %v4694_v35, %v4695_v12  ;;  %v4005_v41 = vld [vmem:[#allocation2 + $0x188] sm:$0xff] }
 0x433   : > { %v4137_v29 = vpop.permute.xlu1 %4136  ;;  %2875 = vrot.lane.b32.xlu0 %v8548_v11, %s6270_s10  ;;  %v6002_v35 = vpack.c.bf16 %v4005_v41, %v4005_v41 }
 0x434   : > { %4216 = vst.msk [vmem:[#allocation4 + $0x80] sm:$0xf] %vm1670_vm12, %v4137_v29  ;;  %5072 = vmatmul.mubr.bf16.gmra.mxu1 %v5733_v58 }
 0x435   : > { %3389 = vrot.lane.b32.xlu1 %v8325_v59, %s6272_s12  ;;  %v3626_v8 = vpop.permute.xlu0 %3625  ;;  %5768 = vmatprep.mubr.msk.bf16.mxu1 %vm2183_vm14, %v6190_v3 }
 0x436   : > { %3704 = vst.msk [vmem:[#allocation4 + $0x88] sm:$0xf] %vm1402_vm10, %v3626_v8  ;;  %v4004_v8 = vld [vmem:[#allocation2 + $0x180] sm:$0xff] }
 0x437   : > { %v4393_v21 = vpop.permute.xlu1 %4392  ;;  %3131 = vrot.lane.b32.xlu0 %v8274_v27, %s6271_s11 }
 0x438   : > { %4472 = vst.msk [vmem:[#allocation4 + $0x80] sm:$0xf] %vm1823_vm13, %v4393_v21  ;;  %v6034_v21 = vpack.c.bf16 %v4261_v19, %v4261_v19  ;;  %v5148_v19 = vunpack.c.l.bf16 %v9154_v2 }
 0x439   : > { %3645 = vrot.lane.b32.xlu1 %v6030_v33, %s6274_s25  ;;  %v3882_v39 = vpop.permute.xlu0 %3881 }
 0x43a   : > { %3960 = vst.msk [vmem:[#allocation4 + $0x88] sm:$0xf] %vm1539_vm11, %v3882_v39  ;;  %v6001_v39 = vpack.c.bf16 %v4004_v8, %v4004_v8 }
 0x43b   : > { %v3116_v47 = vpop.permute.xlu1 %3115  ;;  %3387 = vrot.lane.b32.xlu0 %v8327_v25, %s6272_s12 }
 0x43c   : > { %3193 = vst.msk [vmem:[#allocation4 + $0x90] sm:$0xf] %vm1086_vm8, %v3116_v47 }
 0x43d   : > { %3901 = vrot.lane.b32.xlu1 %v8314_v22, %s6275_s23  ;;  %v4139_v11 = vpop.permute.xlu0 %4138 }
 0x43e   : > { %4217 = vst.msk [vmem:[#allocation4 + $0x88] sm:$0xf] %vm1670_vm12, %v4139_v11 }
 0x43f   : > { %v3372_v59 = vpop.permute.xlu1 %3371  ;;  %3643 = vrot.lane.b32.xlu0 %v8596_v4, %s6274_s25  ;;  %v4696_v50 = vld [vmem:[#allocation4 + $0x80] sm:$0xff] }
 0x440   : > { %3449 = vst.msk [vmem:[#allocation4 + $0x90] sm:$0xf] %vm1217_vm9, %v3372_v59  ;;  %v4260_v59 = vld [vmem:[#allocation2 + $0x181] sm:$0xff] }
 0x441   : > { %4158 = vrot.lane.b32.xlu1 %v8363_v57, %s6276_s6  ;;  %v4395_v24 = vpop.permute.xlu0 %4394 }
 0x442   : > { %4473 = vst.msk [vmem:[#allocation4 + $0x88] sm:$0xf] %vm1823_vm13, %v4395_v24  ;;  %v6192_v24 = vld [vmem:[#allocation4 + $0x94] ss:$8 sps:$4 sm:$0xff]  }
 0x443   : > { %v3628_v27 = vpop.permute.xlu1 %3627  ;;  %3899 = vrot.lane.b32.xlu0 %v8312_v34, %s6275_s23 }
 0x444   : > { %3705 = vst.msk [vmem:[#allocation4 + $0x90] sm:$0xf] %vm1402_vm10, %v3628_v27 }
 0x445   : > { %4414 = vrot.lane.b32.xlu1 %v8628_v18, %s6277_s7  ;;  %v3118_v15 = vpop.permute.xlu0 %3117 }
 0x446   : > { %3194 = vst.msk [vmem:[#allocation4 + $0x98] sm:$0xf] %vm1086_vm8, %v3118_v15  ;;  %v5146_v15 = vunpack.c.l.bf16 %v9152_v40  ;;  %v5147_v40 = vunpack.c.l.bf16 %v9151_v61 }
 0x447   : > { %v3884_v25 = vpop.permute.xlu1 %3883  ;;  %4156 = vrot.lane.b32.xlu0 %v8365_v16, %s6276_s6 }
 0x448   : > { %3961 = vst.msk [vmem:[#allocation4 + $0x90] sm:$0xf] %vm1539_vm11, %v3884_v25 }
 0x449   : > { %2881 = vrot.lane.b32.xlu1 %v6030_v33, %s6270_s10  ;;  %v3374_v43 = vpop.permute.xlu0 %3373  ;;  %v4697_v60 = vld [vmem:[#allocation4 + $0x88] sm:$0xff] }
 0x44a   : > { %3450 = vst.msk [vmem:[#allocation4 + $0x98] sm:$0xf] %vm1217_vm9, %v3374_v43  ;;  %v5735_v26 = vcombine.low %v4696_v50, %v4697_v60  ;;  %v6033_v43 = vpack.c.bf16 %v4260_v59, %v4260_v59 }
 0x44b   : > { %v4141_v31 = vpop.permute.xlu1 %4140  ;;  %4412 = vrot.lane.b32.xlu0 %v8641_v5, %s6277_s7  ;;  %v5017_v48 = vpop.f32.mrf.mxu1 }
 0x44c   : > { %4218 = vst.msk [vmem:[#allocation4 + $0x90] sm:$0xf] %vm1670_vm12, %v4141_v31  ;;  %5080 = vmatmul.mubr.bf16.gmra.mxu1 %v5735_v26 }
 0x44d   : > { %3137 = vrot.lane.b32.xlu1 %v8314_v22, %s6271_s11  ;;  %v5018_v22 = vadd.f32 %v8653_v53, %v5017_v48  ;;  %v3630_v52 = vpop.permute.xlu0 %3629  ;;  %v5019_v9 = vpop.f32.mrf.mxu1  ;;  %5769 = vmatprep.mubr.msk.bf16.mxu1 %vm2183_vm14, %v6192_v24 }
 0x44e   : > { %3706 = vst.msk [vmem:[#allocation4 + $0x98] sm:$0xf] %vm1402_vm10, %v3630_v52 }
 0x44f   : > { %v4397_v38 = vpop.permute.xlu1 %4396  ;;  %2879 = vrot.lane.b32.xlu0 %v8596_v4, %s6270_s10  ;;  %v5176_v51 = vadd.f32 %v5144_v54, %v5018_v22  ;;  %v5020_v33 = vpop.f32.mrf.mxu1 }
 0x450   : > { %4474 = vst.msk [vmem:[#allocation4 + $0x90] sm:$0xf] %vm1823_vm13, %v4397_v38  ;;  %v5021_v6 = vadd.f32 %v8653_v53, %v5020_v33 }
 0x451   : > { %3393 = vrot.lane.b32.xlu1 %v8363_v57, %s6272_s12  ;;  %v5208_v45 = vmax.f32 %v5176_v51, 0.0  ;;  %v3886_v36 = vpop.permute.xlu0 %3885  ;;  %v5022_v57 = vpop.f32.mrf.mxu1  ;;  %v6004_v51 = vpack.c.bf16 %v4007_v63, %v4007_v63 }
 0x452   : > { %3962 = vst.msk [vmem:[#allocation4 + $0x98] sm:$0xf] %vm1539_vm11, %v3886_v36  ;;  %v5177_v13 = vadd.f32 %v5145_v37, %v5021_v6  ;;  %v4519_v6 = vld [vmem:[#allocation2 + $0x1a2] sm:$0xff] }
 0x453   : > { %v3120_v14 = vpop.permute.xlu1 %3119  ;;  %3135 = vrot.lane.b32.xlu0 %v8312_v34, %s6271_s11  ;;  %5240 = vst.msk [vmem:[%s8674_s30] sm:$0xff] %vm2183_vm14, %v5208_v45  ;;  %v4518_v45 = vld [vmem:[#allocation2 + $0x19a] sm:$0xff]  ;;  %v6068_v57 = vpack.c.bf16 %v4519_v6, %v4519_v6 }
 0x454   : > { %3195 = vst.msk [vmem:[#allocation4 + $0xa0] sm:$0xf] %vm1086_vm8, %v3120_v14  ;;  %v5209_v4 = vmax.f32 %v5177_v13, 0.0  ;;  %v4263_v14 = vld [vmem:[#allocation2 + $0x1a1] sm:$0xff]  ;;  %v6067_v36 = vpack.c.bf16 %v4518_v45, %v4518_v45 }
 0x455   : > { %3649 = vrot.lane.b32.xlu1 %v8628_v18, %s6274_s25  ;;  %v4143_v29 = vpop.permute.xlu0 %4142  ;;  %v6036_v13 = vpack.c.bf16 %v4263_v14, %v4263_v14  ;;  %4679 = vst.msk [vmem:[#allocation4 + $0xfc] sm:$0xf] %vm278_vm2, %v6068_v57 }
 0x456   : > { %4219 = vst.msk [vmem:[#allocation4 + $0x98] sm:$0xf] %vm1670_vm12, %v4143_v29 }
 0x457   : > { %v3376_v55 = vpop.permute.xlu1 %3375  ;;  %3391 = vrot.lane.b32.xlu0 %v8365_v16, %s6272_s12  ;;  %5241 = vst.msk [vmem:[%s8674_s30 + $0x8] sm:$0xff] %vm2183_vm14, %v5209_v4  ;;  %v4698_v42 = vld [vmem:[#allocation4 + $0x90] sm:$0xff] }
 0x458   : > { %3451 = vst.msk [vmem:[#allocation4 + $0xa0] sm:$0xf] %vm1217_vm9, %v3376_v55 }
 0x459   : > { %3905 = vrot.lane.b32.xlu1 %v8352_v23, %s6275_s23  ;;  %v4399_v12 = vpop.permute.xlu0 %4398  ;;  %4678 = vst.msk [vmem:[#allocation4 + $0xf4] sm:$0xf] %vm278_vm2, %v6067_v36 }
 0x45a   : > { %4475 = vst.msk [vmem:[#allocation4 + $0x98] sm:$0xf] %vm1823_vm13, %v4399_v12 }
 0x45b   : > { %v3632_v34 = vpop.permute.xlu1 %3631  ;;  %3647 = vrot.lane.b32.xlu0 %v8641_v5, %s6274_s25 }
 0x45c   : > { %3707 = vst.msk [vmem:[#allocation4 + $0xa0] sm:$0xf] %vm1402_vm10, %v3632_v34  ;;  %v6194_v34 = vld [vmem:[#allocation4 + $0xa4] ss:$8 sps:$4 sm:$0xff]  }
 0x45d   : > { %4162 = vrot.lane.b32.xlu1 %v6002_v35, %s6276_s6  ;;  %v3122_v16 = vpop.permute.xlu0 %3121 }
 0x45e   : > { %3196 = vst.msk [vmem:[#allocation4 + $0xa8] sm:$0xf] %vm1086_vm8, %v3122_v16 }
 0x45f   : > { %v3888_v58 = vpop.permute.xlu1 %3887  ;;  %3903 = vrot.lane.b32.xlu0 %v8350_v7, %s6275_s23 }
 0x460   : > { %3963 = vst.msk [vmem:[#allocation4 + $0xa0] sm:$0xf] %vm1539_vm11, %v3888_v58  ;;  %v4262_v58 = vld [vmem:[#allocation2 + $0x199] sm:$0xff] }
 0x461   : > { %4418 = vrot.lane.b32.xlu1 %v6034_v21, %s6277_s7  ;;  %v3378_v11 = vpop.permute.xlu0 %3377  ;;  %v4699_v27 = vld [vmem:[#allocation4 + $0x98] sm:$0xff] }
 0x462   : > { %3452 = vst.msk [vmem:[#allocation4 + $0xa8] sm:$0xf] %vm1217_vm9, %v3378_v11  ;;  %v5737_v25 = vcombine.low %v4698_v42, %v4699_v27  ;;  %v5149_v11 = vunpack.c.l.bf16 %v9153_v56 }
 0x463   : > { %v4145_v47 = vpop.permute.xlu1 %4144  ;;  %4160 = vrot.lane.b32.xlu0 %v6001_v39, %s6276_s6 }
 0x464   : > { %4220 = vst.msk [vmem:[#allocation4 + $0xa0] sm:$0xf] %vm1670_vm12, %v4145_v47  ;;  %v5025_v31 = vpop.f32.mrf.mxu1  ;;  %5088 = vmatmul.mubr.bf16.gmra.mxu1 %v5737_v25 }
 0x465   : > { %2885 = vrot.lane.b32.xlu1 %v8628_v18, %s6270_s10  ;;  %v3634_v50 = vpop.permute.xlu0 %3633  ;;  %v5026_v60 = vadd.f32 %v8653_v53, %v5025_v31  ;;  %5770 = vmatprep.mubr.msk.bf16.mxu1 %vm2183_vm14, %v6194_v34 }
 0x466   : > { %3708 = vst.msk [vmem:[#allocation4 + $0xa8] sm:$0xf] %vm1402_vm10, %v3634_v50  ;;  %v5027_v18 = vpop.f32.mrf.mxu1 }
 0x467   : > { %v4401_v32 = vpop.permute.xlu1 %4400  ;;  %4416 = vrot.lane.b32.xlu0 %v6033_v43, %s6277_s7  ;;  %v5178_v3 = vadd.f32 %v5146_v15, %v5026_v60 }
 0x468   : > { %4476 = vst.msk [vmem:[#allocation4 + $0xa0] sm:$0xf] %vm1823_vm13, %v4401_v32  ;;  %v5028_v28 = vpop.f32.mrf.mxu1 }
 0x469   : > { %3141 = vrot.lane.b32.xlu1 %v8352_v23, %s6271_s11  ;;  %v5210_v54 = vmax.f32 %v5178_v3, 0.0  ;;  %v3890_v38 = vpop.permute.xlu0 %3889  ;;  %v5029_v48 = vadd.f32 %v8653_v53, %v5028_v28 }
 0x46a   : > { %3964 = vst.msk [vmem:[#allocation4 + $0xa8] sm:$0xf] %vm1539_vm11, %v3890_v38  ;;  %v5030_v23 = vpop.f32.mrf.mxu1  ;;  %v6196_v38 = vld [vmem:[#allocation4 + $0xb4] ss:$8 sps:$4 sm:$0xff]  }
 0x46b   : > { %v3124_v26 = vpop.permute.xlu1 %3123  ;;  %2883 = vrot.lane.b32.xlu0 %v8641_v5, %s6270_s10  ;;  %5242 = vst.msk [vmem:[%s8674_s30 + $0x10] sm:$0xff] %vm2183_vm14, %v5210_v54  ;;  %v5179_v61 = vadd.f32 %v5147_v40, %v5029_v48  ;;  %v5150_v23 = vunpack.c.l.bf16 %v9156_v62  ;;  %s6069_s10 = sshll.u32 %s6333_s22, 12  ;;  %s8932_s22 = scalar_lea.sflag [#allocation6], %s215_s15 }
 0x46c   : > { %3197 = vst.msk [vmem:[#allocation4 + $0xb0] sm:$0xf] %vm1086_vm8, %v3124_v26 }
 0x46d   : > { %3397 = vrot.lane.b32.xlu1 %v6002_v35, %s6272_s12  ;;  %v5211_v52 = vmax.f32 %v5179_v61, 0.0  ;;  %v4147_v9 = vpop.permute.xlu0 %4146 }
 0x46e   : > { %4221 = vst.msk [vmem:[#allocation4 + $0xa8] sm:$0xf] %vm1670_vm12, %v4147_v9 }
 0x46f   : > { %v3380_v22 = vpop.permute.xlu1 %3379  ;;  %3139 = vrot.lane.b32.xlu0 %v8350_v7, %s6271_s11  ;;  %5243 = vst.msk [vmem:[%s8674_s30 + $0x18] sm:$0xff] %vm2183_vm14, %v5211_v52  ;;  %v4700_v29 = vld [vmem:[#allocation4 + $0xa0] sm:$0xff]  ;;  %s5286_s11 = sshll.u32 %s8674_s30, 4  ;;  %s8926_s11 = int_to_ptr.vmem [resolvable:$true] %s5286_s11 }
 0x470   : > { %3453 = vst.msk [vmem:[#allocation4 + $0xb0] sm:$0xf] %vm1217_vm9, %v3380_v22 }
 0x471   : > { %3653 = vrot.lane.b32.xlu1 %v6034_v21, %s6274_s25  ;;  %v4403_v37 = vpop.permute.xlu0 %4402 }
 0x472   : > { %4477 = vst.msk [vmem:[#allocation4 + $0xa8] sm:$0xf] %vm1823_vm13, %v4403_v37  ;;  %v5151_v37 = vunpack.c.l.bf16 %v9155_v0 }
 0x473   : > { %v3636_v5 = vpop.permute.xlu1 %3635  ;;  %3395 = vrot.lane.b32.xlu0 %v6001_v39, %s6272_s12  ;;  %v6035_v39 = vpack.c.bf16 %v4262_v58, %v4262_v58  ;;  %v5152_v58 = vunpack.c.l.bf16 %v9158_v1 }
 0x474   : > { %3709 = vst.msk [vmem:[#allocation4 + $0xb0] sm:$0xf] %vm1402_vm10, %v3636_v5 }
 0x475   : > { %3909 = vrot.lane.b32.xlu1 %v8391_v49, %s6275_s23  ;;  %v3126_v7 = vpop.permute.xlu0 %3125  ;;  %v4006_v49 = vld [vmem:[#allocation2 + $0x198] sm:$0xff] }
 0x476   : > { %3198 = vst.msk [vmem:[#allocation4 + $0xb8] sm:$0xf] %vm1086_vm8, %v3126_v7  ;;  %v6003_v12 = vpack.c.bf16 %v4006_v49, %v4006_v49 }
 0x477   : > { %v3892_v33 = vpop.permute.xlu1 %3891  ;;  %3651 = vrot.lane.b32.xlu0 %v6033_v43, %s6274_s25 }
 0x478   : > { %3965 = vst.msk [vmem:[#allocation4 + $0xb0] sm:$0xf] %vm1539_vm11, %v3892_v33 }
 0x479   : > { %4166 = vrot.lane.b32.xlu1 %v6004_v51, %s6276_s6  ;;  %v3382_v4 = vpop.permute.xlu0 %3381  ;;  %v4701_v41 = vld [vmem:[#allocation4 + $0xa8] sm:$0xff] }
 0x47a   : > { %3454 = vst.msk [vmem:[#allocation4 + $0xb8] sm:$0xf] %vm1217_vm9, %v3382_v4  ;;  %v5739_v35 = vcombine.low %v4700_v29, %v4701_v41 }
 0x47b   : > { %v4149_v55 = vpop.permute.xlu1 %4148  ;;  %3907 = vrot.lane.b32.xlu0 %v8389_v44, %s6275_s23  ;;  %s8924_s23 = scalar_lea.hbm %s8977_s5, %s6069_s10 }
 0x47c   : > { %4222 = vst.msk [vmem:[#allocation4 + $0xb0] sm:$0xf] %vm1670_vm12, %v4149_v55  ;;  %v5033_v16 = vpop.f32.mrf.mxu1  ;;  %5096 = vmatmul.mubr.bf16.gmra.mxu1 %v5739_v35 }
 0x47d   : > { %4422 = vrot.lane.b32.xlu1 %v6036_v13, %s6277_s7  ;;  %v3638_v8 = vpop.permute.xlu0 %3637  ;;  %v5034_v47 = vadd.f32 %v8653_v53, %v5033_v16  ;;  %5771 = vmatprep.mubr.msk.bf16.mxu1 %vm2183_vm14, %v6196_v38 }
 0x47e   : > { %3710 = vst.msk [vmem:[#allocation4 + $0xb8] sm:$0xf] %vm1402_vm10, %v3638_v8  ;;  %v5035_v44 = vpop.f32.mrf.mxu1 }
 0x47f   : > { %v4405_v21 = vpop.permute.xlu1 %4404  ;;  %4164 = vrot.lane.b32.xlu0 %v6003_v12, %s6276_s6  ;;  %v5180_v59 = vadd.f32 %v5148_v19, %v5034_v47  ;;  %v6198_v12 = vld [vmem:[#allocation4 + $0xc4] ss:$8 sps:$4 sm:$0xff]   ;;  %s6208_s6 = scalar_lea.vmem %s8926_s11, 4096 }
 0x480   : > { %4478 = vst.msk [vmem:[#allocation4 + $0xb0] sm:$0xf] %vm1823_vm13, %v4405_v21  ;;  %v5036_v42 = vpop.f32.mrf.mxu1  ;;  %p6209_p11 = scmp.ne.s32.totalorder %s8926_s11, %s6208_s6 }
 0x481   : > { %v5212_v27 = vmax.f32 %v5180_v59, 0.0  ;;  %v3894_v24 = vpop.permute.xlu0 %3893  ;;  %v5037_v25 = vadd.f32 %v8653_v53, %v5036_v42  ;;  %v5153_v59 = vunpack.c.l.bf16 %v9157_v10 }
 0x482   : > { %3966 = vst.msk [vmem:[#allocation4 + $0xb8] sm:$0xf] %vm1539_vm11, %v3894_v24  ;;  %v5038_v15 = vpop.f32.mrf.mxu1  ;;  %p6210_p12 = pnand %p6209_p11, %p6350_p5 }
 0x483   : > { %v2874_v2 = vpop.permute.xlu1 %2873  ;;  %4420 = vrot.lane.b32.xlu0 %v6035_v39, %s6277_s7  ;;  %5244 = vst.msk [vmem:[%s8674_s30 + $0x20] sm:$0xff] %vm2183_vm14, %v5212_v27  ;;  %v5181_v32 = vadd.f32 %v5149_v11, %v5037_v25  ;;  %s6279_s7 = smov [#allocation5]  }
 0x484   : > { %2944 = vst.msk [vmem:[#allocation4 + $0xc8] sm:$0xf] %vm794_vm7, %v2874_v2  ;;  %p6211_p13 = pneg %p6210_p12  ;;  %s6212_s9 = sshll.u32 %s6279_s7, 4  ;;  %s6213_s9 = int_to_ptr.vmem [resolvable:$false] %s6212_s9 }
 0x485   : > { %v5213_v43 = vmax.f32 %v5181_v32, 0.0  ;;  %v4151_v56 = vpop.permute.xlu0 %4150  ;;  %s6214_s8 = scalar_lea.vmem %s6213_s9, 8192  ;;  %p6215_p0 = scmp.lt.s32.totalorder %s8926_s11, %s6213_s9 }
 0x486   : > { %4223 = vst.msk [vmem:[#allocation4 + $0xb8] sm:$0xf] %vm1670_vm12, %v4151_v56  ;;  %p6216_p1 = scmp.lt.s32.totalorder %s6214_s8, %s6208_s6 }
 0x487   : > { %v3130_v31 = vpop.permute.xlu1 %3129  ;;  %5245 = vst.msk [vmem:[%s8674_s30 + $0x28] sm:$0xff] %vm2183_vm14, %v5213_v43  ;;  %v4702_v28 = vld [vmem:[#allocation4 + $0xb0] sm:$0xff] }
 0x488   : > { %3200 = vst.msk [vmem:[#allocation4 + $0xc8] sm:$0xf] %vm1086_vm8, %v3130_v31  ;;  %p6217_p2 = por %p6216_p1, %p6215_p0 }
 0x489   : > { %v4407_v60 = vpop.permute.xlu0 %4406 }
 0x48a   : > { %4479 = vst.msk [vmem:[#allocation4 + $0xb8] sm:$0xf] %vm1823_vm13, %v4407_v60  ;;  %p6218_p3 = pnand %p6217_p2, %p6211_p13 }
 0x48b   : > { %v3386_v50 = vpop.permute.xlu1 %3385 }
 0x48c   : > { %3456 = vst.msk [vmem:[#allocation4 + $0xc8] sm:$0xf] %vm1217_vm9, %v3386_v50 }
 0x48d   : > { %v3128_v3 = vpop.permute.xlu0 %3127 }
 0x48e   : > { %3199 = vst.msk [vmem:[#allocation4 + $0xc0] sm:$0xf] %vm1086_vm8, %v3128_v3  ;;  %v5154_v3 = vunpack.c.l.bf16 %v9166_v46  ;;  %v5155_v46 = vunpack.c.l.bf16 %v9165_v30 }
 0x48f   : > { %v3642_v18 = vpop.permute.xlu1 %3641 }
 0x490   : > { %3712 = vst.msk [vmem:[#allocation4 + $0xc8] sm:$0xf] %vm1402_vm10, %v3642_v18 }
 0x491   : > { %v3384_v26 = vpop.permute.xlu0 %3383  ;;  %v4703_v54 = vld [vmem:[#allocation4 + $0xb8] sm:$0xff] }
 0x492   : > { %3455 = vst.msk [vmem:[#allocation4 + $0xc0] sm:$0xf] %vm1217_vm9, %v3384_v26  ;;  %v5741_v48 = vcombine.low %v4702_v28, %v4703_v54 }
 0x493   : > { %v3898_v40 = vpop.permute.xlu1 %3897 }
 0x494   : > { %3968 = vst.msk [vmem:[#allocation4 + $0xc8] sm:$0xf] %vm1539_vm11, %v3898_v40  ;;  %v5041_v22 = vpop.f32.mrf.mxu1  ;;  %5104 = vmatmul.mubr.bf16.gmra.mxu1 %v5741_v48 }
 0x495   : > { %v3640_v52 = vpop.permute.xlu0 %3639  ;;  %v5042_v9 = vadd.f32 %v8653_v53, %v5041_v22  ;;  %5772 = vmatprep.mubr.msk.bf16.mxu1 %vm2183_vm14, %v6198_v12  ;;  %v5157_v12 = vunpack.c.l.bf16 %v9167_v20 }
 0x496   : > { %3711 = vst.msk [vmem:[#allocation4 + $0xc0] sm:$0xf] %vm1402_vm10, %v3640_v52  ;;  %v5043_v63 = vpop.f32.mrf.mxu1 }
 0x497   : > { %v4155_v61 = vpop.permute.xlu1 %4154  ;;  %v5182_v5 = vadd.f32 %v5150_v23, %v5042_v9  ;;  %v6200_v23 = vld [vmem:[#allocation4 + $0xd4] ss:$8 sps:$4 sm:$0xff]  }
 0x498   : > { %4225 = vst.msk [vmem:[#allocation4 + $0xc8] sm:$0xf] %vm1670_vm12, %v4155_v61  ;;  %v5044_v14 = vpop.f32.mrf.mxu1 }
 0x499   : > { %v5214_v33 = vmax.f32 %v5182_v5, 0.0  ;;  %v3896_v62 = vpop.permute.xlu0 %3895  ;;  %v5045_v45 = vadd.f32 %v8653_v53, %v5044_v14 }
 0x49a   : > { %3967 = vst.msk [vmem:[#allocation4 + $0xc0] sm:$0xf] %vm1539_vm11, %v3896_v62  ;;  %v5046_v6 = vpop.f32.mrf.mxu1 }
 0x49b   : > { %v4411_v51 = vpop.permute.xlu1 %4410  ;;  %5246 = vst.msk [vmem:[%s8674_s30 + $0x30] sm:$0xff] %vm2183_vm14, %v5214_v33  ;;  %v5183_v7 = vadd.f32 %v5151_v37, %v5045_v45 }
 0x49c   : > { %4481 = vst.msk [vmem:[#allocation4 + $0xc8] sm:$0xf] %vm1823_vm13, %v4411_v51 }
 0x49d   : > { %v5215_v57 = vmax.f32 %v5183_v7, 0.0  ;;  %v4153_v0 = vpop.permute.xlu0 %4152 }
 0x49e   : > { %4224 = vst.msk [vmem:[#allocation4 + $0xc0] sm:$0xf] %vm1670_vm12, %v4153_v0 }
 0x49f   : > { %v2878_v36 = vpop.permute.xlu1 %2877  ;;  %5247 = vst.msk [vmem:[%s8674_s30 + $0x38] sm:$0xff] %vm2183_vm14, %v5215_v57 }
 0x4a0   : > { %2946 = vst.msk [vmem:[#allocation4 + $0xd8] sm:$0xf] %vm794_vm7, %v2878_v36 }
 0x4a1   : > { %v4409_v49 = vpop.permute.xlu0 %4408 }
 0x4a2   : > { %4480 = vst.msk [vmem:[#allocation4 + $0xc0] sm:$0xf] %vm1823_vm13, %v4409_v49  ;;  %v5156_v49 = vunpack.c.l.bf16 %v9168_v17 }
 0x4a3   : > { %v3134_v13 = vpop.permute.xlu1 %3133  ;;  %v4705_v35 = vld [vmem:[#allocation4 + $0xc8] sm:$0xff] }
 0x4a4   : > { %3202 = vst.msk [vmem:[#allocation4 + $0xd8] sm:$0xf] %vm1086_vm8, %v3134_v13 }
 0x4a5   : > { %v2876_v4 = vpop.permute.xlu0 %2875 }
 0x4a6   : > { %2945 = vst.msk [vmem:[#allocation4 + $0xd0] sm:$0xf] %vm794_vm7, %v2876_v4 }
 0x4a7   : > { %v3390_v55 = vpop.permute.xlu1 %3389 }
 0x4a8   : > { %3458 = vst.msk [vmem:[#allocation4 + $0xd8] sm:$0xf] %vm1217_vm9, %v3390_v55 }
 0x4a9   : > { %v3132_v41 = vpop.permute.xlu0 %3131  ;;  %v4704_v34 = vld [vmem:[#allocation4 + $0xc0] sm:$0xff] }
 0x4aa   : > { %3201 = vst.msk [vmem:[#allocation4 + $0xd0] sm:$0xf] %vm1086_vm8, %v3132_v41  ;;  %v5743_v19 = vcombine.low %v4704_v34, %v4705_v35 }
 0x4ab   : > { %v3646_v29 = vpop.permute.xlu1 %3645 }
 0x4ac   : > { %3714 = vst.msk [vmem:[#allocation4 + $0xd8] sm:$0xf] %vm1402_vm10, %v3646_v29  ;;  %v5049_v16 = vpop.f32.mrf.mxu1  ;;  %5112 = vmatmul.mubr.bf16.gmra.mxu1 %v5743_v19 }
 0x4ad   : > { %v3388_v8 = vpop.permute.xlu0 %3387  ;;  %v5050_v47 = vadd.f32 %v8653_v53, %v5049_v16  ;;  %5773 = vmatprep.mubr.msk.bf16.mxu1 %vm2183_vm14, %v6200_v23  ;;  %v6204_v23 = vld [vmem:[#allocation4 + $0xf4] ss:$8 sps:$4 sm:$0xff]  }
 0x4ae   : > { %3457 = vst.msk [vmem:[#allocation4 + $0xd0] sm:$0xf] %vm1217_vm9, %v3388_v8  ;;  %v5051_v44 = vpop.f32.mrf.mxu1 }
 0x4af   : > { %v3902_v21 = vpop.permute.xlu1 %3901  ;;  %v5184_v39 = vadd.f32 %v5152_v58, %v5050_v47  ;;  %v6202_v44 = vld [vmem:[#allocation4 + $0xe4] ss:$8 sps:$4 sm:$0xff]  }
 0x4b0   : > { %3970 = vst.msk [vmem:[#allocation4 + $0xd8] sm:$0xf] %vm1539_vm11, %v3902_v21  ;;  %v5052_v2 = vpop.f32.mrf.mxu1 }
 0x4b1   : > { %v5216_v42 = vmax.f32 %v5184_v39, 0.0  ;;  %v3644_v1 = vpop.permute.xlu0 %3643  ;;  %v5053_v27 = vadd.f32 %v8653_v53, %v5052_v2 }
 0x4b2   : > { %3713 = vst.msk [vmem:[#allocation4 + $0xd0] sm:$0xf] %vm1402_vm10, %v3644_v1  ;;  %v5054_v24 = vpop.f32.mrf.mxu1 }
 0x4b3   : > { %v4159_v11 = vpop.permute.xlu1 %4158  ;;  %5248 = vst.msk [vmem:[%s8674_s30 + $0x40] sm:$0xff] %vm2183_vm14, %v5216_v42  ;;  %v5185_v25 = vadd.f32 %v5153_v59, %v5053_v27 }
 0x4b4   : > { %4227 = vst.msk [vmem:[#allocation4 + $0xd8] sm:$0xf] %vm1670_vm12, %v4159_v11 }
 0x4b5   : > { %v5217_v32 = vmax.f32 %v5185_v25, 0.0  ;;  %v3900_v10 = vpop.permute.xlu0 %3899 }
 0x4b6   : > { %3969 = vst.msk [vmem:[#allocation4 + $0xd0] sm:$0xf] %vm1539_vm11, %v3900_v10 }
 0x4b7   : > { %v4415_v15 = vpop.permute.xlu1 %4414  ;;  %5249 = vst.msk [vmem:[%s8674_s30 + $0x48] sm:$0xff] %vm2183_vm14, %v5217_v32  ;;  %v9198_v32 = vld [vmem:[#allocation33_spill] sm:$0xff] }
 0x4b8   : > { %4483 = vst.msk [vmem:[#allocation4 + $0xd8] sm:$0xf] %vm1823_vm13, %v4415_v15  ;;  %v5158_v10 = vunpack.c.l.bf16 %v9198_v32 }
 0x4b9   : > { %v4157_v43 = vpop.permute.xlu0 %4156 }
 0x4ba   : > { %4226 = vst.msk [vmem:[#allocation4 + $0xd0] sm:$0xf] %vm1670_vm12, %v4157_v43 }
 0x4bb   : > { %v2882_v31 = vpop.permute.xlu1 %2881 }
 0x4bc   : > { %2948 = vst.msk [vmem:[#allocation4 + $0xe8] sm:$0xf] %vm794_vm7, %v2882_v31 }
 0x4bd   : > { %v4413_v50 = vpop.permute.xlu0 %4412 }
 0x4be   : > { %4482 = vst.msk [vmem:[#allocation4 + $0xd0] sm:$0xf] %vm1823_vm13, %v4413_v50 }
 0x4bf   : > { %v3138_v56 = vpop.permute.xlu1 %3137  ;;  %v4707_v48 = vld [vmem:[#allocation4 + $0xd8] sm:$0xff] }
 0x4c0   : > { %3204 = vst.msk [vmem:[#allocation4 + $0xe8] sm:$0xf] %vm1086_vm8, %v3138_v56 }
 0x4c1   : > { %v2880_v18 = vpop.permute.xlu0 %2879 }
 0x4c2   : > { %2947 = vst.msk [vmem:[#allocation4 + $0xe0] sm:$0xf] %vm794_vm7, %v2880_v18  ;;  %v9199_v18 = vld [vmem:[#allocation32_spill] sm:$0xff] }
 0x4c3   : > { %v3394_v60 = vpop.permute.xlu1 %3393 }
 0x4c4   : > { %3460 = vst.msk [vmem:[#allocation4 + $0xe8] sm:$0xf] %vm1217_vm9, %v3394_v60  ;;  %v5057_v26 = vpop.f32.mrf.mxu1 }
 0x4c5   : > { %v3136_v28 = vpop.permute.xlu0 %3135  ;;  %v5058_v54 = vadd.f32 %v8653_v53, %v5057_v26  ;;  %v4706_v38 = vld [vmem:[#allocation4 + $0xd0] sm:$0xff] }
 0x4c6   : > { %3203 = vst.msk [vmem:[#allocation4 + $0xe0] sm:$0xf] %vm1086_vm8, %v3136_v28  ;;  %v5059_v61 = vpop.f32.mrf.mxu1  ;;  %v5745_v22 = vcombine.low %v4706_v38, %v4707_v48 }
 0x4c7   : > { %v3650_v40 = vpop.permute.xlu1 %3649  ;;  %v5186_v52 = vadd.f32 %v5154_v3, %v5058_v54  ;;  %v5159_v3 = vunpack.c.l.bf16 %v9199_v18 }
 0x4c8   : > { %3716 = vst.msk [vmem:[#allocation4 + $0xe8] sm:$0xf] %vm1402_vm10, %v3650_v40  ;;  %v5060_v63 = vpop.f32.mrf.mxu1  ;;  %5120 = vmatmul.mubr.bf16.gmra.mxu1 %v5745_v22  ;;  %v9200_v22 = vld [vmem:[#allocation36_spill] sm:$0xff] }
 0x4c9   : > { %v5218_v5 = vmax.f32 %v5186_v52, 0.0  ;;  %v3392_v37 = vpop.permute.xlu0 %3391  ;;  %v5061_v51 = vadd.f32 %v8653_v53, %v5060_v63  ;;  %5774 = vmatprep.mubr.msk.bf16.mxu1 %vm2183_vm14, %v6202_v44  ;;  %v5160_v52 = vunpack.c.l.bf16 %v9200_v22  ;;  %v9205_v44 = vld [vmem:[#allocation39_spill] sm:$0xff] }
 0x4ca   : > { %3459 = vst.msk [vmem:[#allocation4 + $0xe0] sm:$0xf] %vm1217_vm9, %v3392_v37  ;;  %v5062_v14 = vpop.f32.mrf.mxu1  ;;  %v9201_v37 = vld [vmem:[#allocation35_spill] sm:$0xff] }
 0x4cb   : > { %v3906_v9 = vpop.permute.xlu1 %3905  ;;  %5250 = vst.msk [vmem:[%s8674_s30 + $0x50] sm:$0xff] %vm2183_vm14, %v5218_v5  ;;  %v5187_v33 = vadd.f32 %v5155_v46, %v5061_v51  ;;  %v5161_v51 = vunpack.c.l.bf16 %v9201_v37 }
 0x4cc   : > { %3972 = vst.msk [vmem:[#allocation4 + $0xe8] sm:$0xf] %vm1539_vm11, %v3906_v9 }
 0x4cd   : > { %v5219_v45 = vmax.f32 %v5187_v33, 0.0  ;;  %v3648_v30 = vpop.permute.xlu0 %3647 }
 0x4ce   : > { %3715 = vst.msk [vmem:[#allocation4 + $0xe0] sm:$0xf] %vm1402_vm10, %v3648_v30 }
 0x4cf   : > { %v4163_v62 = vpop.permute.xlu1 %4162  ;;  %5251 = vst.msk [vmem:[%s8674_s30 + $0x58] sm:$0xff] %vm2183_vm14, %v5219_v45 }
 0x4d0   : > { %4229 = vst.msk [vmem:[#allocation4 + $0xe8] sm:$0xf] %vm1670_vm12, %v4163_v62 }
 0x4d1   : > { %v3904_v7 = vpop.permute.xlu0 %3903 }
 0x4d2   : > { %3971 = vst.msk [vmem:[#allocation4 + $0xe0] sm:$0xf] %vm1539_vm11, %v3904_v7  ;;  %v9202_v7 = vld [vmem:[#allocation38_spill] sm:$0xff] }
 0x4d3   : > { %v4419_v6 = vpop.permute.xlu1 %4418 }
 0x4d4   : > { %4485 = vst.msk [vmem:[#allocation4 + $0xe8] sm:$0xf] %vm1823_vm13, %v4419_v6 }
 0x4d5   : > { %v4161_v57 = vpop.permute.xlu0 %4160 }
 0x4d6   : > { %4228 = vst.msk [vmem:[#allocation4 + $0xe0] sm:$0xf] %vm1670_vm12, %v4161_v57 }
 0x4d7   : > { %v2886_v36 = vpop.permute.xlu1 %2885 }
 0x4d8   : > { %2950 = vst.msk [vmem:[#allocation4 + $0xf8] sm:$0xf] %vm794_vm7, %v2886_v36  ;;  %v5162_v36 = vunpack.c.l.bf16 %v9202_v7 }
 0x4d9   : > { %v4417_v13 = vpop.permute.xlu0 %4416 }
 0x4da   : > { %4484 = vst.msk [vmem:[#allocation4 + $0xe0] sm:$0xf] %vm1823_vm13, %v4417_v13 }
 0x4db   : > { %v3142_v0 = vpop.permute.xlu1 %3141  ;;  %v4709_v47 = vld [vmem:[#allocation4 + $0xe8] sm:$0xff] }
 0x4dc   : > { %3206 = vst.msk [vmem:[#allocation4 + $0xf8] sm:$0xf] %vm1086_vm8, %v3142_v0  ;;  %v5065_v4 = vpop.f32.mrf.mxu1 }
 0x4dd   : > { %v2884_v29 = vpop.permute.xlu0 %2883  ;;  %v5066_v41 = vadd.f32 %v8653_v53, %v5065_v4 }
 0x4de   : > { %2949 = vst.msk [vmem:[#allocation4 + $0xf0] sm:$0xf] %vm794_vm7, %v2884_v29  ;;  %v5067_v34 = vpop.f32.mrf.mxu1 }
 0x4df   : > { %v3398_v55 = vpop.permute.xlu1 %3397  ;;  %v5188_v35 = vadd.f32 %v5156_v49, %v5066_v41 }
 0x4e0   : > { %3462 = vst.msk [vmem:[#allocation4 + $0xf8] sm:$0xf] %vm1217_vm9, %v3398_v55  ;;  %v5068_v58 = vpop.f32.mrf.mxu1  ;;  %v9203_v55 = vld [vmem:[#allocation37_spill] sm:$0xff] }
 0x4e1   : > { %v5220_v21 = vmax.f32 %v5188_v35, 0.0  ;;  %v3140_v17 = vpop.permute.xlu0 %3139  ;;  %v5069_v16 = vadd.f32 %v8653_v53, %v5068_v58  ;;  %v4708_v8 = vld [vmem:[#allocation4 + $0xe0] sm:$0xff]  ;;  %v5163_v4 = vunpack.c.l.bf16 %v9203_v55 }
 0x4e2   : > { %3205 = vst.msk [vmem:[#allocation4 + $0xf0] sm:$0xf] %vm1086_vm8, %v3140_v17  ;;  %v5070_v39 = vpop.f32.mrf.mxu1  ;;  %v5747_v59 = vcombine.low %v4708_v8, %v4709_v47  ;;  %v9204_v58 = vld [vmem:[#allocation40_spill] sm:$0xff] }
 0x4e3   : > { %v3654_v19 = vpop.permute.xlu1 %3653  ;;  %5252 = vst.msk [vmem:[%s8674_s30 + $0x60] sm:$0xff] %vm2183_vm14, %v5220_v21  ;;  %v5189_v11 = vadd.f32 %v5157_v12, %v5069_v16  ;;  %v5164_v21 = vunpack.c.l.bf16 %v9204_v58  ;;  %v5165_v39 = vunpack.c.l.bf16 %v9205_v44 }
 0x4e4   : > { %3718 = vst.msk [vmem:[#allocation4 + $0xf8] sm:$0xf] %vm1402_vm10, %v3654_v19  ;;  %5128 = vmatmul.mubr.bf16.gmra.mxu1 %v5747_v59 }
 0x4e5   : > { %v5221_v2 = vmax.f32 %v5189_v11, 0.0  ;;  %v3396_v42 = vpop.permute.xlu0 %3395  ;;  %5775 = vmatprep.mubr.msk.bf16.mxu1 %vm2183_vm14, %v6204_v23 }
 0x4e6   : > { %3461 = vst.msk [vmem:[#allocation4 + $0xf0] sm:$0xf] %vm1217_vm9, %v3396_v42 }
 0x4e7   : > { %v3910_v20 = vpop.permute.xlu1 %3909  ;;  %5253 = vst.msk [vmem:[%s8674_s30 + $0x68] sm:$0xff] %vm2183_vm14, %v5221_v2 }
 0x4e8   : > { %3974 = vst.msk [vmem:[#allocation4 + $0xf8] sm:$0xf] %vm1539_vm11, %v3910_v20 }
 0x4e9   : > { %v3652_v27 = vpop.permute.xlu0 %3651 }
 0x4ea   : > { %3717 = vst.msk [vmem:[#allocation4 + $0xf0] sm:$0xf] %vm1402_vm10, %v3652_v27  ;;  %v9206_v27 = vld [vmem:[#allocation42_spill] sm:$0xff] }
 0x4eb   : > { %v4167_v1 = vpop.permute.xlu1 %4166 }
 0x4ec   : > { %4231 = vst.msk [vmem:[#allocation4 + $0xf8] sm:$0xf] %vm1670_vm12, %v4167_v1 }
 0x4ed   : > { %v3908_v25 = vpop.permute.xlu0 %3907 }
 0x4ee   : > { %3973 = vst.msk [vmem:[#allocation4 + $0xf0] sm:$0xf] %vm1539_vm11, %v3908_v25 }
 0x4ef   : > { %v4423_v24 = vpop.permute.xlu1 %4422 }
 0x4f0   : > { %4487 = vst.msk [vmem:[#allocation4 + $0xf8] sm:$0xf] %vm1823_vm13, %v4423_v24  ;;  %v5166_v24 = vunpack.c.l.bf16 %v9206_v27 }
 0x4f1   : > { %v4165_v15 = vpop.permute.xlu0 %4164 }
 0x4f2   : > { %4230 = vst.msk [vmem:[#allocation4 + $0xf0] sm:$0xf] %vm1670_vm12, %v4165_v15 }
 0x4f4   : > { %v5073_v31 = vpop.f32.mrf.mxu1 }
 0x4f5   : > { %v4421_v43 = vpop.permute.xlu0 %4420  ;;  %v5074_v56 = vadd.f32 %v8653_v53, %v5073_v31  ;;  %v9207_v31 = vld [vmem:[#allocation41_spill] sm:$0xff] }
 0x4f6   : > { %4486 = vst.msk [vmem:[#allocation4 + $0xf0] sm:$0xf] %vm1823_vm13, %v4421_v43  ;;  %v5075_v50 = vpop.f32.mrf.mxu1  ;;  %v5167_v43 = vunpack.c.l.bf16 %v9207_v31 }
 0x4f7   : > { %v5190_v60 = vadd.f32 %v5158_v10, %v5074_v56 }
 0x4f8   : > { %v5076_v40 = vpop.f32.mrf.mxu1 }
 0x4f9   : > { %v5222_v26 = vmax.f32 %v5190_v60, 0.0  ;;  %v5077_v28 = vadd.f32 %v8653_v53, %v5076_v40 }
 0x4fa   : > { %v5078_v54 = vpop.f32.mrf.mxu1 }
 0x4fb   : > { %5254 = vst.msk [vmem:[%s8674_s30 + $0x70] sm:$0xff] %vm2183_vm14, %v5222_v26  ;;  %v5191_v38 = vadd.f32 %v5159_v3, %v5077_v28  ;;  %v9208_v26 = vld [vmem:[#allocation44_spill] sm:$0xff] }
 0x4fc   : > { %v5168_v28 = vunpack.c.l.bf16 %v9208_v26 }
 0x4fd   : > { %v5223_v48 = vmax.f32 %v5191_v38, 0.0  ;;  %v6206_v61 = vld [vmem:[#allocation4 + $0xf0] ss:$8 sps:$4 sm:$0xff]  }
 0x4fe   : > { %5136 = vmatmul.mubr.bf16.gmra.mxu1 %v6206_v61  ;;  %v9209_v61 = vld [vmem:[#allocation43_spill] sm:$0xff] }
 0x4ff   : > { %5255 = vst.msk [vmem:[%s8674_s30 + $0x78] sm:$0xff] %vm2183_vm14, %v5223_v48  ;;  %v5169_v22 = vunpack.c.l.bf16 %v9209_v61 }
 0x50c   : > { %v5081_v46 = vpop.f32.mrf.mxu1 }
 0x50d   : > { %v5082_v9 = vadd.f32 %v8653_v53, %v5081_v46 }
 0x50e   : > { %v5083_v63 = vpop.f32.mrf.mxu1 }
 0x50f   : > { %v5192_v5 = vadd.f32 %v5160_v52, %v5082_v9 }
 0x510   : > { %v5084_v14 = vpop.f32.mrf.mxu1 }
 0x511   : > { %v5224_v33 = vmax.f32 %v5192_v5, 0.0  ;;  %v5085_v62 = vadd.f32 %v8653_v53, %v5084_v14 }
 0x512   : > { %v5086_v45 = vpop.f32.mrf.mxu1 }
 0x513   : > { %5256 = vst.msk [vmem:[%s8674_s30 + $0x80] sm:$0xff] %vm2183_vm14, %v5224_v33  ;;  %v5193_v30 = vadd.f32 %v5161_v51, %v5085_v62  ;;  %v9210_v51 = vld [vmem:[#allocation46_spill] sm:$0xff] }
 0x514   : > { %v5170_v14 = vunpack.c.l.bf16 %v9210_v51 }
 0x515   : > { %v5225_v6 = vmax.f32 %v5193_v30, 0.0 }
 0x517   : > { %5257 = vst.msk [vmem:[%s8674_s30 + $0x88] sm:$0xff] %vm2183_vm14, %v5225_v6  ;;  %v9211_v6 = vld [vmem:[#allocation45_spill] sm:$0xff] }
 0x518   : > { %v5171_v7 = vunpack.c.l.bf16 %v9211_v6 }
 0x524   : > { %v5089_v57 = vpop.f32.mrf.mxu1 }
 0x525   : > { %v5090_v0 = vadd.f32 %v8653_v53, %v5089_v57 }
 0x526   : > { %v5091_v13 = vpop.f32.mrf.mxu1 }
 0x527   : > { %v5194_v49 = vadd.f32 %v5162_v36, %v5090_v0 }
 0x528   : > { %v5092_v29 = vpop.f32.mrf.mxu1 }
 0x529   : > { %v5226_v41 = vmax.f32 %v5194_v49, 0.0  ;;  %v5093_v34 = vadd.f32 %v8653_v53, %v5092_v29 }
 0x52a   : > { %v5094_v35 = vpop.f32.mrf.mxu1 }
 0x52b   : > { %5258 = vst.msk [vmem:[%s8674_s30 + $0x90] sm:$0xff] %vm2183_vm14, %v5226_v41  ;;  %v5195_v12 = vadd.f32 %v5163_v4, %v5093_v34  ;;  %v9212_v4 = vld [vmem:[#allocation49_spill] sm:$0xff] }
 0x52c   : > { %v5172_v29 = vunpack.c.l.bf16 %v9212_v4 }
 0x52d   : > { %v5227_v19 = vmax.f32 %v5195_v12, 0.0 }
 0x52f   : > { %5259 = vst.msk [vmem:[%s8674_s30 + $0x98] sm:$0xff] %vm2183_vm14, %v5227_v19  ;;  %v9213_v19 = vld [vmem:[#allocation47_spill] sm:$0xff] }
 0x530   : > { %v5173_v58 = vunpack.c.l.bf16 %v9213_v19 }
 0x53c   : > { %v5097_v17 = vpop.f32.mrf.mxu1 }
 0x53d   : > { %v5098_v16 = vadd.f32 %v8653_v53, %v5097_v17 }
 0x53e   : > { %v5099_v8 = vpop.f32.mrf.mxu1 }
 0x53f   : > { %v5196_v47 = vadd.f32 %v5164_v21, %v5098_v16 }
 0x540   : > { %v5100_v59 = vpop.f32.mrf.mxu1 }
 0x541   : > { %v5228_v11 = vmax.f32 %v5196_v47, 0.0  ;;  %v5101_v20 = vadd.f32 %v8653_v53, %v5100_v59 }
 0x542   : > { %v5102_v2 = vpop.f32.mrf.mxu1 }
 0x543   : > { %5260 = vst.msk [vmem:[%s8674_s30 + $0xa0] sm:$0xff] %vm2183_vm14, %v5228_v11  ;;  %v5197_v42 = vadd.f32 %v5165_v39, %v5101_v20  ;;  %v9214_v39 = vld [vmem:[#allocation20_spill] sm:$0xff] }
 0x544   : > { %v5174_v59 = vunpack.c.l.bf16 %v9214_v39 }
 0x545   : > { %v5229_v1 = vmax.f32 %v5197_v42, 0.0 }
 0x547   : > { %5261 = vst.msk [vmem:[%s8674_s30 + $0xa8] sm:$0xff] %vm2183_vm14, %v5229_v1  ;;  %v9215_v1 = vld [vmem:[#allocation34_spill] sm:$0xff] }
 0x548   : > { %v5175_v27 = vunpack.c.l.bf16 %v9215_v1 }
 0x554   : > { %v5105_v25 = vpop.f32.mrf.mxu1 }
 0x555   : > { %v5106_v15 = vadd.f32 %v8653_v53, %v5105_v25 }
 0x556   : > { %v5107_v32 = vpop.f32.mrf.mxu1 }
 0x557   : > { %v5198_v10 = vadd.f32 %v5166_v24, %v5106_v15 }
 0x558   : > { %v5108_v56 = vpop.f32.mrf.mxu1 }
 0x559   : > { %v5230_v50 = vmax.f32 %v5198_v10, 0.0  ;;  %v5109_v60 = vadd.f32 %v8653_v53, %v5108_v56 }
 0x55a   : > { %v5110_v18 = vpop.f32.mrf.mxu1 }
 0x55b   : > { %5262 = vst.msk [vmem:[%s8674_s30 + $0xb0] sm:$0xff] %vm2183_vm14, %v5230_v50  ;;  %v5199_v3 = vadd.f32 %v5167_v43, %v5109_v60 }
 0x55d   : > { %v5231_v40 = vmax.f32 %v5199_v3, 0.0 }
 0x55f   : > { %5263 = vst.msk [vmem:[%s8674_s30 + $0xb8] sm:$0xff] %vm2183_vm14, %v5231_v40 }
 0x56c   : > { %v5113_v54 = vpop.f32.mrf.mxu1 }
 0x56d   : > { %v5114_v38 = vadd.f32 %v8653_v53, %v5113_v54 }
 0x56e   : > { %v5115_v48 = vpop.f32.mrf.mxu1 }
 0x56f   : > { %v5200_v23 = vadd.f32 %v5168_v28, %v5114_v38 }
 0x570   : > { %v5116_v52 = vpop.f32.mrf.mxu1 }
 0x571   : > { %v5232_v46 = vmax.f32 %v5200_v23, 0.0  ;;  %v5117_v9 = vadd.f32 %v8653_v53, %v5116_v52 }
 0x572   : > { %v5118_v63 = vpop.f32.mrf.mxu1 }
 0x573   : > { %5264 = vst.msk [vmem:[%s8674_s30 + $0xc0] sm:$0xff] %vm2183_vm14, %v5232_v46  ;;  %v5201_v5 = vadd.f32 %v5169_v22, %v5117_v9 }
 0x575   : > { %v5233_v37 = vmax.f32 %v5201_v5, 0.0 }
 0x577   : > { %5265 = vst.msk [vmem:[%s8674_s30 + $0xc8] sm:$0xff] %vm2183_vm14, %v5233_v37 }
 0x588   : > { %v5121_v33 = vpop.f32.mrf.mxu1 }
 0x589   : > { %v5122_v62 = vadd.f32 %v8653_v53, %v5121_v33 }
 0x58a   : > { %v5123_v45 = vpop.f32.mrf.mxu1 }
 0x58b   : > { %v5202_v30 = vadd.f32 %v5170_v14, %v5122_v62 }
 0x58c   : > { %v5124_v36 = vpop.f32.mrf.mxu1 }
 0x58d   : > { %v5234_v57 = vmax.f32 %v5202_v30, 0.0  ;;  %v5125_v0 = vadd.f32 %v8653_v53, %v5124_v36 }
 0x58e   : > { %v5126_v13 = vpop.f32.mrf.mxu1 }
 0x58f   : > { %5266 = vst.msk [vmem:[%s8674_s30 + $0xd0] sm:$0xff] %vm2183_vm14, %v5234_v57  ;;  %v5203_v49 = vadd.f32 %v5171_v7, %v5125_v0 }
 0x591   : > { %v5235_v55 = vmax.f32 %v5203_v49, 0.0 }
 0x593   : > { %5267 = vst.msk [vmem:[%s8674_s30 + $0xd8] sm:$0xff] %vm2183_vm14, %v5235_v55 }
 0x5a4   : > { %v5129_v41 = vpop.f32.mrf.mxu1 }
 0x5a5   : > { %v5130_v34 = vadd.f32 %v8653_v53, %v5129_v41 }
 0x5a6   : > { %v5131_v35 = vpop.f32.mrf.mxu1 }
 0x5a7   : > { %v5204_v12 = vadd.f32 %v5172_v29, %v5130_v34 }
 0x5a8   : > { %v5132_v21 = vpop.f32.mrf.mxu1 }
 0x5a9   : > { %v5236_v17 = vmax.f32 %v5204_v12, 0.0  ;;  %v5133_v16 = vadd.f32 %v8653_v53, %v5132_v21 }
 0x5aa   : > { %v5134_v8 = vpop.f32.mrf.mxu1 }
 0x5ab   : > { %5268 = vst.msk [vmem:[%s8674_s30 + $0xe0] sm:$0xff] %vm2183_vm14, %v5236_v17  ;;  %v5205_v47 = vadd.f32 %v5173_v58, %v5133_v16 }
 0x5ad   : > { %v5237_v44 = vmax.f32 %v5205_v47, 0.0 }
 0x5af   : > { %5269 = vst.msk [vmem:[%s8674_s30 + $0xe8] sm:$0xff] %vm2183_vm14, %v5237_v44 }
 0x5be   : > { %v5137_v11 = vpop.f32.mrf.mxu1 }
 0x5bf   : > { %v5138_v20 = vadd.f32 %v8653_v53, %v5137_v11 }
 0x5c0   : > { %v5139_v2 = vpop.f32.mrf.mxu1 }
 0x5c1   : > { %v5206_v42 = vadd.f32 %v5174_v59, %v5138_v20 }
 0x5c2   : > { %v5140_v24 = vpop.f32.mrf.mxu1 }
 0x5c3   : > { %v5238_v25 = vmax.f32 %v5206_v42, 0.0  ;;  %v5141_v15 = vadd.f32 %v8653_v53, %v5140_v24 }
 0x5c4   : > { %v5142_v32 = vpop.f32.mrf.mxu1 }
 0x5c5   : > { %5270 = vst.msk [vmem:[%s8674_s30 + $0xf0] sm:$0xff] %vm2183_vm14, %v5238_v25  ;;  %v5207_v10 = vadd.f32 %v5175_v27, %v5141_v15 }
 0x5c7   : > { %v5239_v31 = vmax.f32 %v5207_v10, 0.0 }
 0x5c9   : > { %5271 = vst.msk [vmem:[%s8674_s30 + $0xf8] sm:$0xff] %vm2183_vm14, %v5239_v31 }
 0x5ca   : > { %6221 = shalt.err (!%p6218_p3)
}
 0x5cb   : > { %s6222_s13 = scalar_lea.hbm %s8924_s23, 4096  ;;  %s6226_s16 = scalar_lea.hbm %s8977_s5, 8192 }
 0x5cc   : > { %p6223_p4 = scmp.ne.s32.totalorder %s8924_s23, %s6222_s13  ;;  %p6227_p9 = scmp.lt.s32.totalorder %s8924_s23, %s8977_s5 }
 0x5cd   : > { %p6228_p10 = scmp.lt.s32.totalorder %s6226_s16, %s6222_s13 }
 0x5ce   : > { %p6224_p7 = pnand %p6223_p4, %p6350_p5 }
 0x5cf   : > { %p6229_p11 = por %p6228_p10, %p6227_p9 }
 0x5d0   : > { %p6225_p8 = pneg %p6224_p7 }
 0x5d2   : > { %p6230_p12 = pnand %p6229_p11, %p6225_p8 }
 0x5d4   : > { %6233 = shalt.err (!%p6230_p12)
}
 0x5d5   : > { %s6280_s30 = smov 128   ;;  %s6281_s10 = smov 8  }
 0x5d6   : > { %6071 = dma.vmem_to_hbm [thread:$0]  (%p6350_p5), %s8926_s11, 4096, %s8924_s23, %s8932_s22, %s6280_s30, %s6280_s30, %s6281_s10  }
 0x5d7 PF: > { %p6077_p13 = scmp.ge.s32.totalorder %s6268_s21, 2  ;;  %s5301_s12 = sand.u32 1, %s6256_s18  }
 0x5d8   : > { %s5302_s25 = scalar_lea.sflag [#allocation6], %s5301_s12 }
 0x5d9   : > { %p6074_p0 = pnand %p6077_p13, %p6354_p6 }
 0x5db   : > { %p6075_p1 = pneg %p6074_p0 }
 0x5dd   : > { %6251 = dma.done.wait (%p6075_p1), %s5302_s25, 4096  }
 0x5de   : > { %6253 = vsyncadd (%p6075_p1), %s5302_s25, 4294963200  ;;  %p15_p2 = scmp.ge.s32.totalorder %s6337_s24, 4   ;;  %s9216_s18 = smov %s6260_s19 }
 0x5df   : > { %s9217_s19 = smov %s6264_s20  ;;  %s9218_s20 = smov %s6348_s27 }
 0x5e0   : > { %s9219_s21 = smov %s6337_s24  ;;  %17 = sbr.rel (!%p15_p2) target bundleno = 3 (0x3), region = 78 }
 0x5e5   :  { %5307 = vsyncpa [#allocation6], 1 }
 0x5e6   :  { %5309 = vsyncpa [#allocation6 + $0x1], 1 }

</bundles_post_ra>
